<compile_context>
chip_gen: v7x
topology: tpu7x:2x2x1
jax: 0.10.0
libtpu: 0.0.40
codegen_flags: <defaults>
</compile_context>

<pallas_src>
import jax
import jax.numpy as jnp
from jax import lax
from jax.experimental import pallas as pl
from jax.experimental.pallas import tpu as pltpu


def _vmem():
    return pl.BlockSpec(memory_space=pltpu.MemorySpace.VMEM)


# ---------------------------------------------------------------------------
# Kernels
# ---------------------------------------------------------------------------
def _conv1_kernel(nblk):
    """One stacked GEMM for all 4 pooling candidates + bias + ReLU + max over row-blocks.

    p_ref: [4*nblk, 128]  (rows: candidate-major, then (b, ph, pw); K=75 zero-padded)
    w_ref: [128, 128]     b_ref: [1, 128]     o_ref: [nblk, 128]
    """
    def kernel(p_ref, w_ref, b_ref, o_ref):
        h = jnp.dot(p_ref[...], w_ref[...], preferred_element_type=jnp.float32) + b_ref[...]
        h = jnp.maximum(h, 0.0)
        o_ref[...] = jnp.maximum(
            jnp.maximum(h[0 * nblk:1 * nblk], h[1 * nblk:2 * nblk]),
            jnp.maximum(h[2 * nblk:3 * nblk], h[3 * nblk:4 * nblk]),
        )
    return kernel


def _conv2_mlp_kernel(nblk):
    """Fused conv2(+bias+ReLU+2x2 max-pool) + fc1 + ReLU + fc2 + ReLU + fc3.

    p_ref:  [4*nblk, 1024]  flattened 13x13x6 input windows (candidate-major, then batch)
    w2_ref: [1024, 512]     block-structured conv2 weights; output cols = (ph, pw, oc)
    b2_ref: [1, 512]        conv2 bias tiled over the 25 pooled positions
    w1f/b1f, w2f/b2f, w3f/b3f: padded FC weights ([512,128]/[128,128]) and biases [1,128]
    o_ref:  [nblk, 128]     rows 0..B-1 hold the logits in lanes 0..9
    """
    def kernel(p_ref, w2_ref, b2_ref, w1f_ref, b1f_ref, w2f_ref, b2f_ref,
               w3f_ref, b3f_ref, o_ref):
        h = jnp.dot(p_ref[...], w2_ref[...], preferred_element_type=jnp.float32) + b2_ref[...]
        h = jnp.maximum(h, 0.0)                                   # [4*nblk, 512]
        # 2x2 max-pool == elementwise max over the 4 candidate row-blocks.
        y2 = jnp.maximum(
            jnp.maximum(h[0 * nblk:1 * nblk], h[1 * nblk:2 * nblk]),
            jnp.maximum(h[2 * nblk:3 * nblk], h[3 * nblk:4 * nblk]),
        )                                                         # [nblk, 512] = flattened features
        f1 = jnp.maximum(
            jnp.dot(y2, w1f_ref[...], preferred_element_type=jnp.float32) + b1f_ref[...], 0.0)
        f2 = jnp.maximum(
            jnp.dot(f1, w2f_ref[...], preferred_element_type=jnp.float32) + b2f_ref[...], 0.0)
        o_ref[...] = jnp.dot(f2, w3f_ref[...], preferred_element_type=jnp.float32) + b3f_ref[...]
    return kernel


# ---------------------------------------------------------------------------
# One-time parameter preparation (all padding / rearrangement hoisted out of the
# per-call forward path).
# ---------------------------------------------------------------------------
def prepare_params(p):
    # conv1 as GEMM: [K=75 -> 128, OC=6 -> 128]; feature order (kh, kw, cin).
    w1 = jnp.transpose(p["conv1_w"], (2, 3, 1, 0)).reshape(75, 6)
    w1 = jnp.pad(w1, ((0, 128 - 75), (0, 128 - 6)))
    b1 = jnp.pad(p["conv1_b"].reshape(1, 6), ((0, 0), (0, 128 - 6)))

    # conv2 as a single window-GEMM.  For a 13x13x6 input window (one per pooling
    # candidate & batch), column (ph*5+pw)*16+oc of the structured matrix holds
    # W2[oc, cin, dy-2ph, dx-2pw] at row (dy*13+dx)*6+cin (zero outside the 5x5 support).
    w2t = jnp.transpose(p["conv2_w"], (2, 3, 1, 0))                 # [kh, kw, cin, oc]
    big = jnp.zeros((25, 13, 13, 6, 16), jnp.float32)
    for ph in range(5):
        for pw in range(5):
            big = big.at[ph * 5 + pw, 2 * ph:2 * ph + 5, 2 * pw:2 * pw + 5, :, :].set(w2t)
    w2s = jnp.transpose(big, (1, 2, 3, 0, 4)).reshape(13 * 13 * 6, 25 * 16)
    w2s = jnp.pad(w2s, ((0, 1024 - 1014), (0, 512 - 400)))          # [1024, 512]
    b2 = jnp.pad(jnp.tile(p["conv2_b"], 25).reshape(1, 400), ((0, 0), (0, 512 - 400)))

    # fc1 permuted to consume features in (ph, pw, oc) order (PyTorch flattens (c, h, w)).
    w1f = p["fc1_w"].reshape(16, 5, 5, 120).transpose(1, 2, 0, 3).reshape(400, 120)
    w1f = jnp.pad(w1f, ((0, 512 - 400), (0, 128 - 120)))
    b1f = jnp.pad(p["fc1_b"].reshape(1, 120), ((0, 0), (0, 128 - 120)))
    w2f = jnp.pad(p["fc2_w"], ((0, 128 - 120), (0, 128 - 84)))
    b2f = jnp.pad(p["fc2_b"].reshape(1, 84), ((0, 0), (0, 128 - 84)))
    w3f = jnp.pad(p["fc3_w"], ((0, 128 - 84), (0, 128 - 10)))
    b3f = jnp.pad(p["fc3_b"].reshape(1, 10), ((0, 0), (0, 128 - 10)))

    return {"w1": w1, "b1": b1, "w2s": w2s, "b2": b2,
            "w1f": w1f, "b1f": b1f, "w2f": w2f, "b2f": b2f, "w3f": w3f, "b3f": b3f}


# ---------------------------------------------------------------------------
# Forward pass (two pallas_calls: conv1 stage; conv2+pool+MLP stage)
# ---------------------------------------------------------------------------
def net_forward(x_nchw, prep):
    B = x_nchw.shape[0]
    x = jnp.transpose(x_nchw, (0, 2, 3, 1))                         # NCHW -> NHWC [B,32,32,3]

    # --- conv1 glue: im2col + 2x2 pooling-candidate stacking (depends only on raw x) ---
    OH, PH, K1 = 28, 14, 75
    slabs = [x[:, i:i + OH, j:j + OH, :] for i in range(5) for j in range(5)]
    patches = jnp.concatenate(slabs, axis=-1)                        # [B,28,28,75]
    n1 = B * PH * PH
    n1p = -(-n1 // 8) * 8                                            # sublane-align row blocks
    cands = []
    for i in (0, 1):
        for j in (0, 1):
            c = patches[:, i::2, j::2, :].reshape(n1, K1)
            cands.append(jnp.pad(c, ((0, n1p - n1), (0, 128 - K1))))
    p1 = jnp.concatenate(cands, axis=0)                              # [4*n1p, 128]

    y1 = pl.pallas_call(
        _conv1_kernel(n1p),
        out_shape=jax.ShapeDtypeStruct((n1p, 128), jnp.float32),
        in_specs=[_vmem()] * 3,
        out_specs=_vmem(),
    )(p1, prep["w1"], prep["b1"])                                    # [n1p, 128]

    # --- conv2 glue: per-candidate 13x13x6 input windows, flattened & padded ---
    y1 = y1[:n1, :6].reshape(B, 14, 14, 6)
    bp = -(-B // 8) * 8                                              # per-candidate row block
    wins = []
    for i in (0, 1):
        for j in (0, 1):
            w = y1[:, i:i + 13, j:j + 13, :].reshape(B, 13 * 13 * 6)  # [B, 1014]
            wins.append(jnp.pad(w, ((0, bp - B), (0, 1024 - 1014))))
    p2 = jnp.concatenate(wins, axis=0)                                # [4*bp, 1024]

    out = pl.pallas_call(
        _conv2_mlp_kernel(bp),
        out_shape=jax.ShapeDtypeStruct((bp, 128), jnp.float32),
        in_specs=[_vmem()] * 9,
        out_specs=_vmem(),
    )(p2, prep["w2s"], prep["b2"], prep["w1f"], prep["b1f"],
      prep["w2f"], prep["b2f"], prep["w3f"], prep["b3f"])

    return out[:B, :10]


# ---------------------------------------------------------------------------
# Pure-JAX reference (for a numerical sanity check) and parameter init
# ---------------------------------------------------------------------------
def reference_forward(x, p):
    dn = ("NCHW", "OIHW", "NCHW")
    z = lax.conv_general_dilated(x, p["conv1_w"], (1, 1), "VALID", dimension_numbers=dn)
    z = jnp.maximum(z + p["conv1_b"][None, :, None, None], 0.0)
    z = lax.reduce_window(z, -jnp.inf, lax.max, (1, 1, 2, 2), (1, 1, 2, 2), "VALID")
    z = lax.conv_general_dilated(z, p["conv2_w"], (1, 1), "VALID", dimension_numbers=dn)
    z = jnp.maximum(z + p["conv2_b"][None, :, None, None], 0.0)
    z = lax.reduce_window(z, -jnp.inf, lax.max, (1, 1, 2, 2), (1, 1, 2, 2), "VALID")
    z = z.reshape(z.shape[0], -1)                                    # NCHW flatten, like .view(-1, 400)
    z = jnp.maximum(z @ p["fc1_w"] + p["fc1_b"], 0.0)
    z = jnp.maximum(z @ p["fc2_w"] + p["fc2_b"], 0.0)
    return z @ p["fc3_w"] + p["fc3_b"]


def init_params(key):
    def unif(k, shape, fan_in):
        bound = 1.0 / (fan_in ** 0.5)
        return jax.random.uniform(k, shape, jnp.float32, -bound, bound)

    ks = jax.random.split(key, 10)
    return {
        "conv1_w": unif(ks[0], (6, 3, 5, 5), 3 * 25),    # [OC, C, KH, KW]
        "conv1_b": unif(ks[1], (6,), 3 * 25),
        "conv2_w": unif(ks[2], (16, 6, 5, 5), 6 * 25),
        "conv2_b": unif(ks[3], (16,), 6 * 25),
        "fc1_w": unif(ks[4], (400, 120), 400),           # stored [in, out]
        "fc1_b": unif(ks[5], (120,), 400),
        "fc2_w": unif(ks[6], (120, 84), 120),
        "fc2_b": unif(ks[7], (84,), 120),
        "fc3_w": unif(ks[8], (84, 10), 84),
        "fc3_b": unif(ks[9], (10,), 84),
    }


if __name__ == "__main__":
    key = jax.random.PRNGKey(0)
    pkey, xkey = jax.random.split(key)
    params = init_params(pkey)
    prep = prepare_params(params)                         # one-time weight prep (off hot path)

    # fc1's 16*5*5 input fixes the spatial size to 32x32 (CIFAR-like); batch = 2.
    x = jax.random.normal(xkey, (2, 3, 32, 32), dtype=jnp.float32)

    out = jax.jit(net_forward)(x, prep)
    out = jax.block_until_ready(out)
    assert out.shape == (2, 10) and out.dtype == jnp.float32

    ref = reference_forward(x, params)
    assert bool(jnp.allclose(out, ref, rtol=3e-2, atol=3e-2))

    print("KERNEL_OK")
</pallas_src>

<mosaic_0001>
module attributes {stable_mosaic.version = 11 : i64} {
  func.func @kernel(%arg0: memref<1568x128xf32, #tpu.memory_space<vmem>>, %arg1: memref<128x128xf32, #tpu.memory_space<vmem>>, %arg2: memref<1x128xf32, #tpu.memory_space<vmem>>, %arg3: memref<392x128xf32, #tpu.memory_space<vmem>>) attributes {dimension_semantics = [], scalar_prefetch = 0 : i64, scratch_operands = 0 : i64, tpu.core_type = #tpu.core_type<tc>} {
    %c0 = arith.constant 0 : index
    %c0_0 = arith.constant 0 : index
    %0 = vector.load %arg0[%c0, %c0_0] : memref<1568x128xf32, #tpu.memory_space<vmem>>, vector<1568x128xf32>
    %c0_1 = arith.constant 0 : index
    %c0_2 = arith.constant 0 : index
    %1 = vector.load %arg1[%c0_1, %c0_2] : memref<128x128xf32, #tpu.memory_space<vmem>>, vector<128x128xf32>
    %cst = arith.constant dense<0.000000e+00> : vector<1568x128xf32>
    %2 = tpu.matmul %0, %1, %cst {dimension_numbers = #tpu.dot_dimension_numbers<[1], [0], [0], [1], [0, 0, 1, 1], [], []>} : vector<1568x128xf32>, vector<128x128xf32>, vector<1568x128xf32> -> vector<1568x128xf32>
    %c0_3 = arith.constant 0 : index
    %c0_4 = arith.constant 0 : index
    %3 = vector.load %arg2[%c0_3, %c0_4] : memref<1x128xf32, #tpu.memory_space<vmem>>, vector<1x128xf32>
    %4 = vector.broadcast %3 : vector<1x128xf32> to vector<1568x128xf32>
    %5 = arith.addf %2, %4 : vector<1568x128xf32>
    %cst_5 = arith.constant 0.000000e+00 : f32
    %6 = vector.broadcast %cst_5 : f32 to vector<1568x128xf32>
    %7 = arith.maximumf %5, %6 : vector<1568x128xf32>
    %8 = vector.extract_strided_slice %7 {offsets = [0, 0], sizes = [392, 128], strides = [1, 1]} : vector<1568x128xf32> to vector<392x128xf32>
    %9 = vector.extract_strided_slice %7 {offsets = [392, 0], sizes = [392, 128], strides = [1, 1]} : vector<1568x128xf32> to vector<392x128xf32>
    %10 = arith.maximumf %8, %9 : vector<392x128xf32>
    %11 = vector.extract_strided_slice %7 {offsets = [784, 0], sizes = [392, 128], strides = [1, 1]} : vector<1568x128xf32> to vector<392x128xf32>
    %12 = vector.extract_strided_slice %7 {offsets = [1176, 0], sizes = [392, 128], strides = [1, 1]} : vector<1568x128xf32> to vector<392x128xf32>
    %13 = arith.maximumf %11, %12 : vector<392x128xf32>
    %14 = arith.maximumf %10, %13 : vector<392x128xf32>
    %c0_6 = arith.constant 0 : index
    %c0_7 = arith.constant 0 : index
    %15 = vector.load %arg3[%c0_6, %c0_7] : memref<392x128xf32, #tpu.memory_space<vmem>>, vector<392x128xf32>
    tpu.vector_store %arg3[%c0_6, %c0_7], %14 {strides = array<i32>} : memref<392x128xf32, #tpu.memory_space<vmem>>, vector<392x128xf32>,
    return
  }
}

module attributes {stable_mosaic.version = 11 : i64} {
  func.func @kernel(%arg0: memref<32x1024xf32, #tpu.memory_space<vmem>>, %arg1: memref<1024x512xf32, #tpu.memory_space<vmem>>, %arg2: memref<1x512xf32, #tpu.memory_space<vmem>>, %arg3: memref<512x128xf32, #tpu.memory_space<vmem>>, %arg4: memref<1x128xf32, #tpu.memory_space<vmem>>, %arg5: memref<128x128xf32, #tpu.memory_space<vmem>>, %arg6: memref<1x128xf32, #tpu.memory_space<vmem>>, %arg7: memref<128x128xf32, #tpu.memory_space<vmem>>, %arg8: memref<1x128xf32, #tpu.memory_space<vmem>>, %arg9: memref<8x128xf32, #tpu.memory_space<vmem>>) attributes {dimension_semantics = [], scalar_prefetch = 0 : i64, scratch_operands = 0 : i64, tpu.core_type = #tpu.core_type<tc>} {
    %c0 = arith.constant 0 : index
    %c0_0 = arith.constant 0 : index
    %0 = vector.load %arg0[%c0, %c0_0] : memref<32x1024xf32, #tpu.memory_space<vmem>>, vector<32x1024xf32>
    %c0_1 = arith.constant 0 : index
    %c0_2 = arith.constant 0 : index
    %1 = vector.load %arg1[%c0_1, %c0_2] : memref<1024x512xf32, #tpu.memory_space<vmem>>, vector<1024x512xf32>
    %cst = arith.constant dense<0.000000e+00> : vector<32x512xf32>
    %2 = tpu.matmul %0, %1, %cst {dimension_numbers = #tpu.dot_dimension_numbers<[1], [0], [0], [1], [0, 0, 1, 1], [], []>} : vector<32x1024xf32>, vector<1024x512xf32>, vector<32x512xf32> -> vector<32x512xf32>
    %c0_3 = arith.constant 0 : index
    %c0_4 = arith.constant 0 : index
    %3 = vector.load %arg2[%c0_3, %c0_4] : memref<1x512xf32, #tpu.memory_space<vmem>>, vector<1x512xf32>
    %4 = vector.broadcast %3 : vector<1x512xf32> to vector<32x512xf32>
    %5 = arith.addf %2, %4 : vector<32x512xf32>
    %cst_5 = arith.constant 0.000000e+00 : f32
    %6 = vector.broadcast %cst_5 : f32 to vector<32x512xf32>
    %7 = arith.maximumf %5, %6 : vector<32x512xf32>
    %8 = vector.extract_strided_slice %7 {offsets = [0, 0], sizes = [8, 512], strides = [1, 1]} : vector<32x512xf32> to vector<8x512xf32>
    %9 = vector.extract_strided_slice %7 {offsets = [8, 0], sizes = [8, 512], strides = [1, 1]} : vector<32x512xf32> to vector<8x512xf32>
    %10 = arith.maximumf %8, %9 : vector<8x512xf32>
    %11 = vector.extract_strided_slice %7 {offsets = [16, 0], sizes = [8, 512], strides = [1, 1]} : vector<32x512xf32> to vector<8x512xf32>
    %12 = vector.extract_strided_slice %7 {offsets = [24, 0], sizes = [8, 512], strides = [1, 1]} : vector<32x512xf32> to vector<8x512xf32>
    %13 = arith.maximumf %11, %12 : vector<8x512xf32>
    %14 = arith.maximumf %10, %13 : vector<8x512xf32>
    %c0_6 = arith.constant 0 : index
    %c0_7 = arith.constant 0 : index
    %15 = vector.load %arg3[%c0_6, %c0_7] : memref<512x128xf32, #tpu.memory_space<vmem>>, vector<512x128xf32>
    %cst_8 = arith.constant dense<0.000000e+00> : vector<8x128xf32>
    %16 = tpu.matmul %14, %15, %cst_8 {dimension_numbers = #tpu.dot_dimension_numbers<[1], [0], [0], [1], [0, 0, 1, 1], [], []>} : vector<8x512xf32>, vector<512x128xf32>, vector<8x128xf32> -> vector<8x128xf32>
    %c0_9 = arith.constant 0 : index
    %c0_10 = arith.constant 0 : index
    %17 = vector.load %arg4[%c0_9, %c0_10] : memref<1x128xf32, #tpu.memory_space<vmem>>, vector<1x128xf32>
    %18 = vector.broadcast %17 : vector<1x128xf32> to vector<8x128xf32>
    %19 = arith.addf %16, %18 : vector<8x128xf32>
    %cst_11 = arith.constant 0.000000e+00 : f32
    %20 = vector.broadcast %cst_11 : f32 to vector<8x128xf32>
    %21 = arith.maximumf %19, %20 : vector<8x128xf32>
    %c0_12 = arith.constant 0 : index
    %c0_13 = arith.constant 0 : index
    %22 = vector.load %arg5[%c0_12, %c0_13] : memref<128x128xf32, #tpu.memory_space<vmem>>, vector<128x128xf32>
    %cst_14 = arith.constant dense<0.000000e+00> : vector<8x128xf32>
    %23 = tpu.matmul %21, %22, %cst_14 {dimension_numbers = #tpu.dot_dimension_numbers<[1], [0], [0], [1], [0, 0, 1, 1], [], []>} : vector<8x128xf32>, vector<128x128xf32>, vector<8x128xf32> -> vector<8x128xf32>
    %c0_15 = arith.constant 0 : index
    %c0_16 = arith.constant 0 : index
    %24 = vector.load %arg6[%c0_15, %c0_16] : memref<1x128xf32, #tpu.memory_space<vmem>>, vector<1x128xf32>
    %25 = vector.broadcast %24 : vector<1x128xf32> to vector<8x128xf32>
    %26 = arith.addf %23, %25 : vector<8x128xf32>
    %cst_17 = arith.constant 0.000000e+00 : f32
    %27 = vector.broadcast %cst_17 : f32 to vector<8x128xf32>
    %28 = arith.maximumf %26, %27 : vector<8x128xf32>
    %c0_18 = arith.constant 0 : index
    %c0_19 = arith.constant 0 : index
    %29 = vector.load %arg7[%c0_18, %c0_19] : memref<128x128xf32, #tpu.memory_space<vmem>>, vector<128x128xf32>
    %cst_20 = arith.constant dense<0.000000e+00> : vector<8x128xf32>
    %30 = tpu.matmul %28, %29, %cst_20 {dimension_numbers = #tpu.dot_dimension_numbers<[1], [0], [0], [1], [0, 0, 1, 1], [], []>} : vector<8x128xf32>, vector<128x128xf32>, vector<8x128xf32> -> vector<8x128xf32>
    %c0_21 = arith.constant 0 : index
    %c0_22 = arith.constant 0 : index
    %31 = vector.load %arg8[%c0_21, %c0_22] : memref<1x128xf32, #tpu.memory_space<vmem>>, vector<1x128xf32>
    %32 = vector.broadcast %31 : vector<1x128xf32> to vector<8x128xf32>
    %33 = arith.addf %30, %32 : vector<8x128xf32>
    %c0_23 = arith.constant 0 : index
    %c0_24 = arith.constant 0 : index
    %34 = vector.load %arg9[%c0_23, %c0_24] : memref<8x128xf32, #tpu.memory_space<vmem>>, vector<8x128xf32>
    tpu.vector_store %arg9[%c0_23, %c0_24], %33 {strides = array<i32>} : memref<8x128xf32, #tpu.memory_space<vmem>>, vector<8x128xf32>,
    return
  }
}

</mosaic_0001>

<bundles_post_ra>
// kernel: net_forward.2
= control target key start
LH: loop header
LB: loop body
LE: loop exit
PB: predicated region body
PF: predicated region fallthrough
CT: control target
= control target key end

     0   :  { %s4039_s1 = inlined_call_operand.vmem [shape: f32[128,128], index: 1, kind: input, shape index: {}]   ;;  %s4040_s0 = inlined_call_operand.vmem [shape: f32[1568,128], index: 0, kind: input, shape index: {}]   ;;  %s4041_s2 = inlined_call_operand.vmem [shape: f32[1,128], index: 2, kind: input, shape index: {}]   ;;  %s4042_s3 = inlined_call_operand.vmem [shape: f32[392,128], index: 3, kind: output, shape index: {}]  }
   0x1   :  { %v210_v0 = vld [vmem:[%s4039_s1] sm:$0xff]  ;;  %v211_v1 = vld [vmem:[%s4039_s1 + $0x8] sm:$0xff]  ;;  %v212_v2 = vld [vmem:[%s4039_s1 + $0x10] sm:$0xff] }
   0x2   :  { %v2213_v3 = vpack.c.bf16 %v211_v1, %v210_v0  ;;  %v213_v4 = vld [vmem:[%s4039_s1 + $0x18] sm:$0xff]  ;;  %v214_v6 = vld [vmem:[%s4039_s1 + $0x20] sm:$0xff]  ;;  %v215_v7 = vld [vmem:[%s4039_s1 + $0x28] sm:$0xff] }
   0x3   :  { %v2217_v5 = vpack.c.bf16 %v213_v4, %v212_v2  ;;  %v2221_v8 = vpack.c.bf16 %v215_v7, %v214_v6  ;;  %v14_v9 = vld [vmem:[%s4040_s0] sm:$0xff]  ;;  %v112_v10 = vld [vmem:[%s4040_s0 + $0x310] sm:$0xff]  ;;  %v217_v12 = vld [vmem:[%s4039_s1 + $0x38] sm:$0xff] }
   0x4   :  { %2214 = vmatprep.subr.bf16.mxu0 %v2213_v3  ;;  %2245 = vmatprep.subr.bf16.mxu1 %v2213_v3  ;;  %v216_v11 = vld [vmem:[%s4039_s1 + $0x30] sm:$0xff]  ;;  %v218_v14 = vld [vmem:[%s4039_s1 + $0x40] sm:$0xff]  ;;  %v219_v15 = vld [vmem:[%s4039_s1 + $0x48] sm:$0xff] }
   0x5   :  { %2216 = vmatpush3.bf16.msra.mxu0 %v2213_v3  ;;  %2253 = vmatpush3.bf16.msra.mxu1 %v2213_v3  ;;  %v2225_v13 = vpack.c.bf16 %v217_v12, %v216_v11  ;;  %v2229_v16 = vpack.c.bf16 %v219_v15, %v218_v14  ;;  %v220_v17 = vld [vmem:[%s4039_s1 + $0x50] sm:$0xff]  ;;  %v221_v18 = vld [vmem:[%s4039_s1 + $0x58] sm:$0xff]  ;;  %v222_v20 = vld [vmem:[%s4039_s1 + $0x60] sm:$0xff] }
   0x6   :  { %2218 = vmatprep.subr.bf16.mxu0 %v2217_v5  ;;  %2246 = vmatprep.subr.bf16.mxu1 %v2217_v5  ;;  %v2233_v19 = vpack.c.bf16 %v221_v18, %v220_v17  ;;  %v223_v21 = vld [vmem:[%s4039_s1 + $0x68] sm:$0xff]  ;;  %v224_v23 = vld [vmem:[%s4039_s1 + $0x70] sm:$0xff]  ;;  %v225_v24 = vld [vmem:[%s4039_s1 + $0x78] sm:$0xff] }
   0x7   :  { %1919 = vmatprep.mubr.f32.mxu0 %v14_v9  ;;  %2066 = vmatprep.mubr.f32.mxu1 %v112_v10  ;;  %v2237_v22 = vpack.c.bf16 %v223_v21, %v222_v20  ;;  %v2241_v25 = vpack.c.bf16 %v225_v24, %v224_v23  ;;  %v15_v26 = vld [vmem:[%s4040_s0 + $0x8] sm:$0xff]  ;;  %v113_v27 = vld [vmem:[%s4040_s0 + $0x318] sm:$0xff]  ;;  %v16_v28 = vld [vmem:[%s4040_s0 + $0x10] sm:$0xff] }
   0x8   :  { %v114_v29 = vld [vmem:[%s4040_s0 + $0x320] sm:$0xff]  ;;  %v17_v30 = vld [vmem:[%s4040_s0 + $0x18] sm:$0xff]  ;;  %v115_v31 = vld [vmem:[%s4040_s0 + $0x328] sm:$0xff] }
   0x9   :  { %2220 = vmatpush3.bf16.msra.mxu0 %v2217_v5  ;;  %2254 = vmatpush3.bf16.msra.mxu1 %v2217_v5  ;;  %v18_v32 = vld [vmem:[%s4040_s0 + $0x20] sm:$0xff]  ;;  %v116_v33 = vld [vmem:[%s4040_s0 + $0x330] sm:$0xff]  ;;  %v19_v34 = vld [vmem:[%s4040_s0 + $0x28] sm:$0xff] }
   0xa   :  { %2222 = vmatprep.subr.bf16.mxu0 %v2221_v8  ;;  %2247 = vmatprep.subr.bf16.mxu1 %v2221_v8  ;;  %v117_v35 = vld [vmem:[%s4040_s0 + $0x338] sm:$0xff]  ;;  %v20_v36 = vld [vmem:[%s4040_s0 + $0x30] sm:$0xff]  ;;  %v118_v37 = vld [vmem:[%s4040_s0 + $0x340] sm:$0xff] }
   0xb   :  { %v21_v38 = vld [vmem:[%s4040_s0 + $0x38] sm:$0xff]  ;;  %v119_v39 = vld [vmem:[%s4040_s0 + $0x348] sm:$0xff]  ;;  %v22_v40 = vld [vmem:[%s4040_s0 + $0x40] sm:$0xff] }
   0xc   :  { %v120_v41 = vld [vmem:[%s4040_s0 + $0x350] sm:$0xff]  ;;  %v23_v42 = vld [vmem:[%s4040_s0 + $0x48] sm:$0xff]  ;;  %v121_v43 = vld [vmem:[%s4040_s0 + $0x358] sm:$0xff] }
   0xd   :  { %2224 = vmatpush3.bf16.msra.mxu0 %v2221_v8  ;;  %2255 = vmatpush3.bf16.msra.mxu1 %v2221_v8  ;;  %v24_v44 = vld [vmem:[%s4040_s0 + $0x50] sm:$0xff]  ;;  %v122_v45 = vld [vmem:[%s4040_s0 + $0x360] sm:$0xff]  ;;  %v25_v46 = vld [vmem:[%s4040_s0 + $0x58] sm:$0xff] }
   0xe   :  { %2226 = vmatprep.subr.bf16.mxu0 %v2225_v13  ;;  %2248 = vmatprep.subr.bf16.mxu1 %v2225_v13  ;;  %v123_v47 = vld [vmem:[%s4040_s0 + $0x368] sm:$0xff]  ;;  %v26_v48 = vld [vmem:[%s4040_s0 + $0x60] sm:$0xff]  ;;  %v124_v49 = vld [vmem:[%s4040_s0 + $0x370] sm:$0xff] }
   0xf   :  { %v27_v50 = vld [vmem:[%s4040_s0 + $0x68] sm:$0xff]  ;;  %v125_v51 = vld [vmem:[%s4040_s0 + $0x378] sm:$0xff]  ;;  %v28_v52 = vld [vmem:[%s4040_s0 + $0x70] sm:$0xff] }
  0x10   :  { %v126_v53 = vld [vmem:[%s4040_s0 + $0x380] sm:$0xff]  ;;  %v29_v54 = vld [vmem:[%s4040_s0 + $0x78] sm:$0xff]  ;;  %v127_v55 = vld [vmem:[%s4040_s0 + $0x388] sm:$0xff] }
  0x11   :  { %2228 = vmatpush3.bf16.msra.mxu0 %v2225_v13  ;;  %2256 = vmatpush3.bf16.msra.mxu1 %v2225_v13  ;;  %v30_v56 = vld [vmem:[%s4040_s0 + $0x80] sm:$0xff]  ;;  %v128_v57 = vld [vmem:[%s4040_s0 + $0x390] sm:$0xff]  ;;  %v31_v58 = vld [vmem:[%s4040_s0 + $0x88] sm:$0xff] }
  0x12   :  { %2230 = vmatprep.subr.bf16.mxu0 %v2229_v16  ;;  %2249 = vmatprep.subr.bf16.mxu1 %v2229_v16  ;;  %v129_v59 = vld [vmem:[%s4040_s0 + $0x398] sm:$0xff]  ;;  %v32_v60 = vld [vmem:[%s4040_s0 + $0x90] sm:$0xff]  ;;  %v130_v61 = vld [vmem:[%s4040_s0 + $0x3a0] sm:$0xff] }
  0x13   :  { %v33_v62 = vld [vmem:[%s4040_s0 + $0x98] sm:$0xff]  ;;  %v131_v63 = vld [vmem:[%s4040_s0 + $0x3a8] sm:$0xff]  ;;  %v34_v0 = vld [vmem:[%s4040_s0 + $0xa0] sm:$0xff] }
  0x14   :  { %v132_v1 = vld [vmem:[%s4040_s0 + $0x3b0] sm:$0xff]  ;;  %v35_v2 = vld [vmem:[%s4040_s0 + $0xa8] sm:$0xff]  ;;  %v133_v3 = vld [vmem:[%s4040_s0 + $0x3b8] sm:$0xff] }
  0x15   :  { %2232 = vmatpush3.bf16.msra.mxu0 %v2229_v16  ;;  %2257 = vmatpush3.bf16.msra.mxu1 %v2229_v16  ;;  %v36_v4 = vld [vmem:[%s4040_s0 + $0xb0] sm:$0xff]  ;;  %v134_v5 = vld [vmem:[%s4040_s0 + $0x3c0] sm:$0xff]  ;;  %v37_v6 = vld [vmem:[%s4040_s0 + $0xb8] sm:$0xff] }
  0x16   :  { %2234 = vmatprep.subr.bf16.mxu0 %v2233_v19  ;;  %2250 = vmatprep.subr.bf16.mxu1 %v2233_v19  ;;  %v135_v7 = vld [vmem:[%s4040_s0 + $0x3c8] sm:$0xff]  ;;  %v38_v8 = vld [vmem:[%s4040_s0 + $0xc0] sm:$0xff]  ;;  %v136_v9 = vld [vmem:[%s4040_s0 + $0x3d0] sm:$0xff] }
  0x17   :  { %v39_v10 = vld [vmem:[%s4040_s0 + $0xc8] sm:$0xff]  ;;  %v137_v11 = vld [vmem:[%s4040_s0 + $0x3d8] sm:$0xff]  ;;  %v40_v12 = vld [vmem:[%s4040_s0 + $0xd0] sm:$0xff] }
  0x18   :  { %v138_v13 = vld [vmem:[%s4040_s0 + $0x3e0] sm:$0xff]  ;;  %v41_v14 = vld [vmem:[%s4040_s0 + $0xd8] sm:$0xff]  ;;  %v139_v15 = vld [vmem:[%s4040_s0 + $0x3e8] sm:$0xff] }
  0x19   :  { %2236 = vmatpush3.bf16.msra.mxu0 %v2233_v19  ;;  %2258 = vmatpush3.bf16.msra.mxu1 %v2233_v19  ;;  %v42_v16 = vld [vmem:[%s4040_s0 + $0xe0] sm:$0xff]  ;;  %v140_v17 = vld [vmem:[%s4040_s0 + $0x3f0] sm:$0xff]  ;;  %v43_v18 = vld [vmem:[%s4040_s0 + $0xe8] sm:$0xff] }
  0x1a   :  { %2238 = vmatprep.subr.bf16.mxu0 %v2237_v22  ;;  %2251 = vmatprep.subr.bf16.mxu1 %v2237_v22  ;;  %v141_v19 = vld [vmem:[%s4040_s0 + $0x3f8] sm:$0xff]  ;;  %v44_v20 = vld [vmem:[%s4040_s0 + $0xf0] sm:$0xff]  ;;  %v142_v21 = vld [vmem:[%s4040_s0 + $0x400] sm:$0xff] }
  0x1b   :  { %v143_v23 = vld [vmem:[%s4040_s0 + $0x408] sm:$0xff]  ;;  %v46_v24 = vld [vmem:[%s4040_s0 + $0x100] sm:$0xff] }
  0x1d   :  { %2240 = vmatpush3.bf16.msra.mxu0 %v2237_v22  ;;  %2259 = vmatpush3.bf16.msra.mxu1 %v2237_v22  ;;  %v45_v22 = vld [vmem:[%s4040_s0 + $0xf8] sm:$0xff] }
  0x1e   :  { %2242 = vmatprep.subr.bf16.mxu0 %v2241_v25  ;;  %2252 = vmatprep.subr.bf16.mxu1 %v2241_v25 }
  0x21   :  { %2244 = vmatpush3.bf16.msra.mxu0 %v2241_v25  ;;  %2260 = vmatpush3.bf16.msra.mxu1 %v2241_v25  ;;  %v144_v25 = vld [vmem:[%s4040_s0 + $0x410] sm:$0xff] }
  0x24   :  { %1920 = vmatmul.mubr.f32.vlgmr.msra.gmra.mrb[0].mxu0 %v15_v26  ;;  %2067 = vmatmul.mubr.f32.vlgmr.msra.gmra.mrb[0].mxu1 %v113_v27  ;;  %v47_v26 = vld [vmem:[%s4040_s0 + $0x108] sm:$0xff]  ;;  %v145_v27 = vld [vmem:[%s4040_s0 + $0x418] sm:$0xff] }
  0x25   :  { %1922 = vmatprep.mubr.f32.mxu0 %v16_v28  ;;  %2069 = vmatprep.mubr.f32.mxu1 %v114_v29  ;;  %v48_v28 = vld [vmem:[%s4040_s0 + $0x110] sm:$0xff]  ;;  %v146_v29 = vld [vmem:[%s4040_s0 + $0x420] sm:$0xff] }
  0x28   :  { %1923 = vmatmul.mubr.f32.gmra.mrb[2].mxu0 %v17_v30  ;;  %2070 = vmatmul.mubr.f32.gmra.mrb[2].mxu1 %v115_v31  ;;  %v49_v30 = vld [vmem:[%s4040_s0 + $0x118] sm:$0xff]  ;;  %v147_v31 = vld [vmem:[%s4040_s0 + $0x428] sm:$0xff] }
  0x29   :  { %1925 = vmatprep.mubr.f32.mxu0 %v18_v32  ;;  %2072 = vmatprep.mubr.f32.mxu1 %v116_v33  ;;  %v50_v32 = vld [vmem:[%s4040_s0 + $0x120] sm:$0xff]  ;;  %v148_v33 = vld [vmem:[%s4040_s0 + $0x430] sm:$0xff] }
  0x2c   :  { %1926 = vmatmul.mubr.f32.gmra.mrb[4].mxu0 %v19_v34  ;;  %2073 = vmatmul.mubr.f32.gmra.mrb[4].mxu1 %v117_v35  ;;  %v51_v34 = vld [vmem:[%s4040_s0 + $0x128] sm:$0xff]  ;;  %v149_v35 = vld [vmem:[%s4040_s0 + $0x438] sm:$0xff] }
  0x2d   :  { %1928 = vmatprep.mubr.f32.mxu0 %v20_v36  ;;  %2075 = vmatprep.mubr.f32.mxu1 %v118_v37  ;;  %v52_v36 = vld [vmem:[%s4040_s0 + $0x130] sm:$0xff]  ;;  %v150_v37 = vld [vmem:[%s4040_s0 + $0x440] sm:$0xff] }
  0x30   :  { %1929 = vmatmul.mubr.f32.gmra.mrb[6].mxu0 %v21_v38  ;;  %2076 = vmatmul.mubr.f32.gmra.mrb[6].mxu1 %v119_v39  ;;  %v53_v38 = vld [vmem:[%s4040_s0 + $0x138] sm:$0xff]  ;;  %v151_v39 = vld [vmem:[%s4040_s0 + $0x448] sm:$0xff] }
  0x31   :  { %1931 = vmatprep.mubr.f32.mxu0 %v22_v40  ;;  %2078 = vmatprep.mubr.f32.mxu1 %v120_v41  ;;  %v54_v40 = vld [vmem:[%s4040_s0 + $0x140] sm:$0xff]  ;;  %v152_v41 = vld [vmem:[%s4040_s0 + $0x450] sm:$0xff] }
  0x34   :  { %1932 = vmatmul.mubr.f32.gmra.mrb[8].mxu0 %v23_v42  ;;  %2079 = vmatmul.mubr.f32.gmra.mrb[8].mxu1 %v121_v43  ;;  %v55_v42 = vld [vmem:[%s4040_s0 + $0x148] sm:$0xff]  ;;  %v153_v43 = vld [vmem:[%s4040_s0 + $0x458] sm:$0xff] }
  0x35   :  { %1934 = vmatprep.mubr.f32.mxu0 %v24_v44  ;;  %2081 = vmatprep.mubr.f32.mxu1 %v122_v45  ;;  %v56_v44 = vld [vmem:[%s4040_s0 + $0x150] sm:$0xff]  ;;  %v154_v45 = vld [vmem:[%s4040_s0 + $0x460] sm:$0xff] }
  0x38   :  { %1935 = vmatmul.mubr.f32.gmra.mrb[10].mxu0 %v25_v46  ;;  %2082 = vmatmul.mubr.f32.gmra.mrb[10].mxu1 %v123_v47  ;;  %v57_v46 = vld [vmem:[%s4040_s0 + $0x158] sm:$0xff]  ;;  %v155_v47 = vld [vmem:[%s4040_s0 + $0x468] sm:$0xff] }
  0x39   :  { %1937 = vmatprep.mubr.f32.mxu0 %v26_v48  ;;  %2084 = vmatprep.mubr.f32.mxu1 %v124_v49  ;;  %v58_v48 = vld [vmem:[%s4040_s0 + $0x160] sm:$0xff]  ;;  %v156_v49 = vld [vmem:[%s4040_s0 + $0x470] sm:$0xff] }
  0x3c   :  { %1938 = vmatmul.mubr.f32.gmra.mrb[12].mxu0 %v27_v50  ;;  %2085 = vmatmul.mubr.f32.gmra.mrb[12].mxu1 %v125_v51  ;;  %v59_v50 = vld [vmem:[%s4040_s0 + $0x168] sm:$0xff]  ;;  %v157_v51 = vld [vmem:[%s4040_s0 + $0x478] sm:$0xff] }
  0x3d   :  { %1940 = vmatprep.mubr.f32.mxu0 %v28_v52  ;;  %2087 = vmatprep.mubr.f32.mxu1 %v126_v53  ;;  %v60_v52 = vld [vmem:[%s4040_s0 + $0x170] sm:$0xff]  ;;  %v158_v53 = vld [vmem:[%s4040_s0 + $0x480] sm:$0xff] }
  0x40   :  { %1941 = vmatmul.mubr.f32.gmra.mrb[14].mxu0 %v29_v54  ;;  %2088 = vmatmul.mubr.f32.gmra.mrb[14].mxu1 %v127_v55  ;;  %v61_v54 = vld [vmem:[%s4040_s0 + $0x178] sm:$0xff]  ;;  %v159_v55 = vld [vmem:[%s4040_s0 + $0x488] sm:$0xff] }
  0x41   :  { %1943 = vmatprep.mubr.f32.mxu0 %v30_v56  ;;  %2090 = vmatprep.mubr.f32.mxu1 %v128_v57  ;;  %v62_v56 = vld [vmem:[%s4040_s0 + $0x180] sm:$0xff]  ;;  %v160_v57 = vld [vmem:[%s4040_s0 + $0x490] sm:$0xff] }
  0x44   :  { %1944 = vmatmul.mubr.f32.gmra.mrb[16].mxu0 %v31_v58  ;;  %2091 = vmatmul.mubr.f32.gmra.mrb[16].mxu1 %v129_v59  ;;  %v63_v58 = vld [vmem:[%s4040_s0 + $0x188] sm:$0xff]  ;;  %v161_v59 = vld [vmem:[%s4040_s0 + $0x498] sm:$0xff] }
  0x45   :  { %1946 = vmatprep.mubr.f32.mxu0 %v32_v60  ;;  %2093 = vmatprep.mubr.f32.mxu1 %v130_v61  ;;  %v64_v60 = vld [vmem:[%s4040_s0 + $0x190] sm:$0xff]  ;;  %v162_v61 = vld [vmem:[%s4040_s0 + $0x4a0] sm:$0xff] }
  0x48   :  { %1947 = vmatmul.mubr.f32.gmra.mrb[18].mxu0 %v33_v62  ;;  %2094 = vmatmul.mubr.f32.gmra.mrb[18].mxu1 %v131_v63  ;;  %v65_v62 = vld [vmem:[%s4040_s0 + $0x198] sm:$0xff]  ;;  %v163_v63 = vld [vmem:[%s4040_s0 + $0x4a8] sm:$0xff] }
  0x49   :  { %1949 = vmatprep.mubr.f32.mxu0 %v34_v0  ;;  %2096 = vmatprep.mubr.f32.mxu1 %v132_v1  ;;  %v66_v0 = vld [vmem:[%s4040_s0 + $0x1a0] sm:$0xff]  ;;  %v164_v1 = vld [vmem:[%s4040_s0 + $0x4b0] sm:$0xff] }
  0x4c   :  { %1950 = vmatmul.mubr.f32.gmra.mrb[20].mxu0 %v35_v2  ;;  %2097 = vmatmul.mubr.f32.gmra.mrb[20].mxu1 %v133_v3  ;;  %v67_v2 = vld [vmem:[%s4040_s0 + $0x1a8] sm:$0xff]  ;;  %v165_v3 = vld [vmem:[%s4040_s0 + $0x4b8] sm:$0xff] }
  0x4d   :  { %1952 = vmatprep.mubr.f32.mxu0 %v36_v4  ;;  %2099 = vmatprep.mubr.f32.mxu1 %v134_v5  ;;  %v68_v4 = vld [vmem:[%s4040_s0 + $0x1b0] sm:$0xff]  ;;  %v166_v5 = vld [vmem:[%s4040_s0 + $0x4c0] sm:$0xff] }
  0x50   :  { %1953 = vmatmul.mubr.f32.gmra.mrb[22].mxu0 %v37_v6  ;;  %2100 = vmatmul.mubr.f32.gmra.mrb[22].mxu1 %v135_v7  ;;  %v69_v6 = vld [vmem:[%s4040_s0 + $0x1b8] sm:$0xff]  ;;  %v167_v7 = vld [vmem:[%s4040_s0 + $0x4c8] sm:$0xff] }
  0x51   :  { %1955 = vmatprep.mubr.f32.mxu0 %v38_v8  ;;  %2102 = vmatprep.mubr.f32.mxu1 %v136_v9  ;;  %v70_v8 = vld [vmem:[%s4040_s0 + $0x1c0] sm:$0xff]  ;;  %v168_v9 = vld [vmem:[%s4040_s0 + $0x4d0] sm:$0xff] }
  0x54   :  { %1956 = vmatmul.mubr.f32.gmra.mrb[24].mxu0 %v39_v10  ;;  %2103 = vmatmul.mubr.f32.gmra.mrb[24].mxu1 %v137_v11  ;;  %v71_v10 = vld [vmem:[%s4040_s0 + $0x1c8] sm:$0xff]  ;;  %v169_v11 = vld [vmem:[%s4040_s0 + $0x4d8] sm:$0xff] }
  0x55   :  { %1958 = vmatprep.mubr.f32.mxu0 %v40_v12  ;;  %2105 = vmatprep.mubr.f32.mxu1 %v138_v13  ;;  %v72_v12 = vld [vmem:[%s4040_s0 + $0x1d0] sm:$0xff]  ;;  %v170_v13 = vld [vmem:[%s4040_s0 + $0x4e0] sm:$0xff] }
  0x58   :  { %1959 = vmatmul.mubr.f32.gmra.mrb[26].mxu0 %v41_v14  ;;  %2106 = vmatmul.mubr.f32.gmra.mrb[26].mxu1 %v139_v15  ;;  %v73_v14 = vld [vmem:[%s4040_s0 + $0x1d8] sm:$0xff]  ;;  %v171_v15 = vld [vmem:[%s4040_s0 + $0x4e8] sm:$0xff] }
  0x59   :  { %1961 = vmatprep.mubr.f32.mxu0 %v42_v16  ;;  %2108 = vmatprep.mubr.f32.mxu1 %v140_v17  ;;  %v74_v16 = vld [vmem:[%s4040_s0 + $0x1e0] sm:$0xff]  ;;  %v172_v17 = vld [vmem:[%s4040_s0 + $0x4f0] sm:$0xff] }
  0x5c   :  { %1962 = vmatmul.mubr.f32.gmra.mrb[28].mxu0 %v43_v18  ;;  %2109 = vmatmul.mubr.f32.gmra.mrb[28].mxu1 %v141_v19  ;;  %v75_v18 = vld [vmem:[%s4040_s0 + $0x1e8] sm:$0xff]  ;;  %v173_v19 = vld [vmem:[%s4040_s0 + $0x4f8] sm:$0xff] }
  0x5d   :  { %1964 = vmatprep.mubr.f32.mxu0 %v44_v20  ;;  %2111 = vmatprep.mubr.f32.mxu1 %v142_v21  ;;  %v76_v20 = vld [vmem:[%s4040_s0 + $0x1f0] sm:$0xff]  ;;  %v174_v21 = vld [vmem:[%s4040_s0 + $0x500] sm:$0xff] }
  0x60   :  { %1965 = vmatmul.mubr.f32.gmra.mrb[30].mxu0 %v45_v22  ;;  %2112 = vmatmul.mubr.f32.gmra.mrb[30].mxu1 %v143_v23  ;;  %v77_v22 = vld [vmem:[%s4040_s0 + $0x1f8] sm:$0xff]  ;;  %v175_v23 = vld [vmem:[%s4040_s0 + $0x508] sm:$0xff] }
  0x61   :  { %1967 = vmatprep.mubr.f32.mxu0 %v46_v24  ;;  %2114 = vmatprep.mubr.f32.mxu1 %v144_v25  ;;  %v78_v24 = vld [vmem:[%s4040_s0 + $0x200] sm:$0xff]  ;;  %v176_v25 = vld [vmem:[%s4040_s0 + $0x510] sm:$0xff] }
  0x64   :  { %1968 = vmatmul.mubr.f32.gmra.mrb[32].mxu0 %v47_v26  ;;  %2115 = vmatmul.mubr.f32.gmra.mrb[32].mxu1 %v145_v27  ;;  %v79_v26 = vld [vmem:[%s4040_s0 + $0x208] sm:$0xff]  ;;  %v177_v27 = vld [vmem:[%s4040_s0 + $0x518] sm:$0xff] }
  0x65   :  { %1970 = vmatprep.mubr.f32.mxu0 %v48_v28  ;;  %2117 = vmatprep.mubr.f32.mxu1 %v146_v29  ;;  %v80_v28 = vld [vmem:[%s4040_s0 + $0x210] sm:$0xff]  ;;  %v178_v29 = vld [vmem:[%s4040_s0 + $0x520] sm:$0xff] }
  0x68   :  { %1971 = vmatmul.mubr.f32.gmra.mrb[34].mxu0 %v49_v30  ;;  %2118 = vmatmul.mubr.f32.gmra.mrb[34].mxu1 %v147_v31  ;;  %v81_v30 = vld [vmem:[%s4040_s0 + $0x218] sm:$0xff]  ;;  %v179_v31 = vld [vmem:[%s4040_s0 + $0x528] sm:$0xff] }
  0x69   :  { %1973 = vmatprep.mubr.f32.mxu0 %v50_v32  ;;  %2120 = vmatprep.mubr.f32.mxu1 %v148_v33  ;;  %v82_v32 = vld [vmem:[%s4040_s0 + $0x220] sm:$0xff]  ;;  %v180_v33 = vld [vmem:[%s4040_s0 + $0x530] sm:$0xff] }
  0x6c   :  { %1974 = vmatmul.mubr.f32.gmra.mrb[36].mxu0 %v51_v34  ;;  %2121 = vmatmul.mubr.f32.gmra.mrb[36].mxu1 %v149_v35  ;;  %v83_v34 = vld [vmem:[%s4040_s0 + $0x228] sm:$0xff]  ;;  %v181_v35 = vld [vmem:[%s4040_s0 + $0x538] sm:$0xff] }
  0x6d   :  { %1976 = vmatprep.mubr.f32.mxu0 %v52_v36  ;;  %2123 = vmatprep.mubr.f32.mxu1 %v150_v37  ;;  %v84_v36 = vld [vmem:[%s4040_s0 + $0x230] sm:$0xff]  ;;  %v182_v37 = vld [vmem:[%s4040_s0 + $0x540] sm:$0xff] }
  0x70   :  { %1977 = vmatmul.mubr.f32.gmra.mrb[38].mxu0 %v53_v38  ;;  %2124 = vmatmul.mubr.f32.gmra.mrb[38].mxu1 %v151_v39  ;;  %v85_v38 = vld [vmem:[%s4040_s0 + $0x238] sm:$0xff]  ;;  %v183_v39 = vld [vmem:[%s4040_s0 + $0x548] sm:$0xff] }
  0x71   :  { %1979 = vmatprep.mubr.f32.mxu0 %v54_v40  ;;  %2126 = vmatprep.mubr.f32.mxu1 %v152_v41  ;;  %v86_v40 = vld [vmem:[%s4040_s0 + $0x240] sm:$0xff]  ;;  %v184_v41 = vld [vmem:[%s4040_s0 + $0x550] sm:$0xff] }
  0x74   :  { %1980 = vmatmul.mubr.f32.gmra.mrb[40].mxu0 %v55_v42  ;;  %2127 = vmatmul.mubr.f32.gmra.mrb[40].mxu1 %v153_v43  ;;  %v87_v42 = vld [vmem:[%s4040_s0 + $0x248] sm:$0xff]  ;;  %v185_v43 = vld [vmem:[%s4040_s0 + $0x558] sm:$0xff] }
  0x75   :  { %1982 = vmatprep.mubr.f32.mxu0 %v56_v44  ;;  %2129 = vmatprep.mubr.f32.mxu1 %v154_v45  ;;  %v88_v44 = vld [vmem:[%s4040_s0 + $0x250] sm:$0xff]  ;;  %v186_v45 = vld [vmem:[%s4040_s0 + $0x560] sm:$0xff] }
  0x78   :  { %1983 = vmatmul.mubr.f32.gmra.mrb[42].mxu0 %v57_v46  ;;  %2130 = vmatmul.mubr.f32.gmra.mrb[42].mxu1 %v155_v47  ;;  %v89_v46 = vld [vmem:[%s4040_s0 + $0x258] sm:$0xff]  ;;  %v187_v47 = vld [vmem:[%s4040_s0 + $0x568] sm:$0xff] }
  0x79   :  { %1985 = vmatprep.mubr.f32.mxu0 %v58_v48  ;;  %2132 = vmatprep.mubr.f32.mxu1 %v156_v49  ;;  %v90_v48 = vld [vmem:[%s4040_s0 + $0x260] sm:$0xff]  ;;  %v188_v49 = vld [vmem:[%s4040_s0 + $0x570] sm:$0xff] }
  0x7c   :  { %1986 = vmatmul.mubr.f32.gmra.mrb[44].mxu0 %v59_v50  ;;  %2133 = vmatmul.mubr.f32.gmra.mrb[44].mxu1 %v157_v51  ;;  %v91_v50 = vld [vmem:[%s4040_s0 + $0x268] sm:$0xff]  ;;  %v189_v51 = vld [vmem:[%s4040_s0 + $0x578] sm:$0xff] }
  0x7d   :  { %1988 = vmatprep.mubr.f32.mxu0 %v60_v52  ;;  %2135 = vmatprep.mubr.f32.mxu1 %v158_v53  ;;  %v92_v52 = vld [vmem:[%s4040_s0 + $0x270] sm:$0xff]  ;;  %v190_v53 = vld [vmem:[%s4040_s0 + $0x580] sm:$0xff] }
  0x80   :  { %1989 = vmatmul.mubr.f32.gmra.mrb[46].mxu0 %v61_v54  ;;  %2136 = vmatmul.mubr.f32.gmra.mrb[46].mxu1 %v159_v55  ;;  %v93_v54 = vld [vmem:[%s4040_s0 + $0x278] sm:$0xff]  ;;  %v191_v55 = vld [vmem:[%s4040_s0 + $0x588] sm:$0xff] }
  0x81   :  { %1991 = vmatprep.mubr.f32.mxu0 %v62_v56  ;;  %2138 = vmatprep.mubr.f32.mxu1 %v160_v57  ;;  %v94_v56 = vld [vmem:[%s4040_s0 + $0x280] sm:$0xff]  ;;  %v192_v57 = vld [vmem:[%s4040_s0 + $0x590] sm:$0xff] }
  0x84   :  { %1992 = vmatmul.mubr.f32.gmra.mrb[48].mxu0 %v63_v58  ;;  %2139 = vmatmul.mubr.f32.gmra.mrb[48].mxu1 %v161_v59  ;;  %v95_v58 = vld [vmem:[%s4040_s0 + $0x288] sm:$0xff]  ;;  %v193_v59 = vld [vmem:[%s4040_s0 + $0x598] sm:$0xff] }
  0x85   :  { %1994 = vmatprep.mubr.f32.mxu0 %v64_v60  ;;  %2141 = vmatprep.mubr.f32.mxu1 %v162_v61  ;;  %v96_v60 = vld [vmem:[%s4040_s0 + $0x290] sm:$0xff]  ;;  %v194_v61 = vld [vmem:[%s4040_s0 + $0x5a0] sm:$0xff] }
  0x88   :  { %1995 = vmatmul.mubr.f32.gmra.mrb[50].mxu0 %v65_v62  ;;  %2142 = vmatmul.mubr.f32.gmra.mrb[50].mxu1 %v163_v63  ;;  %v97_v62 = vld [vmem:[%s4040_s0 + $0x298] sm:$0xff]  ;;  %v195_v63 = vld [vmem:[%s4040_s0 + $0x5a8] sm:$0xff] }
  0x89   :  { %1997 = vmatprep.mubr.f32.mxu0 %v66_v0  ;;  %2144 = vmatprep.mubr.f32.mxu1 %v164_v1  ;;  %v98_v0 = vld [vmem:[%s4040_s0 + $0x2a0] sm:$0xff]  ;;  %v196_v1 = vld [vmem:[%s4040_s0 + $0x5b0] sm:$0xff] }
  0x8c   :  { %1998 = vmatmul.mubr.f32.gmra.mrb[52].mxu0 %v67_v2  ;;  %2145 = vmatmul.mubr.f32.gmra.mrb[52].mxu1 %v165_v3  ;;  %v99_v2 = vld [vmem:[%s4040_s0 + $0x2a8] sm:$0xff]  ;;  %v197_v3 = vld [vmem:[%s4040_s0 + $0x5b8] sm:$0xff] }
  0x8d   :  { %2000 = vmatprep.mubr.f32.mxu0 %v68_v4  ;;  %2147 = vmatprep.mubr.f32.mxu1 %v166_v5  ;;  %v100_v4 = vld [vmem:[%s4040_s0 + $0x2b0] sm:$0xff]  ;;  %v198_v5 = vld [vmem:[%s4040_s0 + $0x5c0] sm:$0xff] }
  0x90   :  { %2001 = vmatmul.mubr.f32.gmra.mrb[54].mxu0 %v69_v6  ;;  %2148 = vmatmul.mubr.f32.gmra.mrb[54].mxu1 %v167_v7  ;;  %v101_v6 = vld [vmem:[%s4040_s0 + $0x2b8] sm:$0xff]  ;;  %v199_v7 = vld [vmem:[%s4040_s0 + $0x5c8] sm:$0xff] }
  0x91   :  { %2003 = vmatprep.mubr.f32.mxu0 %v70_v8  ;;  %2150 = vmatprep.mubr.f32.mxu1 %v168_v9  ;;  %v102_v8 = vld [vmem:[%s4040_s0 + $0x2c0] sm:$0xff]  ;;  %v200_v9 = vld [vmem:[%s4040_s0 + $0x5d0] sm:$0xff] }
  0x94   :  { %2004 = vmatmul.mubr.f32.gmra.mrb[56].mxu0 %v71_v10  ;;  %2151 = vmatmul.mubr.f32.gmra.mrb[56].mxu1 %v169_v11  ;;  %v103_v10 = vld [vmem:[%s4040_s0 + $0x2c8] sm:$0xff]  ;;  %v201_v11 = vld [vmem:[%s4040_s0 + $0x5d8] sm:$0xff] }
  0x95   :  { %2006 = vmatprep.mubr.f32.mxu0 %v72_v12  ;;  %2153 = vmatprep.mubr.f32.mxu1 %v170_v13  ;;  %v104_v12 = vld [vmem:[%s4040_s0 + $0x2d0] sm:$0xff]  ;;  %v202_v13 = vld [vmem:[%s4040_s0 + $0x5e0] sm:$0xff] }
  0x98   :  { %2007 = vmatmul.mubr.f32.gmra.mrb[58].mxu0 %v73_v14  ;;  %2154 = vmatmul.mubr.f32.gmra.mrb[58].mxu1 %v171_v15  ;;  %v105_v14 = vld [vmem:[%s4040_s0 + $0x2d8] sm:$0xff]  ;;  %v203_v15 = vld [vmem:[%s4040_s0 + $0x5e8] sm:$0xff] }
  0x99   :  { %2009 = vmatprep.mubr.f32.mxu0 %v74_v16  ;;  %2156 = vmatprep.mubr.f32.mxu1 %v172_v17  ;;  %v106_v16 = vld [vmem:[%s4040_s0 + $0x2e0] sm:$0xff]  ;;  %v204_v17 = vld [vmem:[%s4040_s0 + $0x5f0] sm:$0xff] }
  0x9c   :  { %2010 = vmatmul.mubr.f32.gmra.mrb[60].mxu0 %v75_v18  ;;  %2157 = vmatmul.mubr.f32.gmra.mrb[60].mxu1 %v173_v19  ;;  %v107_v18 = vld [vmem:[%s4040_s0 + $0x2e8] sm:$0xff]  ;;  %v205_v19 = vld [vmem:[%s4040_s0 + $0x5f8] sm:$0xff] }
  0x9d   :  { %2012 = vmatprep.mubr.f32.mxu0 %v76_v20  ;;  %2159 = vmatprep.mubr.f32.mxu1 %v174_v21  ;;  %v108_v20 = vld [vmem:[%s4040_s0 + $0x2f0] sm:$0xff]  ;;  %v206_v21 = vld [vmem:[%s4040_s0 + $0x600] sm:$0xff] }
  0xa0   :  { %2013 = vmatmul.mubr.f32.gmra.mrb[62].mxu0 %v77_v22  ;;  %2160 = vmatmul.mubr.f32.gmra.mrb[62].mxu1 %v175_v23  ;;  %v109_v22 = vld [vmem:[%s4040_s0 + $0x2f8] sm:$0xff]  ;;  %v207_v23 = vld [vmem:[%s4040_s0 + $0x608] sm:$0xff] }
  0xa1   :  { %2015 = vmatprep.mubr.f32.mxu0 %v78_v24  ;;  %2162 = vmatprep.mubr.f32.mxu1 %v176_v25  ;;  %v110_v24 = vld [vmem:[%s4040_s0 + $0x300] sm:$0xff]  ;;  %v208_v25 = vld [vmem:[%s4040_s0 + $0x610] sm:$0xff] }
  0xa4   :  { %2016 = vmatmul.mubr.f32.gmra.mrb[64].mxu0 %v79_v26  ;;  %2163 = vmatmul.mubr.f32.gmra.mrb[64].mxu1 %v177_v27  ;;  %v111_v26 = vld [vmem:[%s4040_s0 + $0x308] sm:$0xff]  ;;  %v209_v27 = vld [vmem:[%s4040_s0 + $0x618] sm:$0xff] }
  0xa5   :  { %2018 = vmatprep.mubr.f32.mxu0 %v80_v28  ;;  %2165 = vmatprep.mubr.f32.mxu1 %v178_v29 }
  0xa8   :  { %2019 = vmatmul.mubr.f32.gmra.mrb[66].mxu0 %v81_v30  ;;  %2166 = vmatmul.mubr.f32.gmra.mrb[66].mxu1 %v179_v31 }
  0xa9   :  { %2021 = vmatprep.mubr.f32.mxu0 %v82_v32  ;;  %2168 = vmatprep.mubr.f32.mxu1 %v180_v33 }
  0xac   :  { %2022 = vmatmul.mubr.f32.gmra.mrb[68].mxu0 %v83_v34  ;;  %2169 = vmatmul.mubr.f32.gmra.mrb[68].mxu1 %v181_v35 }
  0xad   :  { %2024 = vmatprep.mubr.f32.mxu0 %v84_v36  ;;  %2171 = vmatprep.mubr.f32.mxu1 %v182_v37 }
  0xb0   :  { %2025 = vmatmul.mubr.f32.gmra.mrb[70].mxu0 %v85_v38  ;;  %2172 = vmatmul.mubr.f32.gmra.mrb[70].mxu1 %v183_v39 }
  0xb1   :  { %2027 = vmatprep.mubr.f32.mxu0 %v86_v40  ;;  %2174 = vmatprep.mubr.f32.mxu1 %v184_v41 }
  0xb4   :  { %2028 = vmatmul.mubr.f32.gmra.mrb[72].mxu0 %v87_v42  ;;  %2175 = vmatmul.mubr.f32.gmra.mrb[72].mxu1 %v185_v43 }
  0xb5   :  { %2030 = vmatprep.mubr.f32.mxu0 %v88_v44  ;;  %2177 = vmatprep.mubr.f32.mxu1 %v186_v45 }
  0xb8   :  { %2031 = vmatmul.mubr.f32.gmra.mrb[74].mxu0 %v89_v46  ;;  %2178 = vmatmul.mubr.f32.gmra.mrb[74].mxu1 %v187_v47 }
  0xb9   :  { %2033 = vmatprep.mubr.f32.mxu0 %v90_v48  ;;  %2180 = vmatprep.mubr.f32.mxu1 %v188_v49 }
  0xbc   :  { %2034 = vmatmul.mubr.f32.gmra.mrb[76].mxu0 %v91_v50  ;;  %2181 = vmatmul.mubr.f32.gmra.mrb[76].mxu1 %v189_v51 }
  0xbd   :  { %2036 = vmatprep.mubr.f32.mxu0 %v92_v52  ;;  %2183 = vmatprep.mubr.f32.mxu1 %v190_v53 }
  0xc0   :  { %2037 = vmatmul.mubr.f32.gmra.mrb[78].mxu0 %v93_v54  ;;  %2184 = vmatmul.mubr.f32.gmra.mrb[78].mxu1 %v191_v55 }
  0xc1   :  { %2039 = vmatprep.mubr.f32.mxu0 %v94_v56  ;;  %2186 = vmatprep.mubr.f32.mxu1 %v192_v57 }
  0xc4   :  { %2040 = vmatmul.mubr.f32.gmra.mrb[80].mxu0 %v95_v58  ;;  %2187 = vmatmul.mubr.f32.gmra.mrb[80].mxu1 %v193_v59 }
  0xc5   :  { %2042 = vmatprep.mubr.f32.mxu0 %v96_v60  ;;  %2189 = vmatprep.mubr.f32.mxu1 %v194_v61 }
  0xc8   :  { %2043 = vmatmul.mubr.f32.gmra.mrb[82].mxu0 %v97_v62  ;;  %2190 = vmatmul.mubr.f32.gmra.mrb[82].mxu1 %v195_v63 }
  0xc9   :  { %2045 = vmatprep.mubr.f32.mxu0 %v98_v0  ;;  %2192 = vmatprep.mubr.f32.mxu1 %v196_v1 }
  0xcc   :  { %2046 = vmatmul.mubr.f32.gmra.mrb[84].mxu0 %v99_v2  ;;  %2193 = vmatmul.mubr.f32.gmra.mrb[84].mxu1 %v197_v3 }
  0xcd   :  { %2048 = vmatprep.mubr.f32.mxu0 %v100_v4  ;;  %2195 = vmatprep.mubr.f32.mxu1 %v198_v5 }
  0xd0   :  { %2049 = vmatmul.mubr.f32.gmra.mrb[86].mxu0 %v101_v6  ;;  %2196 = vmatmul.mubr.f32.gmra.mrb[86].mxu1 %v199_v7 }
  0xd1   :  { %2051 = vmatprep.mubr.f32.mxu0 %v102_v8  ;;  %2198 = vmatprep.mubr.f32.mxu1 %v200_v9 }
  0xd4   :  { %2052 = vmatmul.mubr.f32.gmra.mrb[88].mxu0 %v103_v10  ;;  %2199 = vmatmul.mubr.f32.gmra.mrb[88].mxu1 %v201_v11 }
  0xd5   :  { %2054 = vmatprep.mubr.f32.mxu0 %v104_v12  ;;  %2201 = vmatprep.mubr.f32.mxu1 %v202_v13 }
  0xd8   :  { %2055 = vmatmul.mubr.f32.gmra.mrb[90].mxu0 %v105_v14  ;;  %2202 = vmatmul.mubr.f32.gmra.mrb[90].mxu1 %v203_v15 }
  0xd9   :  { %2057 = vmatprep.mubr.f32.mxu0 %v106_v16  ;;  %2204 = vmatprep.mubr.f32.mxu1 %v204_v17 }
  0xdc   :  { %2058 = vmatmul.mubr.f32.gmra.mrb[92].mxu0 %v107_v18  ;;  %2205 = vmatmul.mubr.f32.gmra.mrb[92].mxu1 %v205_v19 }
  0xdd   :  { %2060 = vmatprep.mubr.f32.mxu0 %v108_v20  ;;  %2207 = vmatprep.mubr.f32.mxu1 %v206_v21 }
  0xe0   :  { %2061 = vmatmul.mubr.f32.gmra.mrb[94].mxu0 %v109_v22  ;;  %2208 = vmatmul.mubr.f32.gmra.mrb[94].mxu1 %v207_v23 }
  0xe1   :  { %2063 = vmatprep.mubr.f32.mxu0 %v110_v24  ;;  %2210 = vmatprep.mubr.f32.mxu1 %v208_v25  ;;  %v3041_v24 = vld [vmem:[%s4041_s2] ss:$0 sm:$0xff] }
  0xe4   :  { %2064 = vmatmul.mubr.f32.gmra.mrb[96].mxu0 %v111_v26  ;;  %2211 = vmatmul.mubr.f32.gmra.mrb[96].mxu1 %v209_v27 }
  0xf7   :  { %v2918_v28 = vpop.f32.mrb[0].mxu0  ;;  %v2920_v29 = vpop.f32.mrb[0].mxu1 }
  0xf8   :  { %v2922_v30 = vpop.f32.mrb[1].mxu0  ;;  %v2924_v31 = vpop.f32.mrb[1].mxu1 }
  0xfb   :  { %v2926_v32 = vpop.f32.mrb[2].mxu0  ;;  %v2928_v33 = vpop.f32.mrb[2].mxu1 }
  0xfc   :  { %v2930_v34 = vpop.f32.mrb[3].mxu0  ;;  %v2932_v35 = vpop.f32.mrb[3].mxu1 }
  0xff   :  { %v2934_v36 = vpop.f32.mrb[4].mxu0  ;;  %v2936_v37 = vpop.f32.mrb[4].mxu1 }
 0x100   :  { %v2938_v38 = vpop.f32.mrb[5].mxu0  ;;  %v2940_v39 = vpop.f32.mrb[5].mxu1 }
 0x103   :  { %v2942_v40 = vpop.f32.mrb[6].mxu0  ;;  %v2944_v41 = vpop.f32.mrb[6].mxu1 }
 0x104   :  { %v2946_v42 = vpop.f32.mrb[7].mxu0  ;;  %v2948_v43 = vpop.f32.mrb[7].mxu1 }
 0x107   :  { %v2950_v44 = vpop.f32.mrb[8].mxu0  ;;  %v2952_v45 = vpop.f32.mrb[8].mxu1 }
 0x108   :  { %v2954_v46 = vpop.f32.mrb[9].mxu0  ;;  %v2956_v47 = vpop.f32.mrb[9].mxu1 }
 0x10b   :  { %v2958_v48 = vpop.f32.mrb[10].mxu0  ;;  %v2960_v49 = vpop.f32.mrb[10].mxu1 }
 0x10c   :  { %v2962_v50 = vpop.f32.mrb[11].mxu0  ;;  %v2964_v51 = vpop.f32.mrb[11].mxu1 }
 0x10f   :  { %v2966_v52 = vpop.f32.mrb[12].mxu0  ;;  %v2968_v53 = vpop.f32.mrb[12].mxu1 }
 0x110   :  { %v2970_v54 = vpop.f32.mrb[13].mxu0  ;;  %v2972_v55 = vpop.f32.mrb[13].mxu1 }
 0x113   :  { %v2974_v56 = vpop.f32.mrb[14].mxu0  ;;  %v2976_v57 = vpop.f32.mrb[14].mxu1 }
 0x114   :  { %v2978_v58 = vpop.f32.mrb[15].mxu0  ;;  %v2980_v59 = vpop.f32.mrb[15].mxu1 }
 0x117   :  { %v2982_v60 = vpop.f32.mrb[16].mxu0  ;;  %v2984_v61 = vpop.f32.mrb[16].mxu1 }
 0x118   :  { %v2986_v62 = vpop.f32.mrb[17].mxu0  ;;  %v2988_v63 = vpop.f32.mrb[17].mxu1 }
 0x11b   :  { %v2990_v0 = vpop.f32.mrb[18].mxu0  ;;  %v2992_v1 = vpop.f32.mrb[18].mxu1 }
 0x11c   :  { %v2994_v2 = vpop.f32.mrb[19].mxu0  ;;  %v2996_v3 = vpop.f32.mrb[19].mxu1 }
 0x11f   :  { %v2998_v4 = vpop.f32.mrb[20].mxu0  ;;  %v3000_v5 = vpop.f32.mrb[20].mxu1 }
 0x120   :  { %v3002_v6 = vpop.f32.mrb[21].mxu0  ;;  %v3004_v7 = vpop.f32.mrb[21].mxu1 }
 0x123   :  { %v3006_v8 = vpop.f32.mrb[22].mxu0  ;;  %v3008_v9 = vpop.f32.mrb[22].mxu1 }
 0x124   :  { %v3010_v10 = vpop.f32.mrb[23].mxu0  ;;  %v3012_v11 = vpop.f32.mrb[23].mxu1 }
 0x127   :  { %v3014_v12 = vpop.f32.mrb[24].mxu0  ;;  %v3016_v13 = vpop.f32.mrb[24].mxu1 }
 0x128   :  { %v3018_v14 = vpop.f32.mrb[25].mxu0  ;;  %v3020_v15 = vpop.f32.mrb[25].mxu1 }
 0x12b   :  { %v3022_v16 = vpop.f32.mrb[26].mxu0  ;;  %v3024_v17 = vpop.f32.mrb[26].mxu1 }
 0x12c   :  { %v3026_v18 = vpop.f32.mrb[27].mxu0  ;;  %v3028_v19 = vpop.f32.mrb[27].mxu1 }
 0x12d   :  { %4082 = vst [vmem:[#allocation2_spill] sm:$0xff] %v3026_v18  ;;  %4083 = vst [vmem:[#allocation3_spill] sm:$0xff] %v3028_v19 }
 0x12f   :  { %v3030_v20 = vpop.f32.mrb[28].mxu0  ;;  %v3032_v21 = vpop.f32.mrb[28].mxu1 }
 0x130   :  { %4084 = vst [vmem:[#allocation4_spill] sm:$0xff] %v3030_v20  ;;  %4085 = vst [vmem:[#allocation5_spill] sm:$0xff] %v3032_v21  ;;  %v3034_v22 = vpop.f32.mrb[29].mxu0  ;;  %v3036_v23 = vpop.f32.mrb[29].mxu1  ;;  %v3053_v21 = vadd.f32 %v2918_v28, %v3041_v24  ;;  %v3073_v28 = vadd.f32 %v2928_v33, %v3041_v24 }
 0x131   :  { %4086 = vst [vmem:[#allocation6_spill] sm:$0xff] %v3034_v22  ;;  %4087 = vst [vmem:[#allocation7_spill] sm:$0xff] %v3036_v23  ;;  %v3057_v23 = vadd.f32 %v2920_v29, %v3041_v24  ;;  %v3061_v22 = vadd.f32 %v3041_v24, %v2922_v30  ;;  %v3077_v29 = vadd.f32 %v3041_v24, %v2930_v34 }
 0x132   :  { %4093 = vst [vmem:[#allocation13_spill] sm:$0xff] %v3073_v28  ;;  %v3130_v34 = vadd.f32 %v3041_v24, %v2946_v42  ;;  %v3151_v42 = vadd.f32 %v3041_v24, %v2954_v46  ;;  %v3167_v46 = vadd.f32 %v2960_v49, %v3041_v24  ;;  %v3181_v28 = vadd.f32 %v3041_v24, %v2964_v51 }
 0x133   :  { %v3043_v25 = vpop.f32.mrb[30].mxu0  ;;  %v3045_v26 = vpop.f32.mrb[30].mxu1  ;;  %v3185_v49 = vadd.f32 %v2966_v52, %v3041_v24  ;;  %v3202_v52 = vadd.f32 %v3041_v24, %v2970_v54  ;;  %v3216_v51 = vadd.f32 %v2976_v57, %v3041_v24 }
 0x134   :  { %4088 = vst [vmem:[#allocation8_spill] sm:$0xff] %v3043_v25  ;;  %4089 = vst [vmem:[#allocation9_spill] sm:$0xff] %v3045_v26  ;;  %v3047_v27 = vpop.f32.mrb[31].mxu0  ;;  %v3049_v19 = vpop.f32.mrb[31].mxu1  ;;  %v3065_v25 = vadd.f32 %v3041_v24, %v2924_v31  ;;  %v3085_v31 = vadd.f32 %v3041_v24, %v2932_v35  ;;  %v3120_v35 = vadd.f32 %v2944_v41, %v3041_v24 }
 0x135   :  { %4090 = vst [vmem:[#allocation10_spill] sm:$0xff] %v3047_v27  ;;  %4091 = vst [vmem:[#allocation11_spill] sm:$0xff] %v3049_v19  ;;  %v3069_v27 = vadd.f32 %v2926_v32, %v3041_v24  ;;  %v3089_v32 = vadd.f32 %v2934_v36, %v3041_v24  ;;  %v3106_v36 = vadd.f32 %v3041_v24, %v2938_v38 }
 0x136   :  { %4100 = vst [vmem:[#allocation20_spill] sm:$0xff] %v3120_v35  ;;  %4101 = vst [vmem:[#allocation21_spill] sm:$0xff] %v3130_v34  ;;  %v3206_v34 = vadd.f32 %v3041_v24, %v2972_v55  ;;  %v3243_v55 = vadd.f32 %v2984_v61, %v3041_v24 }
 0x137   :  { %4092 = vst [vmem:[#allocation12_spill] sm:$0xff] %v3069_v27  ;;  %v3079_v19 = vpop.f32.mrb[32].mxu0  ;;  %v3081_v30 = vpop.f32.mrb[32].mxu1  ;;  %4096 = vst [vmem:[#allocation16_spill] sm:$0xff] %v3089_v32  ;;  %v3143_v27 = vadd.f32 %v2950_v44, %v3041_v24  ;;  %v3157_v32 = vadd.f32 %v3041_v24, %v2956_v47  ;;  %v3161_v44 = vadd.f32 %v2958_v48, %v3041_v24 }
 0x138   :  { %4094 = vst [vmem:[#allocation14_spill] sm:$0xff] %v3079_v19  ;;  %4095 = vst [vmem:[#allocation15_spill] sm:$0xff] %v3081_v30  ;;  %v3091_v26 = vpop.f32.mrb[33].mxu0  ;;  %v3093_v33 = vpop.f32.mrb[33].mxu1  ;;  %v3100_v30 = vadd.f32 %v2936_v37, %v3041_v24  ;;  %v3116_v37 = vadd.f32 %v2942_v40, %v3041_v24  ;;  %v3134_v40 = vadd.f32 %v3041_v24, %v2948_v43 }
 0x139   :  { %4097 = vst [vmem:[#allocation17_spill] sm:$0xff] %v3093_v33  ;;  %v3110_v33 = vadd.f32 %v3041_v24, %v2940_v39  ;;  %v3147_v39 = vadd.f32 %v2952_v45, %v3041_v24  ;;  %4103 = vst [vmem:[#allocation23_spill] sm:$0xff] %v3161_v44  ;;  %v3171_v43 = vadd.f32 %v3041_v24, %v2962_v50 }
 0x13a   :  { %4098 = vst [vmem:[#allocation18_spill] sm:$0xff] %v3100_v30  ;;  %4099 = vst [vmem:[#allocation19_spill] sm:$0xff] %v3116_v37  ;;  %v3196_v48 = vadd.f32 %v2968_v53, %v3041_v24  ;;  %v3212_v53 = vadd.f32 %v2974_v56, %v3041_v24  ;;  %v3226_v37 = vadd.f32 %v3041_v24, %v2978_v58 }
 0x13b   :  { %v3122_v18 = vpop.f32.mrb[34].mxu0  ;;  %v3124_v38 = vpop.f32.mrb[34].mxu1  ;;  %4102 = vst [vmem:[#allocation22_spill] sm:$0xff] %v3134_v40  ;;  %4104 = vst [vmem:[#allocation24_spill] sm:$0xff] %v3167_v46  ;;  %v3230_v56 = vadd.f32 %v3041_v24, %v2980_v59  ;;  %v3239_v44 = vadd.f32 %v2982_v60, %v3041_v24  ;;  %v3247_v58 = vadd.f32 %v3041_v24, %v2986_v62 }
 0x13c   :  { %v3136_v20 = vpop.f32.mrb[35].mxu0  ;;  %v3138_v41 = vpop.f32.mrb[35].mxu1  ;;  %4105 = vst [vmem:[#allocation25_spill] sm:$0xff] %v3185_v49  ;;  %4106 = vst [vmem:[#allocation26_spill] sm:$0xff] %v3196_v48  ;;  %v3253_v49 = vadd.f32 %v3041_v24, %v2988_v63  ;;  %v3257_v60 = vadd.f32 %v2990_v0, %v3041_v24  ;;  %v3263_v62 = vadd.f32 %v2992_v1, %v3041_v24 }
 0x13d   :  { %4107 = vst [vmem:[#allocation27_spill] sm:$0xff] %v3212_v53  ;;  %4108 = vst [vmem:[#allocation28_spill] sm:$0xff] %v3216_v51  ;;  %v3267_v59 = vadd.f32 %v3041_v24, %v2994_v2  ;;  %v3277_v46 = vadd.f32 %v3041_v24, %v2996_v3  ;;  %v3281_v1 = vadd.f32 %v2998_v4, %v3041_v24 }
 0x13e   :  { %4109 = vst [vmem:[#allocation29_spill] sm:$0xff] %v3230_v56  ;;  %v3292_v0 = vadd.f32 %v3000_v5, %v3041_v24  ;;  %v3298_v4 = vadd.f32 %v3041_v24, %v3002_v6  ;;  %v3308_v5 = vadd.f32 %v3006_v8, %v3041_v24  ;;  %v3312_v3 = vadd.f32 %v3008_v9, %v3041_v24 }
 0x13f   :  { %v3173_v19 = vpop.f32.mrb[36].mxu0  ;;  %v3175_v47 = vpop.f32.mrb[36].mxu1  ;;  %4110 = vst [vmem:[#allocation30_spill] sm:$0xff] %v3281_v1  ;;  %v3322_v53 = vadd.f32 %v3041_v24, %v3010_v10  ;;  %v3326_v8 = vadd.f32 %v3041_v24, %v3012_v11  ;;  %v3343_v10 = vadd.f32 %v3041_v24, %v3018_v14  ;;  %v3359_v14 = vadd.f32 %v3024_v17, %v3041_v24  ;;  %v4129_v1 = vld [vmem:[#allocation3_spill] sm:$0xff] }
 0x140   :  { %v3187_v45 = vpop.f32.mrb[37].mxu0  ;;  %v3189_v50 = vpop.f32.mrb[37].mxu1  ;;  %4112 = vst [vmem:[#allocation32_spill] sm:$0xff] %v3292_v0  ;;  %4113 = vst [vmem:[#allocation33_spill] sm:$0xff] %v3308_v5  ;;  %v4140_v0 = vld [vmem:[#allocation8_spill] sm:$0xff] }
 0x141   :  { %4114 = vst [vmem:[#allocation34_spill] sm:$0xff] %v3312_v3  ;;  %4117 = vst [vmem:[#allocation37_spill] sm:$0xff] %v3322_v53 }
 0x142   :  { %4118 = vst [vmem:[#allocation38_spill] sm:$0xff] %v3326_v8  ;;  %4124 = vst [vmem:[#allocation44_spill] sm:$0xff] %v3359_v14 }
 0x143   :  { %v3218_v40 = vpop.f32.mrb[38].mxu0  ;;  %v3220_v54 = vpop.f32.mrb[38].mxu1 }
 0x144   :  { %v3232_v35 = vpop.f32.mrb[39].mxu0  ;;  %v3234_v57 = vpop.f32.mrb[39].mxu1 }
 0x147   :  { %v3269_v30 = vpop.f32.mrb[40].mxu0  ;;  %v3271_v63 = vpop.f32.mrb[40].mxu1 }
 0x148   :  { %v3283_v61 = vpop.f32.mrb[41].mxu0  ;;  %v3285_v2 = vpop.f32.mrb[41].mxu1 }
 0x149   :  { %4111 = vst [vmem:[#allocation31_spill] sm:$0xff] %v3285_v2  ;;  %v3302_v2 = vadd.f32 %v3041_v24, %v3004_v7  ;;  %v3339_v7 = vadd.f32 %v3016_v13, %v3041_v24  ;;  %v4130_v13 = vld [vmem:[#allocation4_spill] sm:$0xff] }
 0x14a   :  { %v3377_v17 = vadd.f32 %v4130_v13, %v3041_v24  ;;  %v4136_v13 = vld [vmem:[#allocation6_spill] sm:$0xff] }
 0x14b   :  { %v3314_v56 = vpop.f32.mrb[42].mxu0  ;;  %v3316_v6 = vpop.f32.mrb[42].mxu1  ;;  %4122 = vst [vmem:[#allocation42_spill] sm:$0xff] %v3339_v7  ;;  %v3394_v53 = vadd.f32 %v3041_v24, %v4136_v13 }
 0x14c   :  { %4115 = vst [vmem:[#allocation35_spill] sm:$0xff] %v3314_v56  ;;  %4116 = vst [vmem:[#allocation36_spill] sm:$0xff] %v3316_v6  ;;  %v3328_v51 = vpop.f32.mrb[43].mxu0  ;;  %v3330_v9 = vpop.f32.mrb[43].mxu1  ;;  %v3335_v6 = vadd.f32 %v3014_v12, %v3041_v24  ;;  %v3353_v12 = vadd.f32 %v3022_v16, %v3041_v24  ;;  %v3373_v56 = vadd.f32 %v3041_v24, %v4129_v1  ;;  %v4134_v16 = vld [vmem:[#allocation5_spill] sm:$0xff] }
 0x14d   :  { %4119 = vst [vmem:[#allocation39_spill] sm:$0xff] %v3328_v51  ;;  %4120 = vst [vmem:[#allocation40_spill] sm:$0xff] %v3330_v9  ;;  %v3349_v9 = vadd.f32 %v3041_v24, %v3020_v15  ;;  %v4125_v51 = vld [vmem:[#allocation2_spill] sm:$0xff]  ;;  %v3388_v5 = vadd.f32 %v4134_v16, %v3041_v24  ;;  %v3404_v16 = vadd.f32 %v4140_v0, %v3041_v24  ;;  %v4142_v1 = vld [vmem:[#allocation9_spill] sm:$0xff] }
 0x14e   :  { %4121 = vst [vmem:[#allocation41_spill] sm:$0xff] %v3335_v6  ;;  %4123 = vst [vmem:[#allocation43_spill] sm:$0xff] %v3353_v12  ;;  %v3363_v11 = vadd.f32 %v3041_v24, %v4125_v51  ;;  %v3408_v7 = vadd.f32 %v4142_v1, %v3041_v24  ;;  %v4146_v6 = vld [vmem:[#allocation10_spill] sm:$0xff] }
 0x14f   :  { %v3365_v48 = vpop.f32.mrb[44].mxu0  ;;  %v3367_v15 = vpop.f32.mrb[44].mxu1  ;;  %4131 = vst [vmem:[#allocation3_spill] sm:$0xff] %v3377_v17  ;;  %4135 = vst [vmem:[#allocation5_spill] sm:$0xff] %v3388_v5  ;;  %v4154_v17 = vld [vmem:[#allocation17_spill] sm:$0xff] }
 0x150   :  { %4126 = vst [vmem:[#allocation2_spill] sm:$0xff] %v3363_v11  ;;  %4127 = vst [vmem:[#allocation45_spill] sm:$0xff] %v3365_v48  ;;  %v3379_v3 = vpop.f32.mrb[45].mxu0  ;;  %v3381_v51 = vpop.f32.mrb[45].mxu1  ;;  %v4147_v48 = vld [vmem:[#allocation11_spill] sm:$0xff] }
 0x151   :  { %4128 = vst [vmem:[#allocation46_spill] sm:$0xff] %v3367_v15  ;;  %4132 = vst [vmem:[#allocation4_spill] sm:$0xff] %v3379_v3  ;;  %v4138_v3 = vld [vmem:[#allocation7_spill] sm:$0xff]  ;;  %v3418_v15 = vadd.f32 %v3041_v24, %v4146_v6  ;;  %v3422_v0 = vadd.f32 %v3041_v24, %v4147_v48  ;;  %v3439_v6 = vadd.f32 %v3041_v24, %v3091_v26 }
 0x152   :  { %4133 = vst [vmem:[#allocation47_spill] sm:$0xff] %v3381_v51  ;;  %4137 = vst [vmem:[#allocation6_spill] sm:$0xff] %v3394_v53  ;;  %v3398_v51 = vadd.f32 %v3041_v24, %v4138_v3  ;;  %v4152_v3 = vld [vmem:[#allocation15_spill] sm:$0xff]  ;;  %v3455_v26 = vadd.f32 %v3124_v38, %v3041_v24  ;;  %v3459_v48 = vadd.f32 %v3041_v24, %v3136_v20 }
 0x153   :  { %4141 = vst [vmem:[#allocation8_spill] sm:$0xff] %v3404_v16  ;;  %4143 = vst [vmem:[#allocation9_spill] sm:$0xff] %v3408_v7  ;;  %v3410_v8 = vpop.f32.mrb[46].mxu0  ;;  %v3412_v13 = vpop.f32.mrb[46].mxu1  ;;  %v3435_v12 = vadd.f32 %v4152_v3, %v3041_v24  ;;  %v3474_v53 = vadd.f32 %v3041_v24, %v3138_v41  ;;  %v3482_v38 = vadd.f32 %v3173_v19, %v3041_v24 }
 0x154   :  { %4139 = vst [vmem:[#allocation7_spill] sm:$0xff] %v3398_v51  ;;  %4144 = vst [vmem:[#allocation48_spill] sm:$0xff] %v3410_v8  ;;  %v3424_v14 = vpop.f32.mrb[47].mxu0  ;;  %v3426_v1 = vpop.f32.mrb[47].mxu1  ;;  %v3486_v7 = vadd.f32 %v3175_v47, %v3041_v24  ;;  %v4162_v51 = vmax.f32 %v3061_v22, 0.0  ;;  %v3497_v47 = vadd.f32 %v3041_v24, %v3187_v45 }
 0x155   :  { %4145 = vst [vmem:[#allocation49_spill] sm:$0xff] %v3412_v13  ;;  %4148 = vst [vmem:[#allocation10_spill] sm:$0xff] %v3424_v14  ;;  %v4150_v13 = vld [vmem:[#allocation14_spill] sm:$0xff] }
 0x156   :  { %4149 = vst [vmem:[#allocation11_spill] sm:$0xff] %v3426_v1  ;;  %v3431_v11 = vadd.f32 %v4150_v13, %v3041_v24  ;;  %4153 = vst [vmem:[#allocation15_spill] sm:$0xff] %v3435_v12  ;;  %v3445_v1 = vadd.f32 %v3041_v24, %v4154_v17  ;;  %v3449_v13 = vadd.f32 %v3122_v18, %v3041_v24 }
 0x157   :  { %4156 = vst [vmem:[#allocation50_spill] sm:$0xff] %v3455_v26  ;;  %v1993_v14 = vpop.f32.mrb[48].mxu0  ;;  %v2140_v5 = vpop.f32.mrb[48].mxu1  ;;  %4159 = vst [vmem:[#allocation53_spill] sm:$0xff] %v3474_v53 }
 0x158   :  { %4151 = vst [vmem:[#allocation14_spill] sm:$0xff] %v3431_v11  ;;  %4155 = vst [vmem:[#allocation17_spill] sm:$0xff] %v3449_v13  ;;  %v545_v18 = vadd.f32 %v1993_v14, %v3041_v24  ;;  %v1035_v8 = vadd.f32 %v2140_v5, %v3041_v24  ;;  %v3465_v16 = vpop.f32.mrb[49].mxu0  ;;  %v3467_v3 = vpop.f32.mrb[49].mxu1 }
 0x159   :  { %4157 = vst [vmem:[#allocation51_spill] sm:$0xff] %v3465_v16  ;;  %4158 = vst [vmem:[#allocation52_spill] sm:$0xff] %v3467_v3 }
 0x15a   :  { %v1327_v17 = vmax.f32 %v545_v18, 0.0  ;;  %v1425_v5 = vmax.f32 %v1035_v8, 0.0  ;;  %4160 = vst [vmem:[#allocation54_spill] sm:$0xff] %v3482_v38  ;;  %4161 = vst [vmem:[#allocation55_spill] sm:$0xff] %v3486_v7  ;;  %v4163_v18 = vmax.f32 %v3065_v25, 0.0  ;;  %v3503_v25 = vadd.f32 %v3041_v24, %v3189_v50 }
 0x15b   :  { %v1996_v41 = vpop.f32.mrb[50].mxu0  ;;  %v2143_v20 = vpop.f32.mrb[50].mxu1  ;;  %v4165_v50 = vmax.f32 %v3085_v31, 0.0 }
 0x15c   :  { %v1474_v12 = vmax.f32 %v4162_v51, %v1327_v17  ;;  %v1523_v8 = vmax.f32 %v4163_v18, %v1425_v5  ;;  %v555_v16 = vadd.f32 %v1996_v41, %v3041_v24  ;;  %v1045_v14 = vadd.f32 %v2143_v20, %v3041_v24  ;;  %v549_v3 = vpop.f32.mrb[51].mxu0  ;;  %v1039_v26 = vpop.f32.mrb[51].mxu1 }
 0x15d   :  { %v550_v13 = vadd.f32 %v3041_v24, %v549_v3  ;;  %v1040_v22 = vadd.f32 %v3041_v24, %v1039_v26  ;;  %v4164_v3 = vmax.f32 %v3077_v29, 0.0  ;;  %v4167_v20 = vmax.f32 %v3057_v23, 0.0 }
 0x15e   :  { %v1572_v51 = vmax.f32 %v1474_v12, %v1523_v8  ;;  %v1329_v17 = vmax.f32 %v555_v16, 0.0  ;;  %v1427_v5 = vmax.f32 %v1045_v14, 0.0  ;;  %v4168_v23 = vmax.f32 %v3106_v36, 0.0 }
 0x15f   :  { %v1328_v18 = vmax.f32 %v550_v13, 0.0  ;;  %v1426_v19 = vmax.f32 %v1040_v22, 0.0  ;;  %v1999_v11 = vpop.f32.mrb[52].mxu0  ;;  %v2146_v45 = vpop.f32.mrb[52].mxu1  ;;  %v4166_v13 = vmax.f32 %v3053_v21, 0.0 }
 0x160   :  { %1621 = vst [vmem:[%s4042_s3] sm:$0xff] %v1572_v51  ;;  %v1476_v26 = vmax.f32 %v4164_v3, %v1329_v17  ;;  %v1525_v12 = vmax.f32 %v4165_v50, %v1427_v5  ;;  %v565_v16 = vadd.f32 %v1999_v11, %v3041_v24  ;;  %v1055_v14 = vadd.f32 %v2146_v45, %v3041_v24  ;;  %v559_v8 = vpop.f32.mrb[53].mxu0  ;;  %v1049_v41 = vpop.f32.mrb[53].mxu1 }
 0x161   :  { %v1475_v22 = vmax.f32 %v4166_v13, %v1328_v18  ;;  %v1524_v7 = vmax.f32 %v4167_v20, %v1426_v19  ;;  %v560_v51 = vadd.f32 %v3041_v24, %v559_v8  ;;  %v1050_v29 = vadd.f32 %v3041_v24, %v1049_v41  ;;  %v4172_v13 = vld [vmem:[#allocation13_spill] sm:$0xff] }
 0x162   :  { %v1314_v17 = vmax.f32 %v3497_v47, 0.0  ;;  %v1574_v31 = vmax.f32 %v1476_v26, %v1525_v12  ;;  %v1331_v5 = vmax.f32 %v565_v16, 0.0  ;;  %v1429_v3 = vmax.f32 %v1055_v14, 0.0  ;;  %v4170_v16 = vld [vmem:[#allocation12_spill] sm:$0xff] }
 0x163   :  { %v1412_v11 = vmax.f32 %v3503_v25, 0.0  ;;  %v1573_v45 = vmax.f32 %v1475_v22, %v1524_v7  ;;  %v1330_v50 = vmax.f32 %v560_v51, 0.0  ;;  %v1428_v38 = vmax.f32 %v1050_v29, 0.0  ;;  %v2002_v53 = vpop.f32.mrb[54].mxu0  ;;  %v2149_v21 = vpop.f32.mrb[54].mxu1 }
 0x164   :  { %1623 = vst [vmem:[%s4042_s3 + $0x10] sm:$0xff] %v1574_v31  ;;  %v1478_v19 = vmax.f32 %v4168_v23, %v1331_v5  ;;  %v4169_v20 = vmax.f32 %v3110_v33, 0.0  ;;  %v575_v18 = vadd.f32 %v2002_v53, %v3041_v24  ;;  %v1065_v26 = vadd.f32 %v2149_v21, %v3041_v24  ;;  %v569_v12 = vpop.f32.mrb[55].mxu0  ;;  %v1059_v7 = vpop.f32.mrb[55].mxu1 }
 0x165   :  { %1622 = vst [vmem:[%s4042_s3 + $0x8] sm:$0xff] %v1573_v45  ;;  %v4171_v14 = vmax.f32 %v4170_v16, 0.0  ;;  %v4173_v22 = vmax.f32 %v4172_v13, 0.0  ;;  %v570_v51 = vadd.f32 %v3041_v24, %v569_v12  ;;  %v1060_v33 = vadd.f32 %v3041_v24, %v1059_v7  ;;  %v4176_v7 = vld [vmem:[#allocation22_spill] sm:$0xff] }
 0x166   :  { %v1527_v41 = vmax.f32 %v4169_v20, %v1429_v3  ;;  %v3544_v53 = vadd.f32 %v3218_v40, %v3041_v24  ;;  %v1333_v31 = vmax.f32 %v575_v18, 0.0  ;;  %v1431_v5 = vmax.f32 %v1065_v26, 0.0  ;;  %v4174_v20 = vld [vmem:[#allocation21_spill] sm:$0xff] }
 0x167   :  { %v1477_v8 = vmax.f32 %v4171_v14, %v1330_v50  ;;  %v1526_v36 = vmax.f32 %v4173_v22, %v1428_v38  ;;  %v3548_v3 = vadd.f32 %v3220_v54, %v3041_v24  ;;  %v1332_v50 = vmax.f32 %v570_v51, 0.0  ;;  %v2005_v23 = vpop.f32.mrb[56].mxu0  ;;  %v2152_v38 = vpop.f32.mrb[56].mxu1  ;;  %v4178_v14 = vld [vmem:[#allocation16_spill] sm:$0xff]  ;;  %v4180_v22 = vld [vmem:[#allocation18_spill] sm:$0xff] }
 0x168   :  { %v1576_v29 = vmax.f32 %v1478_v19, %v1527_v41  ;;  %v1430_v21 = vmax.f32 %v1060_v33, 0.0  ;;  %v4175_v12 = vmax.f32 %v4174_v20, 0.0  ;;  %v4177_v19 = vmax.f32 %v4176_v7, 0.0  ;;  %v579_v26 = vpop.f32.mrb[57].mxu0  ;;  %v1069_v16 = vpop.f32.mrb[57].mxu1 }
 0x169   :  { %v1575_v45 = vmax.f32 %v1477_v8, %v1526_v36  ;;  %v585_v18 = vadd.f32 %v2005_v23, %v3041_v24  ;;  %v1075_v54 = vadd.f32 %v2152_v38, %v3041_v24  ;;  %v4179_v8 = vmax.f32 %v4178_v14, 0.0 }
 0x16a   :  { %1625 = vst [vmem:[%s4042_s3 + $0x20] sm:$0xff] %v1576_v29  ;;  %v1480_v40 = vmax.f32 %v4175_v12, %v1333_v31  ;;  %v1529_v41 = vmax.f32 %v4177_v19, %v1431_v5  ;;  %v4181_v36 = vmax.f32 %v4180_v22, 0.0  ;;  %v580_v33 = vadd.f32 %v3041_v24, %v579_v26 }
 0x16b   :  { %1624 = vst [vmem:[%s4042_s3 + $0x18] sm:$0xff] %v1575_v45  ;;  %v1479_v13 = vmax.f32 %v4179_v8, %v1332_v50  ;;  %v1070_v29 = vadd.f32 %v3041_v24, %v1069_v16  ;;  %v3570_v31 = vadd.f32 %v3041_v24, %v3232_v35  ;;  %v1335_v23 = vmax.f32 %v585_v18, 0.0  ;;  %v2008_v7 = vpop.f32.mrb[58].mxu0  ;;  %v4184_v16 = vld [vmem:[#allocation19_spill] sm:$0xff] }
 0x16c   :  { %v1528_v51 = vmax.f32 %v4181_v36, %v1430_v21  ;;  %v1578_v5 = vmax.f32 %v1480_v40, %v1529_v41  ;;  %v1433_v38 = vmax.f32 %v1075_v54, 0.0  ;;  %v3574_v45 = vadd.f32 %v3041_v24, %v3234_v57  ;;  %v2155_v21 = vpop.f32.mrb[58].mxu1  ;;  %v589_v54 = vpop.f32.mrb[59].mxu0 }
 0x16d   :  { %v1334_v50 = vmax.f32 %v580_v33, 0.0  ;;  %v1432_v12 = vmax.f32 %v1070_v29, 0.0  ;;  %v4182_v19 = vmax.f32 %v3151_v42, 0.0  ;;  %v4183_v40 = vmax.f32 %v3157_v32, 0.0  ;;  %v1079_v26 = vpop.f32.mrb[59].mxu1 }
 0x16e   :  { %v1577_v20 = vmax.f32 %v1479_v13, %v1528_v51  ;;  %1627 = vst [vmem:[%s4042_s3 + $0x30] sm:$0xff] %v1578_v5  ;;  %v595_v18 = vadd.f32 %v2008_v7, %v3041_v24  ;;  %v1085_v57 = vadd.f32 %v2155_v21, %v3041_v24  ;;  %v4185_v14 = vmax.f32 %v4184_v16, 0.0  ;;  %v4186_v13 = vld [vmem:[#allocation20_spill] sm:$0xff] }
 0x16f   :  { %v1482_v35 = vmax.f32 %v4182_v19, %v1335_v23  ;;  %v1531_v41 = vmax.f32 %v4183_v40, %v1433_v38  ;;  %v4187_v22 = vmax.f32 %v4186_v13, 0.0  ;;  %v590_v36 = vadd.f32 %v3041_v24, %v589_v54  ;;  %v2011_v21 = vpop.f32.mrb[60].mxu0  ;;  %v2158_v19 = vpop.f32.mrb[60].mxu1 }
 0x170   :  { %1626 = vst [vmem:[%s4042_s3 + $0x28] sm:$0xff] %v1577_v20  ;;  %v1481_v8 = vmax.f32 %v4185_v14, %v1334_v50  ;;  %v1080_v32 = vadd.f32 %v3041_v24, %v1079_v26  ;;  %v1317_v51 = vmax.f32 %v3544_v53, 0.0  ;;  %v1337_v29 = vmax.f32 %v595_v18, 0.0  ;;  %v599_v18 = vpop.f32.mrb[61].mxu0 }
 0x171   :  { %v1530_v42 = vmax.f32 %v4187_v22, %v1432_v12  ;;  %v1580_v33 = vmax.f32 %v1482_v35, %v1531_v41  ;;  %v1435_v5 = vmax.f32 %v1085_v57, 0.0  ;;  %v1415_v23 = vmax.f32 %v3548_v3, 0.0  ;;  %v1089_v57 = vpop.f32.mrb[61].mxu1 }
 0x172   :  { %v1336_v7 = vmax.f32 %v590_v36, 0.0  ;;  %v1434_v20 = vmax.f32 %v1080_v32, 0.0  ;;  %v4188_v50 = vmax.f32 %v3171_v43, 0.0  ;;  %v4189_v40 = vmax.f32 %v3181_v28, 0.0 }
 0x173   :  { %v1579_v38 = vmax.f32 %v1481_v8, %v1530_v42  ;;  %1629 = vst [vmem:[%s4042_s3 + $0x40] sm:$0xff] %v1580_v33  ;;  %v605_v35 = vadd.f32 %v2011_v21, %v3041_v24  ;;  %v1095_v41 = vadd.f32 %v2158_v19, %v3041_v24  ;;  %v4190_v26 = vmax.f32 %v3143_v27, 0.0  ;;  %v2161_v27 = vpop.f32.mrb[62].mxu1 }
 0x174   :  { %v1484_v12 = vmax.f32 %v4188_v50, %v1337_v29  ;;  %v1533_v54 = vmax.f32 %v4189_v40, %v1435_v5  ;;  %v4191_v14 = vmax.f32 %v3147_v39, 0.0  ;;  %v600_v8 = vadd.f32 %v3041_v24, %v599_v18  ;;  %v1099_v40 = vpop.f32.mrb[63].mxu1  ;;  %v4196_v18 = vld [vmem:[#allocation24_spill] sm:$0xff] }
 0x175   :  { %1628 = vst [vmem:[%s4042_s3 + $0x38] sm:$0xff] %v1579_v38  ;;  %v1483_v16 = vmax.f32 %v4190_v26, %v1336_v7  ;;  %v1090_v28 = vadd.f32 %v3041_v24, %v1089_v57  ;;  %v1316_v13 = vmax.f32 %v3570_v31, 0.0  ;;  %v1339_v42 = vmax.f32 %v605_v35, 0.0  ;;  %v2014_v38 = vpop.f32.mrb[62].mxu0 }
 0x176   :  { %v1532_v43 = vmax.f32 %v4191_v14, %v1434_v20  ;;  %v1582_v22 = vmax.f32 %v1484_v12, %v1533_v54  ;;  %v1437_v36 = vmax.f32 %v1095_v41, 0.0  ;;  %v1414_v32 = vmax.f32 %v3574_v45, 0.0  ;;  %v609_v12 = vpop.f32.mrb[63].mxu0  ;;  %v4194_v54 = vld [vmem:[#allocation23_spill] sm:$0xff] }
 0x177   :  { %v1338_v29 = vmax.f32 %v600_v8, 0.0  ;;  %v1436_v5 = vmax.f32 %v1090_v28, 0.0  ;;  %v4192_v39 = vmax.f32 %v3202_v52, 0.0  ;;  %v4193_v20 = vmax.f32 %v3206_v34, 0.0 }
 0x178   :  { %v1581_v33 = vmax.f32 %v1483_v16, %v1532_v43  ;;  %1631 = vst [vmem:[%s4042_s3 + $0x50] sm:$0xff] %v1582_v22  ;;  %v615_v19 = vadd.f32 %v2014_v38, %v3041_v24  ;;  %v1105_v50 = vadd.f32 %v2161_v27, %v3041_v24  ;;  %v4195_v35 = vmax.f32 %v4194_v54, 0.0  ;;  %v4199_v38 = vld [vmem:[#allocation29_spill] sm:$0xff] }
 0x179   :  { %v1486_v7 = vmax.f32 %v4192_v39, %v1339_v42  ;;  %v1535_v21 = vmax.f32 %v4193_v20, %v1437_v36  ;;  %v4197_v57 = vmax.f32 %v4196_v18, 0.0  ;;  %v610_v26 = vadd.f32 %v3041_v24, %v609_v12 }
 0x17a   :  { %1630 = vst [vmem:[%s4042_s3 + $0x48] sm:$0xff] %v1581_v33  ;;  %v1485_v41 = vmax.f32 %v4195_v35, %v1338_v29  ;;  %v1100_v34 = vadd.f32 %v3041_v24, %v1099_v40  ;;  %v3636_v16 = vadd.f32 %v3269_v30, %v3041_v24  ;;  %v1341_v43 = vmax.f32 %v615_v19, 0.0  ;;  %v2017_v33 = vpop.f32.mrb[64].mxu0  ;;  %v2164_v29 = vpop.f32.mrb[64].mxu1  ;;  %v4201_v19 = vld [vmem:[#allocation25_spill] sm:$0xff]  ;;  %v4203_v40 = vld [vmem:[#allocation26_spill] sm:$0xff] }
 0x17b   :  { %v1534_v52 = vmax.f32 %v4197_v57, %v1436_v5  ;;  %v1584_v14 = vmax.f32 %v1486_v7, %v1535_v21  ;;  %v1439_v8 = vmax.f32 %v1105_v50, 0.0  ;;  %v3640_v28 = vadd.f32 %v3271_v63, %v3041_v24  ;;  %v619_v20 = vpop.f32.mrb[65].mxu0  ;;  %v1109_v21 = vpop.f32.mrb[65].mxu1 }
 0x17c   :  { %v1340_v42 = vmax.f32 %v610_v26, 0.0  ;;  %v1438_v36 = vmax.f32 %v1100_v34, 0.0  ;;  %v4198_v5 = vmax.f32 %v3226_v37, 0.0  ;;  %v4200_v27 = vmax.f32 %v4199_v38, 0.0  ;;  %v4205_v34 = vld [vmem:[#allocation31_spill] sm:$0xff] }
 0x17d   :  { %v1583_v22 = vmax.f32 %v1485_v41, %v1534_v52  ;;  %1633 = vst [vmem:[%s4042_s3 + $0x60] sm:$0xff] %v1584_v14  ;;  %v625_v7 = vadd.f32 %v2017_v33, %v3041_v24  ;;  %v1115_v63 = vadd.f32 %v2164_v29, %v3041_v24  ;;  %v4202_v50 = vmax.f32 %v4201_v19, 0.0 }
 0x17e   :  { %v1488_v30 = vmax.f32 %v4198_v5, %v1341_v43  ;;  %v1537_v39 = vmax.f32 %v4200_v27, %v1439_v8  ;;  %v4204_v54 = vmax.f32 %v4203_v40, 0.0  ;;  %v620_v35 = vadd.f32 %v3041_v24, %v619_v20 }
 0x17f   :  { %1632 = vst [vmem:[%s4042_s3 + $0x58] sm:$0xff] %v1583_v22  ;;  %v1487_v12 = vmax.f32 %v4202_v50, %v1340_v42  ;;  %v1110_v41 = vadd.f32 %v3041_v24, %v1109_v21  ;;  %v3662_v18 = vadd.f32 %v3041_v24, %v3283_v61  ;;  %v1343_v52 = vmax.f32 %v625_v7, 0.0  ;;  %v2020_v42 = vpop.f32.mrb[66].mxu0  ;;  %v4208_v7 = vld [vmem:[#allocation27_spill] sm:$0xff]  ;;  %v4210_v21 = vld [vmem:[#allocation28_spill] sm:$0xff] }
 0x180   :  { %v1536_v37 = vmax.f32 %v4204_v54, %v1438_v36  ;;  %v1586_v57 = vmax.f32 %v1488_v30, %v1537_v39  ;;  %v1441_v26 = vmax.f32 %v1115_v63, 0.0  ;;  %v3666_v14 = vadd.f32 %v3041_v24, %v4205_v34  ;;  %v2167_v36 = vpop.f32.mrb[66].mxu1  ;;  %v629_v27 = vpop.f32.mrb[67].mxu0 }
 0x181   :  { %v1342_v8 = vmax.f32 %v620_v35, 0.0  ;;  %v1440_v22 = vmax.f32 %v1110_v41, 0.0  ;;  %v4206_v33 = vmax.f32 %v3247_v58, 0.0  ;;  %v4207_v29 = vmax.f32 %v3253_v49, 0.0  ;;  %v1119_v39 = vpop.f32.mrb[67].mxu1 }
 0x182   :  { %v1585_v43 = vmax.f32 %v1487_v12, %v1536_v37  ;;  %1635 = vst [vmem:[%s4042_s3 + $0x70] sm:$0xff] %v1586_v57  ;;  %v635_v30 = vadd.f32 %v2020_v42, %v3041_v24  ;;  %v1125_v38 = vadd.f32 %v2167_v36, %v3041_v24  ;;  %v4209_v63 = vmax.f32 %v4208_v7, 0.0  ;;  %v2170_v34 = vpop.f32.mrb[68].mxu1 }
 0x183   :  { %v1490_v61 = vmax.f32 %v4206_v33, %v1343_v52  ;;  %v1539_v5 = vmax.f32 %v4207_v29, %v1441_v26  ;;  %v4211_v19 = vmax.f32 %v4210_v21, 0.0  ;;  %v630_v50 = vadd.f32 %v3041_v24, %v629_v27  ;;  %v2023_v26 = vpop.f32.mrb[68].mxu0  ;;  %v1129_v29 = vpop.f32.mrb[69].mxu1 }
 0x184   :  { %1634 = vst [vmem:[%s4042_s3 + $0x68] sm:$0xff] %v1585_v43  ;;  %v1489_v20 = vmax.f32 %v4209_v63, %v1342_v8  ;;  %v1120_v49 = vadd.f32 %v3041_v24, %v1119_v39  ;;  %v1319_v12 = vmax.f32 %v3636_v16, 0.0  ;;  %v1345_v54 = vmax.f32 %v635_v30, 0.0 }
 0x185   :  { %v1538_v58 = vmax.f32 %v4211_v19, %v1440_v22  ;;  %v1588_v40 = vmax.f32 %v1490_v61, %v1539_v5  ;;  %v1443_v37 = vmax.f32 %v1125_v38, 0.0  ;;  %v1417_v35 = vmax.f32 %v3640_v28, 0.0  ;;  %v639_v61 = vpop.f32.mrb[69].mxu0 }
 0x186   :  { %v1344_v57 = vmax.f32 %v630_v50, 0.0  ;;  %v1442_v52 = vmax.f32 %v1120_v49, 0.0  ;;  %v4212_v43 = vmax.f32 %v3267_v59, 0.0  ;;  %v4213_v22 = vmax.f32 %v3277_v46, 0.0  ;;  %v2026_v49 = vpop.f32.mrb[70].mxu0 }
 0x187   :  { %v1587_v41 = vmax.f32 %v1489_v20, %v1538_v58  ;;  %1637 = vst [vmem:[%s4042_s3 + $0x80] sm:$0xff] %v1588_v40  ;;  %v645_v36 = vadd.f32 %v2023_v26, %v3041_v24  ;;  %v1135_v33 = vadd.f32 %v2170_v34, %v3041_v24  ;;  %v4214_v5 = vmax.f32 %v3239_v44, 0.0  ;;  %v2173_v44 = vpop.f32.mrb[70].mxu1 }
 0x188   :  { %v1492_v8 = vmax.f32 %v4212_v43, %v1345_v54  ;;  %v1541_v42 = vmax.f32 %v4213_v22, %v1443_v37  ;;  %v4215_v38 = vmax.f32 %v3243_v55, 0.0  ;;  %v640_v27 = vadd.f32 %v3041_v24, %v639_v61  ;;  %v1139_v26 = vpop.f32.mrb[71].mxu1 }
 0x189   :  { %1636 = vst [vmem:[%s4042_s3 + $0x78] sm:$0xff] %v1587_v41  ;;  %v1491_v30 = vmax.f32 %v4214_v5, %v1344_v57  ;;  %v1130_v46 = vadd.f32 %v3041_v24, %v1129_v29  ;;  %v1318_v39 = vmax.f32 %v3662_v18, 0.0  ;;  %v1347_v63 = vmax.f32 %v645_v36, 0.0  ;;  %v4221_v5 = vld [vmem:[#allocation36_spill] sm:$0xff] }
 0x18a   :  { %v1540_v59 = vmax.f32 %v4215_v38, %v1442_v52  ;;  %v1590_v7 = vmax.f32 %v1492_v8, %v1541_v42  ;;  %v1445_v20 = vmax.f32 %v1135_v33, 0.0  ;;  %v1416_v21 = vmax.f32 %v3666_v14, 0.0  ;;  %v649_v52 = vpop.f32.mrb[71].mxu0  ;;  %v4220_v42 = vld [vmem:[#allocation35_spill] sm:$0xff] }
 0x18b   :  { %v1346_v58 = vmax.f32 %v640_v27, 0.0  ;;  %v1444_v50 = vmax.f32 %v1130_v46, 0.0  ;;  %v4216_v55 = vmax.f32 %v3298_v4, 0.0  ;;  %v4217_v54 = vmax.f32 %v3302_v2, 0.0  ;;  %v2176_v27 = vpop.f32.mrb[72].mxu1  ;;  %v4222_v46 = vld [vmem:[#allocation37_spill] sm:$0xff] }
 0x18c   :  { %v1589_v19 = vmax.f32 %v1491_v30, %v1540_v59  ;;  %1639 = vst [vmem:[%s4042_s3 + $0x90] sm:$0xff] %v1590_v7  ;;  %v655_v41 = vadd.f32 %v2026_v49, %v3041_v24  ;;  %v1145_v57 = vadd.f32 %v2173_v44, %v3041_v24  ;;  %v4218_v34 = vmax.f32 %v3257_v60, 0.0 }
 0x18d   :  { %v1494_v40 = vmax.f32 %v4216_v55, %v1347_v63  ;;  %v1543_v37 = vmax.f32 %v4217_v54, %v1445_v20  ;;  %v4219_v8 = vmax.f32 %v3263_v62, 0.0  ;;  %v650_v22 = vadd.f32 %v3041_v24, %v649_v52  ;;  %v2029_v62 = vpop.f32.mrb[72].mxu0  ;;  %v4224_v20 = vld [vmem:[#allocation38_spill] sm:$0xff]  ;;  %v1149_v55 = vpop.f32.mrb[73].mxu1 }
 0x18e   :  { %1638 = vst [vmem:[%s4042_s3 + $0x88] sm:$0xff] %v1589_v19  ;;  %v1493_v43 = vmax.f32 %v4218_v34, %v1346_v58  ;;  %v1140_v2 = vadd.f32 %v3041_v24, %v1139_v26  ;;  %v3728_v36 = vadd.f32 %v4220_v42, %v3041_v24  ;;  %v1349_v61 = vmax.f32 %v655_v41, 0.0  ;;  %v659_v44 = vpop.f32.mrb[73].mxu0  ;;  %v4228_v41 = vld [vmem:[#allocation32_spill] sm:$0xff] }
 0x18f   :  { %v1542_v4 = vmax.f32 %v4219_v8, %v1444_v50  ;;  %v1592_v33 = vmax.f32 %v1494_v40, %v1543_v37  ;;  %v1447_v29 = vmax.f32 %v1145_v57, 0.0  ;;  %v3732_v30 = vadd.f32 %v4221_v5, %v3041_v24  ;;  %v4226_v40 = vld [vmem:[#allocation30_spill] sm:$0xff]  ;;  %v4231_v42 = vld [vmem:[#allocation40_spill] sm:$0xff] }
 0x190   :  { %v1348_v38 = vmax.f32 %v650_v22, 0.0  ;;  %v1446_v59 = vmax.f32 %v1140_v2, 0.0  ;;  %v4223_v7 = vmax.f32 %v4222_v46, 0.0  ;;  %v4225_v19 = vmax.f32 %v4224_v20, 0.0 }
 0x191   :  { %v1591_v60 = vmax.f32 %v1493_v43, %v1542_v4  ;;  %1641 = vst [vmem:[%s4042_s3 + $0xa0] sm:$0xff] %v1592_v33  ;;  %v665_v50 = vadd.f32 %v2029_v62, %v3041_v24  ;;  %v1155_v49 = vadd.f32 %v2176_v27, %v3041_v24  ;;  %v4227_v54 = vmax.f32 %v4226_v40, 0.0  ;;  %v4230_v43 = vld [vmem:[#allocation39_spill] sm:$0xff] }
 0x192   :  { %v1496_v63 = vmax.f32 %v4223_v7, %v1349_v61  ;;  %v1545_v58 = vmax.f32 %v4225_v19, %v1447_v29  ;;  %v4229_v57 = vmax.f32 %v4228_v41, 0.0  ;;  %v660_v26 = vadd.f32 %v3041_v24, %v659_v44  ;;  %v4236_v44 = vld [vmem:[#allocation34_spill] sm:$0xff] }
 0x193   :  { %1640 = vst [vmem:[%s4042_s3 + $0x98] sm:$0xff] %v1591_v60  ;;  %v1495_v37 = vmax.f32 %v4227_v54, %v1348_v38  ;;  %v1150_v34 = vadd.f32 %v3041_v24, %v1149_v55  ;;  %v3754_v8 = vadd.f32 %v3041_v24, %v4230_v43  ;;  %v1351_v22 = vmax.f32 %v665_v50, 0.0  ;;  %v2032_v60 = vpop.f32.mrb[74].mxu0  ;;  %v2179_v38 = vpop.f32.mrb[74].mxu1 }
 0x194   :  { %v1544_v52 = vmax.f32 %v4229_v57, %v1446_v59  ;;  %v1594_v4 = vmax.f32 %v1496_v63, %v1545_v58  ;;  %v1449_v2 = vmax.f32 %v1155_v49, 0.0  ;;  %v3758_v33 = vadd.f32 %v3041_v24, %v4231_v42  ;;  %v669_v20 = vpop.f32.mrb[75].mxu0  ;;  %v1159_v19 = vpop.f32.mrb[75].mxu1  ;;  %v4234_v58 = vld [vmem:[#allocation33_spill] sm:$0xff] }
 0x195   :  { %v1350_v29 = vmax.f32 %v660_v26, 0.0  ;;  %v1448_v5 = vmax.f32 %v1150_v34, 0.0  ;;  %v4232_v59 = vmax.f32 %v3343_v10, 0.0  ;;  %v4233_v27 = vmax.f32 %v3349_v9, 0.0 }
 0x196   :  { %v1593_v61 = vmax.f32 %v1495_v37, %v1544_v52  ;;  %1643 = vst [vmem:[%s4042_s3 + $0xb0] sm:$0xff] %v1594_v4  ;;  %v675_v7 = vadd.f32 %v2032_v60, %v3041_v24  ;;  %v1165_v63 = vadd.f32 %v2179_v38, %v3041_v24  ;;  %v4235_v50 = vmax.f32 %v4234_v58, 0.0  ;;  %v2035_v4 = vpop.f32.mrb[76].mxu0 }
 0x197   :  { %v1498_v62 = vmax.f32 %v4232_v59, %v1351_v22  ;;  %v1547_v46 = vmax.f32 %v4233_v27, %v1449_v2  ;;  %v4237_v55 = vmax.f32 %v4236_v44, 0.0  ;;  %v670_v40 = vadd.f32 %v3041_v24, %v669_v20  ;;  %v2182_v22 = vpop.f32.mrb[76].mxu1  ;;  %v4238_v2 = vld [vmem:[#allocation2_spill] sm:$0xff]  ;;  %v679_v59 = vpop.f32.mrb[77].mxu0  ;;  %v4241_v27 = vld [vmem:[#allocation41_spill] sm:$0xff] }
 0x198   :  { %1642 = vst [vmem:[%s4042_s3 + $0xa8] sm:$0xff] %v1593_v61  ;;  %v1497_v49 = vmax.f32 %v4235_v50, %v1350_v29  ;;  %v1160_v9 = vadd.f32 %v3041_v24, %v1159_v19  ;;  %v1321_v54 = vmax.f32 %v3728_v36, 0.0  ;;  %v1353_v41 = vmax.f32 %v675_v7, 0.0 }
 0x199   :  { %v1546_v10 = vmax.f32 %v4237_v55, %v1448_v5  ;;  %v1596_v37 = vmax.f32 %v1498_v62, %v1547_v46  ;;  %v1451_v57 = vmax.f32 %v1165_v63, 0.0  ;;  %v1419_v52 = vmax.f32 %v3732_v30, 0.0  ;;  %v1169_v62 = vpop.f32.mrb[77].mxu1  ;;  %v4243_v63 = vld [vmem:[#allocation42_spill] sm:$0xff] }
 0x19a   :  { %v1352_v34 = vmax.f32 %v670_v40, 0.0  ;;  %v1450_v43 = vmax.f32 %v1160_v9, 0.0  ;;  %v4239_v42 = vmax.f32 %v4238_v2, 0.0  ;;  %v4240_v29 = vmax.f32 %v3373_v56, 0.0 }
 0x19b   :  { %v1595_v26 = vmax.f32 %v1497_v49, %v1546_v10  ;;  %1645 = vst [vmem:[%s4042_s3 + $0xc0] sm:$0xff] %v1596_v37  ;;  %v685_v60 = vadd.f32 %v2035_v4, %v3041_v24  ;;  %v1175_v38 = vadd.f32 %v2182_v22, %v3041_v24  ;;  %v4242_v46 = vmax.f32 %v4241_v27, 0.0  ;;  %v4247_v4 = vld [vmem:[#allocation7_spill] sm:$0xff] }
 0x19c   :  { %v1500_v61 = vmax.f32 %v4239_v42, %v1353_v41  ;;  %v1549_v5 = vmax.f32 %v4240_v29, %v1451_v57  ;;  %v4244_v20 = vmax.f32 %v4243_v63, 0.0  ;;  %v680_v58 = vadd.f32 %v3041_v24, %v679_v59  ;;  %v2038_v41 = vpop.f32.mrb[78].mxu0  ;;  %v2185_v57 = vpop.f32.mrb[78].mxu1 }
 0x19d   :  { %1644 = vst [vmem:[%s4042_s3 + $0xb8] sm:$0xff] %v1595_v26  ;;  %v1499_v7 = vmax.f32 %v4242_v46, %v1352_v34  ;;  %v1170_v56 = vadd.f32 %v3041_v24, %v1169_v62  ;;  %v1320_v50 = vmax.f32 %v3754_v8, 0.0  ;;  %v1355_v44 = vmax.f32 %v685_v60, 0.0  ;;  %v4245_v26 = vld [vmem:[#allocation6_spill] sm:$0xff]  ;;  %v689_v29 = vpop.f32.mrb[79].mxu0  ;;  %v4249_v60 = vld [vmem:[#allocation43_spill] sm:$0xff] }
 0x19e   :  { %v1548_v19 = vmax.f32 %v4244_v20, %v1450_v43  ;;  %v1598_v49 = vmax.f32 %v1500_v61, %v1549_v5  ;;  %v1453_v55 = vmax.f32 %v1175_v38, 0.0  ;;  %v1418_v10 = vmax.f32 %v3758_v33, 0.0  ;;  %v1179_v5 = vpop.f32.mrb[79].mxu1  ;;  %v4251_v62 = vld [vmem:[#allocation44_spill] sm:$0xff]  ;;  %v4253_v20 = vld [vmem:[#allocation45_spill] sm:$0xff] }
 0x19f   :  { %v1354_v9 = vmax.f32 %v680_v58, 0.0  ;;  %v1452_v37 = vmax.f32 %v1170_v56, 0.0  ;;  %v4246_v34 = vmax.f32 %v4245_v26, 0.0  ;;  %v4248_v22 = vmax.f32 %v4247_v4, 0.0  ;;  %v2188_v26 = vpop.f32.mrb[80].mxu1 }
 0x1a0   :  { %v1597_v40 = vmax.f32 %v1499_v7, %v1548_v19  ;;  %1647 = vst [vmem:[%s4042_s3 + $0xd0] sm:$0xff] %v1598_v49  ;;  %v695_v42 = vadd.f32 %v2038_v41, %v3041_v24  ;;  %v1185_v61 = vadd.f32 %v2185_v57, %v3041_v24  ;;  %v4250_v38 = vmax.f32 %v4249_v60, 0.0  ;;  %v2041_v57 = vpop.f32.mrb[80].mxu0 }
 0x1a1   :  { %v1502_v43 = vmax.f32 %v4246_v34, %v1355_v44  ;;  %v1551_v2 = vmax.f32 %v4248_v22, %v1453_v55  ;;  %v4252_v27 = vmax.f32 %v4251_v62, 0.0  ;;  %v690_v7 = vadd.f32 %v3041_v24, %v689_v29  ;;  %v3825_v44 = vld [vmem:[%s4041_s2] ss:$0 sm:$0xff]  ;;  %v4257_v29 = vld [vmem:[#allocation3_spill] sm:$0xff] }
 0x1a2   :  { %1646 = vst [vmem:[%s4042_s3 + $0xc8] sm:$0xff] %v1597_v40  ;;  %v1501_v59 = vmax.f32 %v4250_v38, %v1354_v9  ;;  %v1180_v63 = vadd.f32 %v3041_v24, %v1179_v5  ;;  %v3820_v19 = vadd.f32 %v4253_v20, %v3041_v24  ;;  %v1357_v56 = vmax.f32 %v695_v42, 0.0  ;;  %v4254_v55 = vld [vmem:[#allocation46_spill] sm:$0xff]  ;;  %v699_v42 = vpop.f32.mrb[81].mxu0  ;;  %v4259_v38 = vld [vmem:[#allocation5_spill] sm:$0xff] }
 0x1a3   :  { %v1550_v46 = vmax.f32 %v4252_v27, %v1452_v37  ;;  %v1600_v58 = vmax.f32 %v1502_v43, %v1551_v2  ;;  %v1455_v49 = vmax.f32 %v1185_v61, 0.0  ;;  %v3829_v40 = vadd.f32 %v3825_v44, %v4254_v55  ;;  %v1189_v61 = vpop.f32.mrb[81].mxu1  ;;  %v4261_v27 = vld [vmem:[#allocation4_spill] sm:$0xff] }
 0x1a4   :  { %v1356_v37 = vmax.f32 %v690_v7, 0.0  ;;  %v1454_v41 = vmax.f32 %v1180_v63, 0.0  ;;  %v4255_v24 = vmax.f32 %v3418_v15, 0.0  ;;  %v4256_v43 = vmax.f32 %v3422_v0, 0.0 }
 0x1a5   :  { %v1599_v9 = vmax.f32 %v1501_v59, %v1550_v46  ;;  %1649 = vst [vmem:[%s4042_s3 + $0xe0] sm:$0xff] %v1600_v58  ;;  %v705_v22 = vadd.f32 %v3825_v44, %v2041_v57  ;;  %v1195_v2 = vadd.f32 %v3825_v44, %v2188_v26  ;;  %v4258_v5 = vmax.f32 %v4257_v29, 0.0  ;;  %v4262_v58 = vld [vmem:[#allocation47_spill] sm:$0xff] }
 0x1a6   :  { %v1504_v34 = vmax.f32 %v4255_v24, %v1357_v56  ;;  %v1553_v4 = vmax.f32 %v4256_v43, %v1455_v49  ;;  %v4260_v59 = vmax.f32 %v4259_v38, 0.0  ;;  %v700_v62 = vadd.f32 %v3825_v44, %v699_v42  ;;  %v4265_v42 = vld [vmem:[#allocation8_spill] sm:$0xff] }
 0x1a7   :  { %1648 = vst [vmem:[%s4042_s3 + $0xd8] sm:$0xff] %v1599_v9  ;;  %v1503_v60 = vmax.f32 %v4258_v5, %v1356_v37  ;;  %v1190_v0 = vadd.f32 %v3825_v44, %v1189_v61  ;;  %v3851_v46 = vadd.f32 %v3825_v44, %v4261_v27  ;;  %v1359_v63 = vmax.f32 %v705_v22, 0.0  ;;  %v2044_v37 = vpop.f32.mrb[82].mxu0  ;;  %v4267_v5 = vld [vmem:[#allocation9_spill] sm:$0xff] }
 0x1a8   :  { %v1552_v15 = vmax.f32 %v4260_v59, %v1454_v41  ;;  %v1602_v7 = vmax.f32 %v1504_v34, %v1553_v4  ;;  %v1457_v20 = vmax.f32 %v1195_v2, 0.0  ;;  %v3855_v56 = vadd.f32 %v3825_v44, %v4262_v58  ;;  %v2191_v41 = vpop.f32.mrb[82].mxu1  ;;  %v709_v22 = vpop.f32.mrb[83].mxu0 }
 0x1a9   :  { %v1358_v55 = vmax.f32 %v700_v62, 0.0  ;;  %v1456_v9 = vmax.f32 %v1190_v0, 0.0  ;;  %v4263_v57 = vmax.f32 %v3439_v6, 0.0  ;;  %v4264_v24 = vmax.f32 %v3445_v1, 0.0  ;;  %v1199_v2 = vpop.f32.mrb[83].mxu1  ;;  %v2047_v58 = vpop.f32.mrb[84].mxu0 }
 0x1aa   :  { %v1601_v49 = vmax.f32 %v1503_v60, %v1552_v15  ;;  %1651 = vst [vmem:[%s4042_s3 + $0xf0] sm:$0xff] %v1602_v7  ;;  %v715_v43 = vadd.f32 %v3825_v44, %v2044_v37  ;;  %v1205_v4 = vadd.f32 %v3825_v44, %v2191_v41  ;;  %v4266_v61 = vmax.f32 %v4265_v42, 0.0  ;;  %v4270_v37 = vld [vmem:[#allocation53_spill] sm:$0xff]  ;;  %v4274_v42 = vld [vmem:[#allocation15_spill] sm:$0xff] }
 0x1ab   :  { %v1506_v26 = vmax.f32 %v4263_v57, %v1359_v63  ;;  %v1555_v34 = vmax.f32 %v4264_v24, %v1457_v20  ;;  %v4268_v60 = vmax.f32 %v4267_v5, 0.0  ;;  %v710_v38 = vadd.f32 %v3825_v44, %v709_v22 }
 0x1ac   :  { %1650 = vst [vmem:[%s4042_s3 + $0xe8] sm:$0xff] %v1601_v49  ;;  %v1505_v29 = vmax.f32 %v4266_v61, %v1358_v55  ;;  %v1200_v1 = vadd.f32 %v3825_v44, %v1199_v2  ;;  %v1323_v59 = vmax.f32 %v3820_v19, 0.0  ;;  %v1361_v62 = vmax.f32 %v715_v43, 0.0  ;;  %v2194_v49 = vpop.f32.mrb[84].mxu1 }
 0x1ad   :  { %v1554_v6 = vmax.f32 %v4268_v60, %v1456_v9  ;;  %v1604_v15 = vmax.f32 %v1506_v26, %v1555_v34  ;;  %v1459_v0 = vmax.f32 %v1205_v4, 0.0  ;;  %v1421_v27 = vmax.f32 %v3829_v40, 0.0  ;;  %v719_v34 = vpop.f32.mrb[85].mxu0  ;;  %v1209_v43 = vpop.f32.mrb[85].mxu1  ;;  %v4272_v4 = vld [vmem:[#allocation14_spill] sm:$0xff] }
 0x1ae   :  { %v1360_v63 = vmax.f32 %v710_v38, 0.0  ;;  %v1458_v20 = vmax.f32 %v1200_v1, 0.0  ;;  %v4269_v55 = vmax.f32 %v3459_v48, 0.0  ;;  %v4271_v41 = vmax.f32 %v4270_v37, 0.0 }
 0x1af   :  { %v1603_v7 = vmax.f32 %v1505_v29, %v1554_v6  ;;  %1653 = vst [vmem:[%s4042_s3 + $0x100] sm:$0xff] %v1604_v15  ;;  %v725_v26 = vadd.f32 %v3825_v44, %v2047_v58  ;;  %v1215_v24 = vadd.f32 %v3825_v44, %v2194_v49  ;;  %v4273_v22 = vmax.f32 %v4272_v4, 0.0  ;;  %v2050_v58 = vpop.f32.mrb[86].mxu0  ;;  %v2197_v49 = vpop.f32.mrb[86].mxu1 }
 0x1b0   :  { %v1508_v9 = vmax.f32 %v4269_v55, %v1361_v62  ;;  %v1557_v57 = vmax.f32 %v4271_v41, %v1459_v0  ;;  %v4275_v61 = vmax.f32 %v4274_v42, 0.0  ;;  %v720_v29 = vadd.f32 %v3825_v44, %v719_v34  ;;  %v729_v37 = vpop.f32.mrb[87].mxu0  ;;  %v1219_v41 = vpop.f32.mrb[87].mxu1  ;;  %v4278_v34 = vld [vmem:[#allocation50_spill] sm:$0xff] }
 0x1b1   :  { %1652 = vst [vmem:[%s4042_s3 + $0xf8] sm:$0xff] %v1603_v7  ;;  %v1507_v2 = vmax.f32 %v4273_v22, %v1360_v63  ;;  %v1210_v5 = vadd.f32 %v3825_v44, %v1209_v43  ;;  %v1322_v60 = vmax.f32 %v3851_v46, 0.0  ;;  %v1363_v38 = vmax.f32 %v725_v26, 0.0 }
 0x1b2   :  { %v1556_v48 = vmax.f32 %v4275_v61, %v1458_v20  ;;  %v1606_v6 = vmax.f32 %v1508_v9, %v1557_v57  ;;  %v1461_v1 = vmax.f32 %v1215_v24, 0.0  ;;  %v1420_v15 = vmax.f32 %v3855_v56, 0.0  ;;  %v4276_v57 = vld [vmem:[#allocation17_spill] sm:$0xff] }
 0x1b3   :  { %v1362_v0 = vmax.f32 %v720_v29, 0.0  ;;  %v1460_v7 = vmax.f32 %v1210_v5, 0.0  ;;  %v1510_v63 = vmax.f32 %v1314_v17, %v1363_v38  ;;  %v735_v55 = vadd.f32 %v3825_v44, %v2050_v58  ;;  %v4281_v61 = vld [vmem:[#allocation49_spill] sm:$0xff]  ;;  %v2053_v38 = vpop.f32.mrb[88].mxu0 }
 0x1b4   :  { %v1605_v62 = vmax.f32 %v1507_v2, %v1556_v48  ;;  %1655 = vst [vmem:[%s4042_s3 + $0x110] sm:$0xff] %v1606_v6  ;;  %v1559_v20 = vmax.f32 %v1412_v11, %v1461_v1  ;;  %v1225_v9 = vadd.f32 %v3825_v44, %v2197_v49  ;;  %v4277_v26 = vmax.f32 %v4276_v57, 0.0  ;;  %v4280_v11 = vld [vmem:[#allocation48_spill] sm:$0xff]  ;;  %v2200_v1 = vpop.f32.mrb[88].mxu1  ;;  %v739_v49 = vpop.f32.mrb[89].mxu0 }
 0x1b5   :  { %v4279_v43 = vmax.f32 %v4278_v34, 0.0  ;;  %v730_v17 = vadd.f32 %v3825_v44, %v729_v37  ;;  %v1220_v25 = vadd.f32 %v3825_v44, %v1219_v41  ;;  %v3917_v4 = vadd.f32 %v3825_v44, %v4280_v11  ;;  %v4284_v37 = vld [vmem:[#allocation55_spill] sm:$0xff] }
 0x1b6   :  { %1654 = vst [vmem:[%s4042_s3 + $0x108] sm:$0xff] %v1605_v62  ;;  %v1509_v24 = vmax.f32 %v4277_v26, %v1362_v0  ;;  %v1608_v22 = vmax.f32 %v1510_v63, %v1559_v20  ;;  %v1365_v2 = vmax.f32 %v735_v55, 0.0  ;;  %v1463_v42 = vmax.f32 %v1225_v9, 0.0  ;;  %v1229_v63 = vpop.f32.mrb[89].mxu1  ;;  %v4282_v20 = vld [vmem:[#allocation54_spill] sm:$0xff] }
 0x1b7   :  { %v1558_v47 = vmax.f32 %v4279_v43, %v1460_v7  ;;  %v3921_v48 = vadd.f32 %v3825_v44, %v4281_v61  ;;  %v1364_v5 = vmax.f32 %v730_v17, 0.0  ;;  %v1462_v6 = vmax.f32 %v1220_v25, 0.0  ;;  %v4287_v43 = vld [vmem:[#allocation11_spill] sm:$0xff] }
 0x1b8   :  { %1657 = vst [vmem:[%s4042_s3 + $0x120] sm:$0xff] %v1608_v22  ;;  %v1512_v62 = vmax.f32 %v1316_v13, %v1365_v2  ;;  %v1561_v0 = vmax.f32 %v1414_v32, %v1463_v42  ;;  %v745_v7 = vadd.f32 %v3825_v44, %v2053_v38  ;;  %v1235_v58 = vadd.f32 %v3825_v44, %v2200_v1  ;;  %v4286_v32 = vld [vmem:[#allocation10_spill] sm:$0xff]  ;;  %v2056_v22 = vpop.f32.mrb[90].mxu0  ;;  %v2203_v2 = vpop.f32.mrb[90].mxu1 }
 0x1b9   :  { %v1607_v29 = vmax.f32 %v1509_v24, %v1558_v47  ;;  %v4283_v55 = vmax.f32 %v4282_v20, 0.0  ;;  %v4285_v41 = vmax.f32 %v4284_v37, 0.0  ;;  %v740_v13 = vadd.f32 %v3825_v44, %v739_v49  ;;  %v1239_v38 = vpop.f32.mrb[91].mxu1 }
 0x1ba   :  { %v1230_v45 = vadd.f32 %v3825_v44, %v1229_v63  ;;  %v3943_v57 = vadd.f32 %v3825_v44, %v4286_v32  ;;  %v1610_v26 = vmax.f32 %v1512_v62, %v1561_v0  ;;  %v1367_v24 = vmax.f32 %v745_v7, 0.0  ;;  %v2206_v53 = vpop.f32.mrb[92].mxu1 }
 0x1bb   :  { %1656 = vst [vmem:[%s4042_s3 + $0x118] sm:$0xff] %v1607_v29  ;;  %v1511_v9 = vmax.f32 %v4283_v55, %v1364_v5  ;;  %v1560_v31 = vmax.f32 %v4285_v41, %v1462_v6  ;;  %v1465_v34 = vmax.f32 %v1235_v58, 0.0  ;;  %v3947_v47 = vadd.f32 %v3825_v44, %v4287_v43  ;;  %v749_v6 = vpop.f32.mrb[91].mxu0  ;;  %v1249_v41 = vpop.f32.mrb[93].mxu1 }
 0x1bc   :  { %v1366_v25 = vmax.f32 %v740_v13, 0.0  ;;  %v1464_v11 = vmax.f32 %v1230_v45, 0.0  ;;  %1659 = vst [vmem:[%s4042_s3 + $0x130] sm:$0xff] %v1610_v26  ;;  %v1514_v42 = vmax.f32 %v1318_v39, %v1367_v24  ;;  %v755_v29 = vadd.f32 %v3825_v44, %v2056_v22  ;;  %v2059_v55 = vpop.f32.mrb[92].mxu0 }
 0x1bd   :  { %v1609_v17 = vmax.f32 %v1511_v9, %v1560_v31  ;;  %v1563_v61 = vmax.f32 %v1416_v21, %v1465_v34  ;;  %v1245_v5 = vadd.f32 %v3825_v44, %v2203_v2  ;;  %v750_v39 = vadd.f32 %v3825_v44, %v749_v6  ;;  %v759_v37 = vpop.f32.mrb[93].mxu0 }
 0x1be   :  { %v1513_v1 = vmax.f32 %v1317_v51, %v1366_v25  ;;  %v1562_v18 = vmax.f32 %v1415_v23, %v1464_v11  ;;  %v1240_v14 = vadd.f32 %v3825_v44, %v1239_v38  ;;  %v1325_v21 = vmax.f32 %v3917_v4, 0.0  ;;  %v2062_v16 = vpop.f32.mrb[94].mxu0 }
 0x1bf   :  { %1658 = vst [vmem:[%s4042_s3 + $0x128] sm:$0xff] %v1609_v17  ;;  %v1612_v62 = vmax.f32 %v1514_v42, %v1563_v61  ;;  %v1369_v0 = vmax.f32 %v755_v29, 0.0  ;;  %v1467_v7 = vmax.f32 %v1245_v5, 0.0  ;;  %v1324_v58 = vmax.f32 %v3943_v57, 0.0  ;;  %v4288_v57 = vld [vmem:[#allocation51_spill] sm:$0xff]  ;;  %v769_v25 = vpop.f32.mrb[95].mxu0 }
 0x1c0   :  { %v1611_v49 = vmax.f32 %v1513_v1, %v1562_v18  ;;  %v1368_v63 = vmax.f32 %v750_v39, 0.0  ;;  %v1466_v20 = vmax.f32 %v1240_v14, 0.0  ;;  %v765_v23 = vadd.f32 %v3825_v44, %v2059_v55  ;;  %v2065_v18 = vpop.f32.mrb[96].mxu0 }
 0x1c1   :  { %1661 = vst [vmem:[%s4042_s3 + $0x140] sm:$0xff] %v1612_v62  ;;  %v1516_v3 = vmax.f32 %v1320_v50, %v1369_v0  ;;  %v1565_v51 = vmax.f32 %v1418_v10, %v1467_v7  ;;  %v1255_v9 = vadd.f32 %v3825_v44, %v2206_v53  ;;  %v760_v50 = vadd.f32 %v3825_v44, %v759_v37  ;;  %v779_v14 = vpop.f32.mrb[97].mxu0 }
 0x1c2   :  { %1660 = vst [vmem:[%s4042_s3 + $0x138] sm:$0xff] %v1611_v49  ;;  %v1515_v31 = vmax.f32 %v1319_v12, %v1368_v63  ;;  %v1564_v8 = vmax.f32 %v1417_v35, %v1466_v20  ;;  %v1250_v33 = vadd.f32 %v3825_v44, %v1249_v41  ;;  %v1422_v10 = vmax.f32 %v3947_v47, 0.0  ;;  %v2209_v12 = vpop.f32.mrb[94].mxu1 }
 0x1c3   :  { %v1614_v13 = vmax.f32 %v1516_v3, %v1565_v51  ;;  %v1371_v45 = vmax.f32 %v765_v23, 0.0  ;;  %v1469_v32 = vmax.f32 %v1255_v9, 0.0  ;;  %v540_v26 = vadd.f32 %v3825_v44, %v4288_v57  ;;  %v1259_v11 = vpop.f32.mrb[95].mxu1 }
 0x1c4   :  { %v1613_v24 = vmax.f32 %v1515_v31, %v1564_v8  ;;  %v1370_v34 = vmax.f32 %v760_v50, 0.0  ;;  %v1468_v43 = vmax.f32 %v1250_v33, 0.0  ;;  %v775_v47 = vadd.f32 %v3825_v44, %v2062_v16  ;;  %v2212_v36 = vpop.f32.mrb[96].mxu1 }
 0x1c5   :  { %1663 = vst [vmem:[%s4042_s3 + $0x150] sm:$0xff] %v1614_v13  ;;  %v1518_v28 = vmax.f32 %v1322_v60, %v1371_v45  ;;  %v1567_v35 = vmax.f32 %v1420_v15, %v1469_v32  ;;  %v1265_v17 = vadd.f32 %v3825_v44, %v2209_v12  ;;  %v770_v60 = vadd.f32 %v3825_v44, %v769_v25  ;;  %v4289_v15 = vld [vmem:[#allocation52_spill] sm:$0xff]  ;;  %v1269_v62 = vpop.f32.mrb[97].mxu1 }
 0x1c6   :  { %1662 = vst [vmem:[%s4042_s3 + $0x148] sm:$0xff] %v1613_v24  ;;  %v1517_v22 = vmax.f32 %v1321_v54, %v1370_v34  ;;  %v1566_v46 = vmax.f32 %v1419_v52, %v1468_v43  ;;  %v1260_v56 = vadd.f32 %v3825_v44, %v1259_v11  ;;  %v1030_v2 = vadd.f32 %v3825_v44, %v4289_v15 }
 0x1c7   :  { %v1616_v42 = vmax.f32 %v1518_v28, %v1567_v35  ;;  %v1373_v61 = vmax.f32 %v775_v47, 0.0  ;;  %v1471_v29 = vmax.f32 %v1265_v17, 0.0  ;;  %v1326_v5 = vmax.f32 %v540_v26, 0.0 }
 0x1c8   :  { %v1615_v6 = vmax.f32 %v1517_v22, %v1566_v46  ;;  %v1372_v38 = vmax.f32 %v770_v60, 0.0  ;;  %v1470_v1 = vmax.f32 %v1260_v56, 0.0  ;;  %v785_v52 = vadd.f32 %v3825_v44, %v2065_v18 }
 0x1c9   :  { %1665 = vst [vmem:[%s4042_s3 + $0x160] sm:$0xff] %v1616_v42  ;;  %v1520_v30 = vmax.f32 %v1324_v58, %v1373_v61  ;;  %v1569_v54 = vmax.f32 %v1422_v10, %v1471_v29  ;;  %v1275_v39 = vadd.f32 %v3825_v44, %v2212_v36  ;;  %v780_v49 = vadd.f32 %v3825_v44, %v779_v14 }
 0x1ca   :  { %1664 = vst [vmem:[%s4042_s3 + $0x158] sm:$0xff] %v1615_v6  ;;  %v1519_v0 = vmax.f32 %v1323_v59, %v1372_v38  ;;  %v1568_v7 = vmax.f32 %v1421_v27, %v1470_v1  ;;  %v1270_v58 = vadd.f32 %v3825_v44, %v1269_v62  ;;  %v1424_v63 = vmax.f32 %v1030_v2, 0.0 }
 0x1cb   :  { %v1618_v20 = vmax.f32 %v1520_v30, %v1569_v54  ;;  %v1375_v55 = vmax.f32 %v785_v52, 0.0  ;;  %v1473_v53 = vmax.f32 %v1275_v39, 0.0  ;;  %v1423_v3 = vmax.f32 %v3921_v48, 0.0 }
 0x1cc   :  { %v1617_v51 = vmax.f32 %v1519_v0, %v1568_v7  ;;  %v1374_v23 = vmax.f32 %v780_v49, 0.0  ;;  %v1472_v9 = vmax.f32 %v1270_v58, 0.0 }
 0x1cd   :  { %1667 = vst [vmem:[%s4042_s3 + $0x170] sm:$0xff] %v1618_v20  ;;  %v1522_v19 = vmax.f32 %v1326_v5, %v1375_v55  ;;  %v1571_v40 = vmax.f32 %v1424_v63, %v1473_v53 }
 0x1ce   :  { %1666 = vst [vmem:[%s4042_s3 + $0x168] sm:$0xff] %v1617_v51  ;;  %v1521_v44 = vmax.f32 %v1325_v21, %v1374_v23  ;;  %v1570_v59 = vmax.f32 %v1423_v3, %v1472_v9 }
 0x1cf   :  { %v1620_v27 = vmax.f32 %v1522_v19, %v1571_v40 }
 0x1d0   :  { %v1619_v37 = vmax.f32 %v1521_v44, %v1570_v59 }
 0x1d1   :  { %1669 = vst [vmem:[%s4042_s3 + $0x180] sm:$0xff] %v1620_v27 }
 0x1d2   :  { %1668 = vst [vmem:[%s4042_s3 + $0x178] sm:$0xff] %v1619_v37 }

// kernel: net_forward.3
= control target key start
LH: loop header
LB: loop body
LE: loop exit
PB: predicated region body
PF: predicated region fallthrough
CT: control target
= control target key end

     0   :  { %vm2611_vm0 = vmmov 0   ;;  %s4614_s1 = inlined_call_operand.vmem [shape: f32[1024,512], index: 1, kind: input, shape index: {}]   ;;  %s4615_s0 = inlined_call_operand.vmem [shape: f32[32,1024], index: 0, kind: input, shape index: {}]   ;;  %s4616_s3 = inlined_call_operand.vmem [shape: f32[512,128], index: 3, kind: input, shape index: {}]   ;;  %s4617_s2 = inlined_call_operand.vmem [shape: f32[1,512], index: 2, kind: input, shape index: {}]   ;;  %s4618_s5 = inlined_call_operand.vmem [shape: f32[128,128], index: 5, kind: input, shape index: {}]   ;;  %s4619_s7 = inlined_call_operand.vmem [shape: f32[128,128], index: 7, kind: input, shape index: {}]   ;;  %s4620_s4 = inlined_call_operand.vmem [shape: f32[1,128], index: 4, kind: input, shape index: {}]   ;;  %s4621_s6 = inlined_call_operand.vmem [shape: f32[1,128], index: 6, kind: input, shape index: {}]   ;;  %s4622_s8 = inlined_call_operand.vmem [shape: f32[1,128], index: 8, kind: input, shape index: {}]   ;;  %s4623_s9 = inlined_call_operand.vmem [shape: f32[8,128], index: 9, kind: output, shape index: {}]  }
   0x1   :  { %v65_v0 = vld [vmem:[%s4614_s1 + $0x8] sm:$0xff]  ;;  %v67_v2 = vld [vmem:[%s4614_s1 + $0x18] sm:$0xff]  ;;  %v64_v5 = vld [vmem:[%s4614_s1] sm:$0xff] }
   0x2   :  { %v69_v1 = vld [vmem:[%s4614_s1 + $0x28] sm:$0xff]  ;;  %v71_v4 = vld [vmem:[%s4614_s1 + $0x38] sm:$0xff]  ;;  %v68_v6 = vld [vmem:[%s4614_s1 + $0x20] sm:$0xff] }
   0x3   :  { %v1919_v3 = vpack.c.bf16 %v69_v1, %v65_v0  ;;  %v2175_v7 = vpack.c.bf16 %v71_v4, %v67_v2  ;;  %v1921_v8 = vpack.c.bf16 %v68_v6, %v64_v5  ;;  %v66_v9 = vld [vmem:[%s4614_s1 + $0x10] sm:$0xff]  ;;  %v73_v11 = vld [vmem:[%s4614_s1 + $0x48] sm:$0xff]  ;;  %v75_v14 = vld [vmem:[%s4614_s1 + $0x58] sm:$0xff] }
   0x4   :  { %v70_v10 = vld [vmem:[%s4614_s1 + $0x30] sm:$0xff]  ;;  %v77_v13 = vld [vmem:[%s4614_s1 + $0x68] sm:$0xff]  ;;  %v79_v15 = vld [vmem:[%s4614_s1 + $0x78] sm:$0xff] }
   0x5   :  { %1920 = vmatprep.subr.bf16.mxu0 %v1919_v3  ;;  %v2177_v12 = vpack.c.bf16 %v70_v10, %v66_v9  ;;  %2176 = vmatprep.subr.bf16.mxu1 %v2175_v7  ;;  %v1923_v16 = vpack.c.bf16 %v77_v13, %v73_v11  ;;  %v2179_v17 = vpack.c.bf16 %v79_v15, %v75_v14  ;;  %v72_v18 = vld [vmem:[%s4614_s1 + $0x40] sm:$0xff]  ;;  %v74_v20 = vld [vmem:[%s4614_s1 + $0x50] sm:$0xff]  ;;  %v81_v23 = vld [vmem:[%s4614_s1 + $0x88] sm:$0xff] }
   0x6   :  { %1922 = vmatpush1.bf16.msra.mxu0 %v1921_v8  ;;  %v76_v19 = vld [vmem:[%s4614_s1 + $0x60] sm:$0xff]  ;;  %v78_v22 = vld [vmem:[%s4614_s1 + $0x70] sm:$0xff]  ;;  %v85_v24 = vld [vmem:[%s4614_s1 + $0xa8] sm:$0xff] }
   0x7   :  { %2178 = vmatpush1.bf16.msra.mxu1 %v2177_v12  ;;  %v1925_v21 = vpack.c.bf16 %v76_v19, %v72_v18  ;;  %1924 = vmatprep.subr.bf16.mxu0 %v1923_v16  ;;  %v2181_v25 = vpack.c.bf16 %v78_v22, %v74_v20  ;;  %v1927_v26 = vpack.c.bf16 %v85_v24, %v81_v23  ;;  %v83_v27 = vld [vmem:[%s4614_s1 + $0x98] sm:$0xff]  ;;  %v80_v29 = vld [vmem:[%s4614_s1 + $0x80] sm:$0xff]  ;;  %v82_v32 = vld [vmem:[%s4614_s1 + $0x90] sm:$0xff] }
   0x8   :  { %2180 = vmatprep.subr.bf16.mxu1 %v2179_v17  ;;  %v87_v28 = vld [vmem:[%s4614_s1 + $0xb8] sm:$0xff]  ;;  %v84_v31 = vld [vmem:[%s4614_s1 + $0xa0] sm:$0xff]  ;;  %v86_v33 = vld [vmem:[%s4614_s1 + $0xb0] sm:$0xff] }
   0x9   :  { %v2183_v30 = vpack.c.bf16 %v87_v28, %v83_v27  ;;  %v1929_v34 = vpack.c.bf16 %v84_v31, %v80_v29  ;;  %v89_v35 = vld [vmem:[%s4614_s1 + $0xc8] sm:$0xff]  ;;  %v91_v37 = vld [vmem:[%s4614_s1 + $0xd8] sm:$0xff]  ;;  %v2185_v38 = vpack.c.bf16 %v86_v33, %v82_v32  ;;  %v88_v41 = vld [vmem:[%s4614_s1 + $0xc0] sm:$0xff] }
   0xa   :  { %1926 = vmatpush1.bf16.msra.mxu0 %v1925_v21  ;;  %v93_v36 = vld [vmem:[%s4614_s1 + $0xe8] sm:$0xff]  ;;  %v95_v40 = vld [vmem:[%s4614_s1 + $0xf8] sm:$0xff]  ;;  %v92_v42 = vld [vmem:[%s4614_s1 + $0xe0] sm:$0xff] }
   0xb   :  { %2182 = vmatpush1.bf16.msra.mxu1 %v2181_v25  ;;  %1928 = vmatprep.subr.bf16.mxu0 %v1927_v26  ;;  %v1931_v39 = vpack.c.bf16 %v93_v36, %v89_v35  ;;  %v2187_v43 = vpack.c.bf16 %v95_v40, %v91_v37  ;;  %v90_v44 = vld [vmem:[%s4614_s1 + $0xd0] sm:$0xff]  ;;  %v97_v46 = vld [vmem:[%s4614_s1 + $0x108] sm:$0xff]  ;;  %v99_v48 = vld [vmem:[%s4614_s1 + $0x118] sm:$0xff]  ;;  %v1933_v50 = vpack.c.bf16 %v92_v42, %v88_v41 }
   0xc   :  { %2184 = vmatprep.subr.bf16.mxu1 %v2183_v30  ;;  %v94_v45 = vld [vmem:[%s4614_s1 + $0xf0] sm:$0xff]  ;;  %v101_v47 = vld [vmem:[%s4614_s1 + $0x128] sm:$0xff]  ;;  %v103_v49 = vld [vmem:[%s4614_s1 + $0x138] sm:$0xff] }
   0xd   :  { %v2189_v51 = vpack.c.bf16 %v94_v45, %v90_v44  ;;  %v1935_v52 = vpack.c.bf16 %v101_v47, %v97_v46  ;;  %v96_v53 = vld [vmem:[%s4614_s1 + $0x100] sm:$0xff]  ;;  %v98_v55 = vld [vmem:[%s4614_s1 + $0x110] sm:$0xff]  ;;  %v2191_v56 = vpack.c.bf16 %v103_v49, %v99_v48  ;;  %v105_v58 = vld [vmem:[%s4614_s1 + $0x148] sm:$0xff] }
   0xe   :  { %1930 = vmatpush1.bf16.msra.mxu0 %v1929_v34  ;;  %v100_v54 = vld [vmem:[%s4614_s1 + $0x120] sm:$0xff]  ;;  %v102_v57 = vld [vmem:[%s4614_s1 + $0x130] sm:$0xff]  ;;  %v109_v59 = vld [vmem:[%s4614_s1 + $0x168] sm:$0xff] }
   0xf   :  { %2186 = vmatpush1.bf16.msra.mxu1 %v2185_v38  ;;  %1932 = vmatprep.subr.bf16.mxu0 %v1931_v39  ;;  %v107_v60 = vld [vmem:[%s4614_s1 + $0x158] sm:$0xff]  ;;  %v1937_v62 = vpack.c.bf16 %v100_v54, %v96_v53  ;;  %v2193_v63 = vpack.c.bf16 %v102_v57, %v98_v55  ;;  %v1939_v0 = vpack.c.bf16 %v109_v59, %v105_v58  ;;  %v104_v1 = vld [vmem:[%s4614_s1 + $0x140] sm:$0xff]  ;;  %v106_v3 = vld [vmem:[%s4614_s1 + $0x150] sm:$0xff] }
  0x10   :  { %2188 = vmatprep.subr.bf16.mxu1 %v2187_v43  ;;  %v111_v61 = vld [vmem:[%s4614_s1 + $0x178] sm:$0xff]  ;;  %v108_v2 = vld [vmem:[%s4614_s1 + $0x160] sm:$0xff]  ;;  %v110_v5 = vld [vmem:[%s4614_s1 + $0x170] sm:$0xff] }
  0x11   :  { %v2195_v4 = vpack.c.bf16 %v111_v61, %v107_v60  ;;  %v113_v6 = vld [vmem:[%s4614_s1 + $0x188] sm:$0xff]  ;;  %v115_v8 = vld [vmem:[%s4614_s1 + $0x198] sm:$0xff]  ;;  %v1941_v10 = vpack.c.bf16 %v108_v2, %v104_v1  ;;  %v2197_v11 = vpack.c.bf16 %v110_v5, %v106_v3  ;;  %v112_v13 = vld [vmem:[%s4614_s1 + $0x180] sm:$0xff] }
  0x12   :  { %1934 = vmatpush1.bf16.msra.mxu0 %v1933_v50  ;;  %v117_v7 = vld [vmem:[%s4614_s1 + $0x1a8] sm:$0xff]  ;;  %v119_v9 = vld [vmem:[%s4614_s1 + $0x1b8] sm:$0xff]  ;;  %v116_v14 = vld [vmem:[%s4614_s1 + $0x1a0] sm:$0xff] }
  0x13   :  { %2190 = vmatpush1.bf16.msra.mxu1 %v2189_v51  ;;  %1936 = vmatprep.subr.bf16.mxu0 %v1935_v52  ;;  %v1943_v12 = vpack.c.bf16 %v117_v7, %v113_v6  ;;  %v114_v15 = vld [vmem:[%s4614_s1 + $0x190] sm:$0xff]  ;;  %v2199_v16 = vpack.c.bf16 %v119_v9, %v115_v8  ;;  %v121_v18 = vld [vmem:[%s4614_s1 + $0x1c8] sm:$0xff]  ;;  %v123_v20 = vld [vmem:[%s4614_s1 + $0x1d8] sm:$0xff]  ;;  %v1945_v22 = vpack.c.bf16 %v116_v14, %v112_v13 }
  0x14   :  { %2192 = vmatprep.subr.bf16.mxu1 %v2191_v56  ;;  %v118_v17 = vld [vmem:[%s4614_s1 + $0x1b0] sm:$0xff]  ;;  %v125_v19 = vld [vmem:[%s4614_s1 + $0x1e8] sm:$0xff]  ;;  %v127_v21 = vld [vmem:[%s4614_s1 + $0x1f8] sm:$0xff] }
  0x15   :  { %v2201_v23 = vpack.c.bf16 %v118_v17, %v114_v15  ;;  %v1947_v24 = vpack.c.bf16 %v125_v19, %v121_v18  ;;  %v120_v25 = vld [vmem:[%s4614_s1 + $0x1c0] sm:$0xff]  ;;  %v122_v27 = vld [vmem:[%s4614_s1 + $0x1d0] sm:$0xff]  ;;  %v2203_v28 = vpack.c.bf16 %v127_v21, %v123_v20  ;;  %v129_v30 = vld [vmem:[%s4614_s1 + $0x208] sm:$0xff] }
  0x16   :  { %1938 = vmatpush1.bf16.msra.mxu0 %v1937_v62  ;;  %v124_v26 = vld [vmem:[%s4614_s1 + $0x1e0] sm:$0xff]  ;;  %v126_v29 = vld [vmem:[%s4614_s1 + $0x1f0] sm:$0xff]  ;;  %v133_v31 = vld [vmem:[%s4614_s1 + $0x228] sm:$0xff] }
  0x17   :  { %2194 = vmatpush1.bf16.msra.mxu1 %v2193_v63  ;;  %1940 = vmatprep.subr.bf16.mxu0 %v1939_v0  ;;  %v131_v32 = vld [vmem:[%s4614_s1 + $0x218] sm:$0xff]  ;;  %v1949_v34 = vpack.c.bf16 %v124_v26, %v120_v25  ;;  %v2205_v35 = vpack.c.bf16 %v126_v29, %v122_v27  ;;  %v1951_v36 = vpack.c.bf16 %v133_v31, %v129_v30  ;;  %v128_v37 = vld [vmem:[%s4614_s1 + $0x200] sm:$0xff]  ;;  %v130_v39 = vld [vmem:[%s4614_s1 + $0x210] sm:$0xff] }
  0x18   :  { %2196 = vmatprep.subr.bf16.mxu1 %v2195_v4  ;;  %v135_v33 = vld [vmem:[%s4614_s1 + $0x238] sm:$0xff]  ;;  %v132_v38 = vld [vmem:[%s4614_s1 + $0x220] sm:$0xff]  ;;  %v134_v41 = vld [vmem:[%s4614_s1 + $0x230] sm:$0xff] }
  0x19   :  { %v2207_v40 = vpack.c.bf16 %v135_v33, %v131_v32  ;;  %v137_v42 = vld [vmem:[%s4614_s1 + $0x248] sm:$0xff]  ;;  %v139_v44 = vld [vmem:[%s4614_s1 + $0x258] sm:$0xff]  ;;  %v1953_v46 = vpack.c.bf16 %v132_v38, %v128_v37  ;;  %v2209_v47 = vpack.c.bf16 %v134_v41, %v130_v39  ;;  %v136_v49 = vld [vmem:[%s4614_s1 + $0x240] sm:$0xff] }
  0x1a   :  { %1942 = vmatpush1.bf16.msra.mxu0 %v1941_v10  ;;  %v141_v43 = vld [vmem:[%s4614_s1 + $0x268] sm:$0xff]  ;;  %v143_v45 = vld [vmem:[%s4614_s1 + $0x278] sm:$0xff]  ;;  %v140_v50 = vld [vmem:[%s4614_s1 + $0x260] sm:$0xff] }
  0x1b   :  { %2198 = vmatpush1.bf16.msra.mxu1 %v2197_v11  ;;  %1944 = vmatprep.subr.bf16.mxu0 %v1943_v12  ;;  %v1955_v48 = vpack.c.bf16 %v141_v43, %v137_v42  ;;  %v138_v51 = vld [vmem:[%s4614_s1 + $0x250] sm:$0xff]  ;;  %v2211_v52 = vpack.c.bf16 %v143_v45, %v139_v44  ;;  %v145_v54 = vld [vmem:[%s4614_s1 + $0x288] sm:$0xff]  ;;  %v147_v56 = vld [vmem:[%s4614_s1 + $0x298] sm:$0xff]  ;;  %v1957_v58 = vpack.c.bf16 %v140_v50, %v136_v49 }
  0x1c   :  { %2200 = vmatprep.subr.bf16.mxu1 %v2199_v16  ;;  %v142_v53 = vld [vmem:[%s4614_s1 + $0x270] sm:$0xff]  ;;  %v149_v55 = vld [vmem:[%s4614_s1 + $0x2a8] sm:$0xff]  ;;  %v151_v57 = vld [vmem:[%s4614_s1 + $0x2b8] sm:$0xff] }
  0x1d   :  { %v2213_v59 = vpack.c.bf16 %v142_v53, %v138_v51  ;;  %v1959_v60 = vpack.c.bf16 %v149_v55, %v145_v54  ;;  %v144_v61 = vld [vmem:[%s4614_s1 + $0x280] sm:$0xff]  ;;  %v146_v63 = vld [vmem:[%s4614_s1 + $0x290] sm:$0xff]  ;;  %v2215_v0 = vpack.c.bf16 %v151_v57, %v147_v56  ;;  %v153_v2 = vld [vmem:[%s4614_s1 + $0x2c8] sm:$0xff] }
  0x1e   :  { %1946 = vmatpush1.bf16.msra.mxu0 %v1945_v22  ;;  %v148_v62 = vld [vmem:[%s4614_s1 + $0x2a0] sm:$0xff]  ;;  %v150_v1 = vld [vmem:[%s4614_s1 + $0x2b0] sm:$0xff]  ;;  %v157_v3 = vld [vmem:[%s4614_s1 + $0x2e8] sm:$0xff] }
  0x1f   :  { %2202 = vmatpush1.bf16.msra.mxu1 %v2201_v23  ;;  %1948 = vmatprep.subr.bf16.mxu0 %v1947_v24  ;;  %v155_v4 = vld [vmem:[%s4614_s1 + $0x2d8] sm:$0xff]  ;;  %v1961_v6 = vpack.c.bf16 %v148_v62, %v144_v61  ;;  %v152_v7 = vld [vmem:[%s4614_s1 + $0x2c0] sm:$0xff]  ;;  %v2217_v8 = vpack.c.bf16 %v150_v1, %v146_v63  ;;  %v1963_v9 = vpack.c.bf16 %v157_v3, %v153_v2  ;;  %v154_v11 = vld [vmem:[%s4614_s1 + $0x2d0] sm:$0xff] }
  0x20   :  { %2204 = vmatprep.subr.bf16.mxu1 %v2203_v28  ;;  %v159_v5 = vld [vmem:[%s4614_s1 + $0x2f8] sm:$0xff]  ;;  %v156_v10 = vld [vmem:[%s4614_s1 + $0x2e0] sm:$0xff]  ;;  %v158_v12 = vld [vmem:[%s4614_s1 + $0x2f0] sm:$0xff] }
  0x21   :  { %v2219_v13 = vpack.c.bf16 %v159_v5, %v155_v4  ;;  %v161_v14 = vld [vmem:[%s4614_s1 + $0x308] sm:$0xff]  ;;  %v163_v17 = vld [vmem:[%s4614_s1 + $0x318] sm:$0xff]  ;;  %v1965_v19 = vpack.c.bf16 %v156_v10, %v152_v7  ;;  %v2221_v20 = vpack.c.bf16 %v158_v12, %v154_v11  ;;  %v160_v22 = vld [vmem:[%s4614_s1 + $0x300] sm:$0xff] }
  0x22   :  { %1950 = vmatpush1.bf16.msra.mxu0 %v1949_v34  ;;  %v165_v15 = vld [vmem:[%s4614_s1 + $0x328] sm:$0xff]  ;;  %v167_v18 = vld [vmem:[%s4614_s1 + $0x338] sm:$0xff]  ;;  %v164_v23 = vld [vmem:[%s4614_s1 + $0x320] sm:$0xff] }
  0x23   :  { %2206 = vmatpush1.bf16.msra.mxu1 %v2205_v35  ;;  %1952 = vmatprep.subr.bf16.mxu0 %v1951_v36  ;;  %v33_v16 = vld [vmem:[%s4615_s0 + $0x8] sm:$0xff]  ;;  %v1967_v21 = vpack.c.bf16 %v165_v15, %v161_v14  ;;  %v162_v24 = vld [vmem:[%s4614_s1 + $0x310] sm:$0xff]  ;;  %v2223_v25 = vpack.c.bf16 %v167_v18, %v163_v17  ;;  %v171_v29 = vld [vmem:[%s4614_s1 + $0x358] sm:$0xff]  ;;  %v1969_v31 = vpack.c.bf16 %v164_v23, %v160_v22 }
  0x24   :  { %2208 = vmatprep.subr.bf16.mxu1 %v2207_v40  ;;  %662 = vmatprep.mubr.f32.mxu0 %v33_v16  ;;  %v166_v26 = vld [vmem:[%s4614_s1 + $0x330] sm:$0xff]  ;;  %v169_v27 = vld [vmem:[%s4614_s1 + $0x348] sm:$0xff]  ;;  %v175_v30 = vld [vmem:[%s4614_s1 + $0x378] sm:$0xff] }
  0x25   :  { %1018 = vmatprep.mubr.f32.mxu1 %v33_v16  ;;  %v173_v28 = vld [vmem:[%s4614_s1 + $0x368] sm:$0xff]  ;;  %v2225_v32 = vpack.c.bf16 %v166_v26, %v162_v24  ;;  %v168_v34 = vld [vmem:[%s4614_s1 + $0x340] sm:$0xff]  ;;  %v170_v36 = vld [vmem:[%s4614_s1 + $0x350] sm:$0xff]  ;;  %v2227_v37 = vpack.c.bf16 %v175_v30, %v171_v29 }
  0x26   :  { %1954 = vmatpush1.bf16.msra.mxu0 %v1953_v46  ;;  %v1971_v33 = vpack.c.bf16 %v173_v28, %v169_v27  ;;  %v172_v35 = vld [vmem:[%s4614_s1 + $0x360] sm:$0xff]  ;;  %v174_v38 = vld [vmem:[%s4614_s1 + $0x370] sm:$0xff]  ;;  %v177_v39 = vld [vmem:[%s4614_s1 + $0x388] sm:$0xff] }
  0x27   :  { %2210 = vmatpush1.bf16.msra.mxu1 %v2209_v47  ;;  %1956 = vmatprep.subr.bf16.mxu0 %v1955_v48  ;;  %v181_v40 = vld [vmem:[%s4614_s1 + $0x3a8] sm:$0xff]  ;;  %v179_v41 = vld [vmem:[%s4614_s1 + $0x398] sm:$0xff]  ;;  %v1973_v43 = vpack.c.bf16 %v172_v35, %v168_v34  ;;  %v2229_v44 = vpack.c.bf16 %v174_v38, %v170_v36  ;;  %v176_v46 = vld [vmem:[%s4614_s1 + $0x380] sm:$0xff] }
  0x28   :  { %2212 = vmatprep.subr.bf16.mxu1 %v2211_v52  ;;  %v183_v42 = vld [vmem:[%s4614_s1 + $0x3b8] sm:$0xff]  ;;  %v1975_v45 = vpack.c.bf16 %v181_v40, %v177_v39  ;;  %v180_v47 = vld [vmem:[%s4614_s1 + $0x3a0] sm:$0xff]  ;;  %v178_v48 = vld [vmem:[%s4614_s1 + $0x390] sm:$0xff] }
  0x29   :  { %v2231_v49 = vpack.c.bf16 %v183_v42, %v179_v41  ;;  %v182_v50 = vld [vmem:[%s4614_s1 + $0x3b0] sm:$0xff]  ;;  %v185_v51 = vld [vmem:[%s4614_s1 + $0x3c8] sm:$0xff]  ;;  %v187_v53 = vld [vmem:[%s4614_s1 + $0x3d8] sm:$0xff]  ;;  %v1977_v55 = vpack.c.bf16 %v180_v47, %v176_v46 }
  0x2a   :  { %1958 = vmatpush1.bf16.msra.mxu0 %v1957_v58  ;;  %v189_v52 = vld [vmem:[%s4614_s1 + $0x3e8] sm:$0xff]  ;;  %v191_v54 = vld [vmem:[%s4614_s1 + $0x3f8] sm:$0xff]  ;;  %v2233_v56 = vpack.c.bf16 %v182_v50, %v178_v48  ;;  %v184_v58 = vld [vmem:[%s4614_s1 + $0x3c0] sm:$0xff] }
  0x2b   :  { %2214 = vmatpush1.bf16.msra.mxu1 %v2213_v59  ;;  %1960 = vmatprep.subr.bf16.mxu0 %v1959_v60  ;;  %v1979_v57 = vpack.c.bf16 %v189_v52, %v185_v51  ;;  %v188_v59 = vld [vmem:[%s4614_s1 + $0x3e0] sm:$0xff]  ;;  %v186_v60 = vld [vmem:[%s4614_s1 + $0x3d0] sm:$0xff]  ;;  %v2235_v61 = vpack.c.bf16 %v191_v54, %v187_v53  ;;  %v193_v63 = vld [vmem:[%s4614_s1 + $0x408] sm:$0xff] }
  0x2c   :  { %2216 = vmatprep.subr.bf16.mxu1 %v2215_v0  ;;  %v190_v62 = vld [vmem:[%s4614_s1 + $0x3f0] sm:$0xff]  ;;  %v197_v0 = vld [vmem:[%s4614_s1 + $0x428] sm:$0xff]  ;;  %v195_v1 = vld [vmem:[%s4614_s1 + $0x418] sm:$0xff]  ;;  %v1981_v3 = vpack.c.bf16 %v188_v59, %v184_v58 }
  0x2d   :  { %v199_v2 = vld [vmem:[%s4614_s1 + $0x438] sm:$0xff]  ;;  %v2237_v4 = vpack.c.bf16 %v190_v62, %v186_v60  ;;  %v1983_v5 = vpack.c.bf16 %v197_v0, %v193_v63  ;;  %v196_v7 = vld [vmem:[%s4614_s1 + $0x420] sm:$0xff]  ;;  %v198_v10 = vld [vmem:[%s4614_s1 + $0x430] sm:$0xff] }
  0x2e   :  { %1962 = vmatpush1.bf16.msra.mxu0 %v1961_v6  ;;  %v192_v6 = vld [vmem:[%s4614_s1 + $0x400] sm:$0xff]  ;;  %v201_v11 = vld [vmem:[%s4614_s1 + $0x448] sm:$0xff]  ;;  %v207_v14 = vld [vmem:[%s4614_s1 + $0x478] sm:$0xff] }
  0x2f   :  { %2218 = vmatpush1.bf16.msra.mxu1 %v2217_v8  ;;  %1964 = vmatprep.subr.bf16.mxu0 %v1963_v9  ;;  %v194_v8 = vld [vmem:[%s4614_s1 + $0x410] sm:$0xff]  ;;  %v2239_v9 = vpack.c.bf16 %v199_v2, %v195_v1  ;;  %v205_v12 = vld [vmem:[%s4614_s1 + $0x468] sm:$0xff]  ;;  %v32_v15 = vld [vmem:[%s4615_s0] sm:$0xff]  ;;  %v1985_v16 = vpack.c.bf16 %v196_v7, %v192_v6 }
  0x30   :  { %2220 = vmatprep.subr.bf16.mxu1 %v2219_v13  ;;  %v203_v13 = vld [vmem:[%s4614_s1 + $0x458] sm:$0xff]  ;;  %v2241_v17 = vpack.c.bf16 %v198_v10, %v194_v8  ;;  %v1987_v18 = vpack.c.bf16 %v205_v12, %v201_v11  ;;  %v206_v23 = vld [vmem:[%s4614_s1 + $0x470] sm:$0xff]  ;;  %v209_v24 = vld [vmem:[%s4614_s1 + $0x488] sm:$0xff] }
  0x31   :  { %v2243_v22 = vpack.c.bf16 %v207_v14, %v203_v13  ;;  %v211_v26 = vld [vmem:[%s4614_s1 + $0x498] sm:$0xff]  ;;  %v214_v35 = vld [vmem:[%s4614_s1 + $0x4b0] sm:$0xff]  ;;  %v217_v36 = vld [vmem:[%s4614_s1 + $0x4c8] sm:$0xff] }
  0x32   :  { %1966 = vmatpush1.bf16.msra.mxu0 %v1965_v19  ;;  %v200_v19 = vld [vmem:[%s4614_s1 + $0x440] sm:$0xff]  ;;  %v215_v27 = vld [vmem:[%s4614_s1 + $0x4b8] sm:$0xff]  ;;  %v222_v47 = vld [vmem:[%s4614_s1 + $0x4f0] sm:$0xff] }
  0x33   :  { %2222 = vmatpush1.bf16.msra.mxu1 %v2221_v20  ;;  %1968 = vmatprep.subr.bf16.mxu0 %v1967_v21  ;;  %v204_v20 = vld [vmem:[%s4614_s1 + $0x460] sm:$0xff]  ;;  %v202_v21 = vld [vmem:[%s4614_s1 + $0x450] sm:$0xff]  ;;  %v2247_v34 = vpack.c.bf16 %v215_v27, %v211_v26  ;;  %v219_v38 = vld [vmem:[%s4614_s1 + $0x4d8] sm:$0xff] }
  0x34   :  { %2224 = vmatprep.subr.bf16.mxu1 %v2223_v25  ;;  %v213_v25 = vld [vmem:[%s4614_s1 + $0x4a8] sm:$0xff]  ;;  %v1989_v28 = vpack.c.bf16 %v204_v20, %v200_v19  ;;  %v2245_v29 = vpack.c.bf16 %v206_v23, %v202_v21  ;;  %v223_v39 = vld [vmem:[%s4614_s1 + $0x4f8] sm:$0xff]  ;;  %v224_v53 = vld [vmem:[%s4614_s1 + $0x500] sm:$0xff] }
  0x35   :  { %v1991_v30 = vpack.c.bf16 %v213_v25, %v209_v24  ;;  %v2251_v46 = vpack.c.bf16 %v223_v39, %v219_v38  ;;  %v225_v48 = vld [vmem:[%s4614_s1 + $0x508] sm:$0xff]  ;;  %v227_v50 = vld [vmem:[%s4614_s1 + $0x518] sm:$0xff]  ;;  %v230_v58 = vld [vmem:[%s4614_s1 + $0x530] sm:$0xff] }
  0x36   :  { %1970 = vmatpush1.bf16.msra.mxu0 %v1969_v31  ;;  %v208_v31 = vld [vmem:[%s4614_s1 + $0x480] sm:$0xff]  ;;  %v231_v51 = vld [vmem:[%s4614_s1 + $0x538] sm:$0xff]  ;;  %v233_v60 = vld [vmem:[%s4614_s1 + $0x548] sm:$0xff] }
  0x37   :  { %2226 = vmatpush1.bf16.msra.mxu1 %v2225_v32  ;;  %1972 = vmatprep.subr.bf16.mxu0 %v1971_v33  ;;  %v212_v32 = vld [vmem:[%s4614_s1 + $0x4a0] sm:$0xff]  ;;  %v210_v33 = vld [vmem:[%s4614_s1 + $0x490] sm:$0xff]  ;;  %v2255_v59 = vpack.c.bf16 %v231_v51, %v227_v50  ;;  %v41_v62 = vld [vmem:[%s4615_s0 + $0x48] sm:$0xff] }
  0x38   :  { %2228 = vmatprep.subr.bf16.mxu1 %v2227_v37  ;;  %v221_v37 = vld [vmem:[%s4614_s1 + $0x4e8] sm:$0xff]  ;;  %v1993_v40 = vpack.c.bf16 %v212_v32, %v208_v31  ;;  %v2249_v41 = vpack.c.bf16 %v214_v35, %v210_v33  ;;  %v235_v63 = vld [vmem:[%s4614_s1 + $0x558] sm:$0xff]  ;;  %v40_v1 = vld [vmem:[%s4615_s0 + $0x40] sm:$0xff] }
  0x39   :  { %v1995_v42 = vpack.c.bf16 %v221_v37, %v217_v36  ;;  %v239_v0 = vld [vmem:[%s4614_s1 + $0x578] sm:$0xff]  ;;  %v236_v6 = vld [vmem:[%s4614_s1 + $0x560] sm:$0xff]  ;;  %v234_v7 = vld [vmem:[%s4614_s1 + $0x550] sm:$0xff] }
  0x3a   :  { %1974 = vmatpush1.bf16.msra.mxu0 %v1973_v43  ;;  %v216_v43 = vld [vmem:[%s4614_s1 + $0x4c0] sm:$0xff]  ;;  %v49_v8 = vld [vmem:[%s4615_s0 + $0x88] sm:$0xff]  ;;  %v238_v10 = vld [vmem:[%s4614_s1 + $0x570] sm:$0xff] }
  0x3b   :  { %2230 = vmatpush1.bf16.msra.mxu1 %v2229_v44  ;;  %1976 = vmatprep.subr.bf16.mxu0 %v1975_v45  ;;  %v220_v44 = vld [vmem:[%s4614_s1 + $0x4e0] sm:$0xff]  ;;  %v218_v45 = vld [vmem:[%s4614_s1 + $0x4d0] sm:$0xff]  ;;  %v241_v11 = vld [vmem:[%s4614_s1 + $0x588] sm:$0xff]  ;;  %v2261_v19 = vpack.c.bf16 %v238_v10, %v234_v7 }
  0x3c   :  { %2232 = vmatprep.subr.bf16.mxu1 %v2231_v49  ;;  %v229_v49 = vld [vmem:[%s4614_s1 + $0x528] sm:$0xff]  ;;  %v1997_v52 = vpack.c.bf16 %v220_v44, %v216_v43  ;;  %v2253_v54 = vpack.c.bf16 %v222_v47, %v218_v45  ;;  %v243_v13 = vld [vmem:[%s4614_s1 + $0x598] sm:$0xff]  ;;  %v244_v21 = vld [vmem:[%s4614_s1 + $0x5a0] sm:$0xff] }
  0x3d   :  { %v245_v12 = vld [vmem:[%s4614_s1 + $0x5a8] sm:$0xff]  ;;  %v247_v14 = vld [vmem:[%s4614_s1 + $0x5b8] sm:$0xff]  ;;  %v246_v23 = vld [vmem:[%s4614_s1 + $0x5b0] sm:$0xff] }
  0x3e   :  { %1978 = vmatpush1.bf16.msra.mxu0 %v1977_v55  ;;  %v1999_v55 = vpack.c.bf16 %v229_v49, %v225_v48  ;;  %v2007_v20 = vpack.c.bf16 %v245_v12, %v241_v11  ;;  %v2263_v24 = vpack.c.bf16 %v247_v14, %v243_v13  ;;  %v249_v25 = vld [vmem:[%s4614_s1 + $0x5c8] sm:$0xff]  ;;  %v56_v27 = vld [vmem:[%s4615_s0 + $0xc0] sm:$0xff]  ;;  %v35_v31 = vld [vmem:[%s4615_s0 + $0x18] sm:$0xff] }
  0x3f   :  { %2234 = vmatpush1.bf16.msra.mxu1 %v2233_v56  ;;  %1980 = vmatprep.subr.bf16.mxu0 %v1979_v57  ;;  %v228_v56 = vld [vmem:[%s4614_s1 + $0x520] sm:$0xff]  ;;  %v226_v57 = vld [vmem:[%s4614_s1 + $0x510] sm:$0xff]  ;;  %v253_v26 = vld [vmem:[%s4614_s1 + $0x5e8] sm:$0xff] }
  0x40   :  { %2236 = vmatprep.subr.bf16.mxu1 %v2235_v61  ;;  %v237_v61 = vld [vmem:[%s4614_s1 + $0x568] sm:$0xff]  ;;  %v2001_v2 = vpack.c.bf16 %v228_v56, %v224_v53  ;;  %v2011_v33 = vpack.c.bf16 %v253_v26, %v249_v25  ;;  %v252_v35 = vld [vmem:[%s4614_s1 + $0x5e0] sm:$0xff]  ;;  %v250_v36 = vld [vmem:[%s4614_s1 + $0x5d0] sm:$0xff] }
  0x41   :  { %v254_v38 = vld [vmem:[%s4614_s1 + $0x5f0] sm:$0xff]  ;;  %v257_v39 = vld [vmem:[%s4614_s1 + $0x608] sm:$0xff]  ;;  %v260_v47 = vld [vmem:[%s4614_s1 + $0x620] sm:$0xff] }
  0x42   :  { %1982 = vmatpush1.bf16.msra.mxu0 %v1981_v3  ;;  %v232_v3 = vld [vmem:[%s4614_s1 + $0x540] sm:$0xff]  ;;  %v2269_v44 = vpack.c.bf16 %v254_v38, %v250_v36  ;;  %v258_v48 = vld [vmem:[%s4614_s1 + $0x610] sm:$0xff]  ;;  %v265_v51 = vld [vmem:[%s4614_s1 + $0x648] sm:$0xff] }
  0x43   :  { %2238 = vmatpush1.bf16.msra.mxu1 %v2237_v4  ;;  %1984 = vmatprep.subr.bf16.mxu0 %v1983_v5  ;;  %v2257_v4 = vpack.c.bf16 %v230_v58, %v226_v57  ;;  %v2003_v5 = vpack.c.bf16 %v237_v61, %v233_v60  ;;  %v262_v50 = vld [vmem:[%s4614_s1 + $0x630] sm:$0xff]  ;;  %v267_v53 = vld [vmem:[%s4614_s1 + $0x658] sm:$0xff]  ;;  %v264_v58 = vld [vmem:[%s4614_s1 + $0x640] sm:$0xff] }
  0x44   :  { %2240 = vmatprep.subr.bf16.mxu1 %v2239_v9  ;;  %v2259_v9 = vpack.c.bf16 %v239_v0, %v235_v63  ;;  %v2273_v56 = vpack.c.bf16 %v262_v50, %v258_v48  ;;  %v266_v60 = vld [vmem:[%s4614_s1 + $0x650] sm:$0xff]  ;;  %v273_v63 = vld [vmem:[%s4614_s1 + $0x688] sm:$0xff]  ;;  %v276_v7 = vld [vmem:[%s4614_s1 + $0x6a0] sm:$0xff] }
  0x45   :  { %663 = vmatmul.mubr.f32.vlgmr.msra.gmra.mrb[0].mxu0 %v32_v15  ;;  %v277_v0 = vld [vmem:[%s4614_s1 + $0x6a8] sm:$0xff]  ;;  %v278_v10 = vld [vmem:[%s4614_s1 + $0x6b0] sm:$0xff]  ;;  %v283_v13 = vld [vmem:[%s4614_s1 + $0x6d8] sm:$0xff] }
  0x46   :  { %1986 = vmatpush1.bf16.msra.mxu0 %v1985_v16  ;;  %1019 = vmatmul.mubr.f32.vlgmr.msra.gmra.mrb[0].mxu1 %v32_v15  ;;  %v48_v15 = vld [vmem:[%s4615_s0 + $0x80] sm:$0xff]  ;;  %v2005_v16 = vpack.c.bf16 %v236_v6, %v232_v3  ;;  %v281_v11 = vld [vmem:[%s4614_s1 + $0x6c8] sm:$0xff]  ;;  %v287_v14 = vld [vmem:[%s4614_s1 + $0x6f8] sm:$0xff] }
  0x47   :  { %2242 = vmatpush1.bf16.msra.mxu1 %v2241_v17  ;;  %1988 = vmatprep.subr.bf16.mxu0 %v1987_v18  ;;  %v240_v17 = vld [vmem:[%s4614_s1 + $0x580] sm:$0xff]  ;;  %v57_v18 = vld [vmem:[%s4615_s0 + $0xc8] sm:$0xff]  ;;  %v291_v25 = vld [vmem:[%s4614_s1 + $0x718] sm:$0xff] }
  0x48   :  { %2244 = vmatprep.subr.bf16.mxu1 %v2243_v22  ;;  %668 = vmatprep.mubr.f32.mxu0 %v41_v62  ;;  %v242_v22 = vld [vmem:[%s4614_s1 + $0x590] sm:$0xff]  ;;  %v272_v6 = vld [vmem:[%s4614_s1 + $0x680] sm:$0xff]  ;;  %v285_v12 = vld [vmem:[%s4614_s1 + $0x6e8] sm:$0xff] }
  0x49   :  { %1024 = vmatprep.mubr.f32.mxu1 %v41_v62  ;;  %669 = vmatmul.mubr.f32.gmra.mrb[2].mxu0 %v40_v1  ;;  %v2265_v32 = vpack.c.bf16 %v246_v23, %v242_v22  ;;  %v270_v62 = vld [vmem:[%s4614_s1 + $0x670] sm:$0xff]  ;;  %v289_v23 = vld [vmem:[%s4614_s1 + $0x708] sm:$0xff]  ;;  %v295_v26 = vld [vmem:[%s4614_s1 + $0x738] sm:$0xff] }
  0x4a   :  { %1990 = vmatpush1.bf16.msra.mxu0 %v1989_v28  ;;  %1025 = vmatmul.mubr.f32.gmra.mrb[2].mxu1 %v40_v1  ;;  %v251_v28 = vld [vmem:[%s4614_s1 + $0x5d8] sm:$0xff]  ;;  %v286_v22 = vld [vmem:[%s4614_s1 + $0x6f0] sm:$0xff]  ;;  %v301_v36 = vld [vmem:[%s4614_s1 + $0x768] sm:$0xff] }
  0x4b   :  { %2246 = vmatpush1.bf16.msra.mxu1 %v2245_v29  ;;  %1992 = vmatprep.subr.bf16.mxu0 %v1991_v30  ;;  %v255_v29 = vld [vmem:[%s4614_s1 + $0x5f8] sm:$0xff]  ;;  %v2009_v30 = vpack.c.bf16 %v244_v21, %v240_v17  ;;  %v2027_v17 = vpack.c.bf16 %v285_v12, %v281_v11  ;;  %v2283_v21 = vpack.c.bf16 %v287_v14, %v283_v13  ;;  %v309_v48 = vld [vmem:[%s4614_s1 + $0x7a8] sm:$0xff]  ;;  %v320_v14 = vld [vmem:[%s4614_s1 + $0x800] sm:$0xff] }
  0x4c   :  { %2248 = vmatprep.subr.bf16.mxu1 %v2247_v34  ;;  %674 = vmatprep.mubr.f32.mxu0 %v49_v8  ;;  %v248_v34 = vld [vmem:[%s4614_s1 + $0x5c0] sm:$0xff]  ;;  %v2267_v37 = vpack.c.bf16 %v255_v29, %v251_v28  ;;  %v275_v1 = vld [vmem:[%s4614_s1 + $0x698] sm:$0xff] }
  0x4d   :  { %1030 = vmatprep.mubr.f32.mxu1 %v49_v8  ;;  %675 = vmatmul.mubr.f32.gmra.mrb[4].mxu0 %v48_v15  ;;  %v2013_v43 = vpack.c.bf16 %v252_v35, %v248_v34  ;;  %v274_v8 = vld [vmem:[%s4614_s1 + $0x690] sm:$0xff]  ;;  %v297_v35 = vld [vmem:[%s4614_s1 + $0x748] sm:$0xff]  ;;  %v303_v38 = vld [vmem:[%s4614_s1 + $0x778] sm:$0xff] }
  0x4e   :  { %1994 = vmatpush1.bf16.msra.mxu0 %v1993_v40  ;;  %1031 = vmatmul.mubr.f32.gmra.mrb[4].mxu1 %v48_v15  ;;  %v261_v40 = vld [vmem:[%s4614_s1 + $0x628] sm:$0xff]  ;;  %v2025_v15 = vpack.c.bf16 %v276_v7, %v272_v6  ;;  %v294_v34 = vld [vmem:[%s4614_s1 + $0x730] sm:$0xff]  ;;  %v311_v50 = vld [vmem:[%s4614_s1 + $0x7b8] sm:$0xff] }
  0x4f   :  { %2250 = vmatpush1.bf16.msra.mxu1 %v2249_v41  ;;  %1996 = vmatprep.subr.bf16.mxu0 %v1995_v42  ;;  %v259_v41 = vld [vmem:[%s4614_s1 + $0x618] sm:$0xff]  ;;  %v2015_v45 = vpack.c.bf16 %v261_v40, %v257_v39  ;;  %v318_v6 = vld [vmem:[%s4614_s1 + $0x7f0] sm:$0xff]  ;;  %v321_v7 = vld [vmem:[%s4614_s1 + $0x808] sm:$0xff] }
  0x50   :  { %2252 = vmatprep.subr.bf16.mxu1 %v2251_v46  ;;  %680 = vmatprep.mubr.f32.mxu0 %v57_v18  ;;  %v263_v42 = vld [vmem:[%s4614_s1 + $0x638] sm:$0xff]  ;;  %v256_v46 = vld [vmem:[%s4614_s1 + $0x600] sm:$0xff] }
  0x51   :  { %1036 = vmatprep.mubr.f32.mxu1 %v57_v18  ;;  %681 = vmatmul.mubr.f32.gmra.mrb[6].mxu0 %v56_v27  ;;  %v2271_v49 = vpack.c.bf16 %v263_v42, %v259_v41  ;;  %v280_v18 = vld [vmem:[%s4614_s1 + $0x6c0] sm:$0xff]  ;;  %v2035_v41 = vpack.c.bf16 %v301_v36, %v297_v35  ;;  %v343_v35 = vld [vmem:[%s4614_s1 + $0x8b8] sm:$0xff] }
  0x52   :  { %1998 = vmatpush1.bf16.msra.mxu0 %v1997_v52  ;;  %1037 = vmatmul.mubr.f32.gmra.mrb[6].mxu1 %v56_v27  ;;  %v269_v52 = vld [vmem:[%s4614_s1 + $0x668] sm:$0xff]  ;;  %v296_v42 = vld [vmem:[%s4614_s1 + $0x740] sm:$0xff]  ;;  %v43_v36 = vld [vmem:[%s4615_s0 + $0x58] sm:$0xff] }
  0x53   :  { %2254 = vmatpush1.bf16.msra.mxu1 %v2253_v54  ;;  %2000 = vmatprep.subr.bf16.mxu0 %v1999_v55  ;;  %v271_v54 = vld [vmem:[%s4614_s1 + $0x678] sm:$0xff]  ;;  %v2017_v55 = vpack.c.bf16 %v260_v47, %v256_v46  ;;  %v2019_v57 = vpack.c.bf16 %v269_v52, %v265_v51  ;;  %v302_v46 = vld [vmem:[%s4614_s1 + $0x770] sm:$0xff]  ;;  %v305_v47 = vld [vmem:[%s4614_s1 + $0x788] sm:$0xff] }
  0x54   :  { %2256 = vmatprep.subr.bf16.mxu1 %v2255_v59  ;;  %751 = vmatprep.mubr.f32.mxu0 %v35_v31  ;;  %v268_v59 = vld [vmem:[%s4614_s1 + $0x660] sm:$0xff]  ;;  %v2275_v61 = vpack.c.bf16 %v271_v54, %v267_v53  ;;  %v2039_v53 = vpack.c.bf16 %v309_v48, %v305_v47  ;;  %v349_v47 = vld [vmem:[%s4614_s1 + $0x8e8] sm:$0xff]  ;;  %v347_v48 = vld [vmem:[%s4614_s1 + $0x8d8] sm:$0xff] }
  0x55   :  { %1107 = vmatprep.mubr.f32.mxu1 %v35_v31  ;;  %v2021_v3 = vpack.c.bf16 %v268_v59, %v264_v58  ;;  %v292_v31 = vld [vmem:[%s4614_s1 + $0x720] sm:$0xff]  ;;  %v310_v58 = vld [vmem:[%s4614_s1 + $0x7b0] sm:$0xff]  ;;  %v313_v59 = vld [vmem:[%s4614_s1 + $0x7c8] sm:$0xff] }
  0x56   :  { %2002 = vmatpush1.bf16.msra.mxu0 %v2001_v2  ;;  %v279_v2 = vld [vmem:[%s4614_s1 + $0x6b8] sm:$0xff]  ;;  %v304_v54 = vld [vmem:[%s4614_s1 + $0x780] sm:$0xff] }
  0x57   :  { %2258 = vmatpush1.bf16.msra.mxu1 %v2257_v4  ;;  %2004 = vmatprep.subr.bf16.mxu0 %v2003_v5  ;;  %v2277_v4 = vpack.c.bf16 %v270_v62, %v266_v60  ;;  %v2023_v5 = vpack.c.bf16 %v277_v0, %v273_v63  ;;  %v317_v60 = vld [vmem:[%s4614_s1 + $0x7e8] sm:$0xff]  ;;  %v319_v62 = vld [vmem:[%s4614_s1 + $0x7f8] sm:$0xff] }
  0x58   :  { %2260 = vmatprep.subr.bf16.mxu1 %v2259_v9  ;;  %v2279_v9 = vpack.c.bf16 %v279_v2, %v275_v1  ;;  %v2043_v1 = vpack.c.bf16 %v317_v60, %v313_v59  ;;  %v312_v2 = vld [vmem:[%s4614_s1 + $0x7c0] sm:$0xff]  ;;  %v350_v59 = vld [vmem:[%s4614_s1 + $0x8f0] sm:$0xff]  ;;  %v353_v60 = vld [vmem:[%s4614_s1 + $0x908] sm:$0xff] }
  0x5a   :  { %2006 = vmatpush1.bf16.msra.mxu0 %v2005_v16  ;;  %v2281_v16 = vpack.c.bf16 %v278_v10, %v274_v8  ;;  %v325_v8 = vld [vmem:[%s4614_s1 + $0x828] sm:$0xff]  ;;  %v327_v10 = vld [vmem:[%s4614_s1 + $0x838] sm:$0xff] }
  0x5b   :  { %2262 = vmatpush1.bf16.msra.mxu1 %v2261_v19  ;;  %2008 = vmatprep.subr.bf16.mxu0 %v2007_v20  ;;  %v284_v19 = vld [vmem:[%s4614_s1 + $0x6e0] sm:$0xff]  ;;  %v282_v20 = vld [vmem:[%s4614_s1 + $0x6d0] sm:$0xff]  ;;  %v2047_v13 = vpack.c.bf16 %v325_v8, %v321_v7 }
  0x5c   :  { %2264 = vmatprep.subr.bf16.mxu1 %v2263_v24  ;;  %v293_v24 = vld [vmem:[%s4614_s1 + $0x728] sm:$0xff]  ;;  %v2029_v27 = vpack.c.bf16 %v284_v19, %v280_v18  ;;  %v2285_v28 = vpack.c.bf16 %v286_v22, %v282_v20  ;;  %v326_v18 = vld [vmem:[%s4614_s1 + $0x830] sm:$0xff]  ;;  %v335_v22 = vld [vmem:[%s4614_s1 + $0x878] sm:$0xff] }
  0x5d   :  { %v2031_v29 = vpack.c.bf16 %v293_v24, %v289_v23  ;;  %v329_v19 = vld [vmem:[%s4614_s1 + $0x848] sm:$0xff]  ;;  %v34_v23 = vld [vmem:[%s4615_s0 + $0x10] sm:$0xff] }
  0x5e   :  { %2010 = vmatpush1.bf16.msra.mxu0 %v2009_v30  ;;  %v288_v30 = vld [vmem:[%s4614_s1 + $0x700] sm:$0xff]  ;;  %v333_v20 = vld [vmem:[%s4614_s1 + $0x868] sm:$0xff]  ;;  %v354_v7 = vld [vmem:[%s4614_s1 + $0x910] sm:$0xff] }
  0x5f   :  { %2266 = vmatpush1.bf16.msra.mxu1 %v2265_v32  ;;  %2012 = vmatprep.subr.bf16.mxu0 %v2011_v33  ;;  %v290_v32 = vld [vmem:[%s4614_s1 + $0x710] sm:$0xff]  ;;  %v2287_v33 = vpack.c.bf16 %v295_v26, %v291_v25  ;;  %v2033_v39 = vpack.c.bf16 %v292_v31, %v288_v30  ;;  %v2051_v26 = vpack.c.bf16 %v333_v20, %v329_v19  ;;  %v364_v19 = vld [vmem:[%s4614_s1 + $0x960] sm:$0xff] }
  0x60   :  { %2268 = vmatprep.subr.bf16.mxu1 %v2267_v37  ;;  %v299_v37 = vld [vmem:[%s4614_s1 + $0x758] sm:$0xff]  ;;  %v2289_v40 = vpack.c.bf16 %v294_v34, %v290_v32  ;;  %v334_v31 = vld [vmem:[%s4614_s1 + $0x870] sm:$0xff]  ;;  %v337_v32 = vld [vmem:[%s4614_s1 + $0x888] sm:$0xff] }
  0x61   :  { %v339_v34 = vld [vmem:[%s4614_s1 + $0x898] sm:$0xff]  ;;  %v362_v20 = vld [vmem:[%s4614_s1 + $0x950] sm:$0xff] }
  0x62   :  { %2014 = vmatpush1.bf16.msra.mxu0 %v2013_v43  ;;  %v300_v43 = vld [vmem:[%s4614_s1 + $0x760] sm:$0xff] }
  0x63   :  { %2270 = vmatpush1.bf16.msra.mxu1 %v2269_v44  ;;  %2016 = vmatprep.subr.bf16.mxu0 %v2015_v45  ;;  %v298_v44 = vld [vmem:[%s4614_s1 + $0x750] sm:$0xff]  ;;  %v2291_v45 = vpack.c.bf16 %v303_v38, %v299_v37  ;;  %v2037_v51 = vpack.c.bf16 %v300_v43, %v296_v42  ;;  %v340_v42 = vld [vmem:[%s4614_s1 + $0x8a0] sm:$0xff] }
  0x64   :  { %2272 = vmatprep.subr.bf16.mxu1 %v2271_v49  ;;  %v307_v49 = vld [vmem:[%s4614_s1 + $0x798] sm:$0xff]  ;;  %v2293_v52 = vpack.c.bf16 %v302_v46, %v298_v44  ;;  %v42_v38 = vld [vmem:[%s4615_s0 + $0x50] sm:$0xff]  ;;  %v2311_v44 = vpack.c.bf16 %v343_v35, %v339_v34  ;;  %v345_v46 = vld [vmem:[%s4614_s1 + $0x8c8] sm:$0xff] }
  0x65   :  { %v338_v43 = vld [vmem:[%s4614_s1 + $0x890] sm:$0xff]  ;;  %v377_v35 = vld [vmem:[%s4614_s1 + $0x9c8] sm:$0xff] }
  0x66   :  { %2018 = vmatpush1.bf16.msra.mxu0 %v2017_v55  ;;  %v308_v55 = vld [vmem:[%s4614_s1 + $0x7a0] sm:$0xff]  ;;  %v374_v34 = vld [vmem:[%s4614_s1 + $0x9b0] sm:$0xff] }
  0x67   :  { %2274 = vmatpush1.bf16.msra.mxu1 %v2273_v56  ;;  %2020 = vmatprep.subr.bf16.mxu0 %v2019_v57  ;;  %v306_v56 = vld [vmem:[%s4614_s1 + $0x790] sm:$0xff]  ;;  %v2295_v57 = vpack.c.bf16 %v311_v50, %v307_v49  ;;  %v2041_v63 = vpack.c.bf16 %v308_v55, %v304_v54  ;;  %v351_v49 = vld [vmem:[%s4614_s1 + $0x8f8] sm:$0xff]  ;;  %v2059_v54 = vpack.c.bf16 %v349_v47, %v345_v46  ;;  %v344_v55 = vld [vmem:[%s4614_s1 + $0x8c0] sm:$0xff] }
  0x68   :  { %2276 = vmatprep.subr.bf16.mxu1 %v2275_v61  ;;  %v315_v61 = vld [vmem:[%s4614_s1 + $0x7d8] sm:$0xff]  ;;  %v2297_v0 = vpack.c.bf16 %v310_v58, %v306_v56  ;;  %v348_v56 = vld [vmem:[%s4614_s1 + $0x8e0] sm:$0xff]  ;;  %v2315_v58 = vpack.c.bf16 %v351_v49, %v347_v48  ;;  %v382_v46 = vld [vmem:[%s4614_s1 + $0x9f0] sm:$0xff] }
  0x69   :  { %v51_v50 = vld [vmem:[%s4615_s0 + $0x98] sm:$0xff]  ;;  %v385_v47 = vld [vmem:[%s4614_s1 + $0xa08] sm:$0xff] }
  0x6a   :  { %2022 = vmatpush1.bf16.msra.mxu0 %v2021_v3  ;;  %v316_v3 = vld [vmem:[%s4614_s1 + $0x7e0] sm:$0xff]  ;;  %v389_v48 = vld [vmem:[%s4614_s1 + $0xa28] sm:$0xff]  ;;  %v387_v49 = vld [vmem:[%s4614_s1 + $0xa18] sm:$0xff] }
  0x6b   :  { %2278 = vmatpush1.bf16.msra.mxu1 %v2277_v4  ;;  %2024 = vmatprep.subr.bf16.mxu0 %v2023_v5  ;;  %v314_v4 = vld [vmem:[%s4614_s1 + $0x7d0] sm:$0xff]  ;;  %v2299_v5 = vpack.c.bf16 %v319_v62, %v315_v61  ;;  %v2045_v11 = vpack.c.bf16 %v316_v3, %v312_v2  ;;  %v357_v61 = vld [vmem:[%s4614_s1 + $0x928] sm:$0xff]  ;;  %v355_v62 = vld [vmem:[%s4614_s1 + $0x918] sm:$0xff] }
  0x6c   :  { %2280 = vmatprep.subr.bf16.mxu1 %v2279_v9  ;;  %v323_v9 = vld [vmem:[%s4614_s1 + $0x818] sm:$0xff]  ;;  %v2301_v12 = vpack.c.bf16 %v318_v6, %v314_v4  ;;  %v58_v2 = vld [vmem:[%s4615_s0 + $0xd0] sm:$0xff]  ;;  %v2063_v4 = vpack.c.bf16 %v357_v61, %v353_v60  ;;  %v356_v6 = vld [vmem:[%s4614_s1 + $0x920] sm:$0xff] }
  0x6d   :  { %v397_v60 = vld [vmem:[%s4614_s1 + $0xa68] sm:$0xff]  ;;  %v395_v61 = vld [vmem:[%s4614_s1 + $0xa58] sm:$0xff] }
  0x6e   :  { %2026 = vmatpush1.bf16.msra.mxu0 %v2025_v15  ;;  %v324_v15 = vld [vmem:[%s4614_s1 + $0x820] sm:$0xff] }
  0x6f   :  { %2282 = vmatpush1.bf16.msra.mxu1 %v2281_v16  ;;  %2028 = vmatprep.subr.bf16.mxu0 %v2027_v17  ;;  %v322_v16 = vld [vmem:[%s4614_s1 + $0x810] sm:$0xff]  ;;  %v2303_v17 = vpack.c.bf16 %v327_v10, %v323_v9  ;;  %v2049_v24 = vpack.c.bf16 %v324_v15, %v320_v14  ;;  %v361_v10 = vld [vmem:[%s4614_s1 + $0x948] sm:$0xff] }
  0x70   :  { %2284 = vmatprep.subr.bf16.mxu1 %v2283_v21  ;;  %v331_v21 = vld [vmem:[%s4614_s1 + $0x858] sm:$0xff]  ;;  %v2305_v25 = vpack.c.bf16 %v326_v18, %v322_v16  ;;  %v358_v9 = vld [vmem:[%s4614_s1 + $0x930] sm:$0xff]  ;;  %v37_v14 = vld [vmem:[%s4615_s0 + $0x28] sm:$0xff] }
  0x71   :  { %v2307_v30 = vpack.c.bf16 %v335_v22, %v331_v21  ;;  %v2321_v16 = vpack.c.bf16 %v358_v9, %v354_v7  ;;  %v360_v18 = vld [vmem:[%s4614_s1 + $0x940] sm:$0xff]  ;;  %v366_v22 = vld [vmem:[%s4614_s1 + $0x970] sm:$0xff]  ;;  %v401_v7 = vld [vmem:[%s4614_s1 + $0xa88] sm:$0xff] }
  0x72   :  { %2030 = vmatpush1.bf16.msra.mxu0 %v2029_v27  ;;  %v328_v27 = vld [vmem:[%s4614_s1 + $0x840] sm:$0xff]  ;;  %v403_v9 = vld [vmem:[%s4614_s1 + $0xa98] sm:$0xff] }
  0x73   :  { %2286 = vmatpush1.bf16.msra.mxu1 %v2285_v28  ;;  %2032 = vmatprep.subr.bf16.mxu0 %v2031_v29  ;;  %v332_v28 = vld [vmem:[%s4614_s1 + $0x860] sm:$0xff]  ;;  %v330_v29 = vld [vmem:[%s4614_s1 + $0x850] sm:$0xff] }
  0x74   :  { %2288 = vmatprep.subr.bf16.mxu1 %v2287_v33  ;;  %v341_v33 = vld [vmem:[%s4614_s1 + $0x8a8] sm:$0xff]  ;;  %v2053_v37 = vpack.c.bf16 %v332_v28, %v328_v27  ;;  %v2069_v27 = vpack.c.bf16 %v364_v19, %v360_v18  ;;  %v2325_v28 = vpack.c.bf16 %v366_v22, %v362_v20  ;;  %v406_v18 = vld [vmem:[%s4614_s1 + $0xab0] sm:$0xff]  ;;  %v415_v22 = vld [vmem:[%s4614_s1 + $0xaf8] sm:$0xff] }
  0x75   :  { %v409_v19 = vld [vmem:[%s4614_s1 + $0xac8] sm:$0xff] }
  0x76   :  { %2034 = vmatpush1.bf16.msra.mxu0 %v2033_v39  ;;  %v2309_v39 = vpack.c.bf16 %v334_v31, %v330_v29  ;;  %v372_v31 = vld [vmem:[%s4614_s1 + $0x9a0] sm:$0xff]  ;;  %v413_v20 = vld [vmem:[%s4614_s1 + $0xae8] sm:$0xff] }
  0x77   :  { %2290 = vmatpush1.bf16.msra.mxu1 %v2289_v40  ;;  %2036 = vmatprep.subr.bf16.mxu0 %v2035_v41  ;;  %v2055_v40 = vpack.c.bf16 %v341_v33, %v337_v32  ;;  %v336_v41 = vld [vmem:[%s4614_s1 + $0x880] sm:$0xff]  ;;  %v370_v32 = vld [vmem:[%s4614_s1 + $0x990] sm:$0xff] }
  0x78   :  { %2292 = vmatprep.subr.bf16.mxu1 %v2291_v45  ;;  %v342_v45 = vld [vmem:[%s4614_s1 + $0x8b0] sm:$0xff] }
  0x7a   :  { %2038 = vmatpush1.bf16.msra.mxu0 %v2037_v51  ;;  %v2057_v51 = vpack.c.bf16 %v340_v42, %v336_v41  ;;  %v376_v42 = vld [vmem:[%s4614_s1 + $0x9c0] sm:$0xff] }
  0x7b   :  { %2294 = vmatpush1.bf16.msra.mxu1 %v2293_v52  ;;  %2040 = vmatprep.subr.bf16.mxu0 %v2039_v53  ;;  %v50_v52 = vld [vmem:[%s4615_s0 + $0x90] sm:$0xff]  ;;  %v2313_v53 = vpack.c.bf16 %v342_v45, %v338_v43  ;;  %v380_v43 = vld [vmem:[%s4614_s1 + $0x9e0] sm:$0xff] }
  0x7c   :  { %2296 = vmatprep.subr.bf16.mxu1 %v2295_v57  ;;  %v346_v57 = vld [vmem:[%s4614_s1 + $0x8d0] sm:$0xff] }
  0x7d   :  { %v2317_v3 = vpack.c.bf16 %v350_v59, %v346_v57  ;;  %v393_v59 = vld [vmem:[%s4614_s1 + $0xa48] sm:$0xff] }
  0x7e   :  { %2042 = vmatpush1.bf16.msra.mxu0 %v2041_v63  ;;  %v359_v63 = vld [vmem:[%s4614_s1 + $0x938] sm:$0xff] }
  0x7f   :  { %2298 = vmatpush1.bf16.msra.mxu1 %v2297_v0  ;;  %2044 = vmatprep.subr.bf16.mxu0 %v2043_v1  ;;  %v59_v0 = vld [vmem:[%s4615_s0 + $0xd8] sm:$0xff]  ;;  %v2061_v1 = vpack.c.bf16 %v348_v56, %v344_v55  ;;  %v2319_v8 = vpack.c.bf16 %v359_v63, %v355_v62  ;;  %v388_v55 = vld [vmem:[%s4614_s1 + $0xa20] sm:$0xff]  ;;  %v386_v56 = vld [vmem:[%s4614_s1 + $0xa10] sm:$0xff] }
  0x80   :  { %2300 = vmatprep.subr.bf16.mxu1 %v2299_v5  ;;  %v352_v5 = vld [vmem:[%s4614_s1 + $0x900] sm:$0xff]  ;;  %v399_v62 = vld [vmem:[%s4614_s1 + $0xa78] sm:$0xff] }
  0x81   :  { %v2065_v15 = vpack.c.bf16 %v356_v6, %v352_v5  ;;  %v2339_v5 = vpack.c.bf16 %v399_v62, %v395_v61  ;;  %v398_v6 = vld [vmem:[%s4614_s1 + $0xa70] sm:$0xff]  ;;  %v432_v62 = vld [vmem:[%s4614_s1 + $0xb80] sm:$0xff] }
  0x82   :  { %2046 = vmatpush1.bf16.msra.mxu0 %v2045_v11  ;;  %v365_v11 = vld [vmem:[%s4614_s1 + $0x968] sm:$0xff] }
  0x83   :  { %2302 = vmatpush1.bf16.msra.mxu1 %v2301_v12  ;;  %2048 = vmatprep.subr.bf16.mxu0 %v2047_v13  ;;  %v363_v12 = vld [vmem:[%s4614_s1 + $0x958] sm:$0xff] }
  0x84   :  { %2304 = vmatprep.subr.bf16.mxu1 %v2303_v17  ;;  %v367_v13 = vld [vmem:[%s4614_s1 + $0x978] sm:$0xff]  ;;  %v2067_v17 = vpack.c.bf16 %v365_v11, %v361_v10 }
  0x85   :  { %752 = vmatmul.mubr.f32.vlgmr.msra.gmra.mrb[0].mxu0 %v34_v23  ;;  %v2323_v21 = vpack.c.bf16 %v367_v13, %v363_v12  ;;  %v407_v10 = vld [vmem:[%s4614_s1 + $0xab8] sm:$0xff] }
  0x86   :  { %2050 = vmatpush1.bf16.msra.mxu0 %v2049_v24  ;;  %1108 = vmatmul.mubr.f32.vlgmr.msra.gmra.mrb[0].mxu1 %v34_v23  ;;  %v369_v23 = vld [vmem:[%s4614_s1 + $0x988] sm:$0xff] }
  0x87   :  { %2306 = vmatpush1.bf16.msra.mxu1 %v2305_v25  ;;  %2052 = vmatprep.subr.bf16.mxu0 %v2051_v26  ;;  %v373_v24 = vld [vmem:[%s4614_s1 + $0x9a8] sm:$0xff]  ;;  %v371_v25 = vld [vmem:[%s4614_s1 + $0x998] sm:$0xff] }
  0x88   :  { %2308 = vmatprep.subr.bf16.mxu1 %v2307_v30  ;;  %757 = vmatprep.mubr.f32.mxu0 %v43_v36  ;;  %v375_v26 = vld [vmem:[%s4614_s1 + $0x9b8] sm:$0xff]  ;;  %v2071_v29 = vpack.c.bf16 %v373_v24, %v369_v23  ;;  %v368_v30 = vld [vmem:[%s4614_s1 + $0x980] sm:$0xff] }
  0x89   :  { %1113 = vmatprep.mubr.f32.mxu1 %v43_v36  ;;  %758 = vmatmul.mubr.f32.gmra.mrb[2].mxu0 %v42_v38  ;;  %v2327_v33 = vpack.c.bf16 %v375_v26, %v371_v25  ;;  %v381_v36 = vld [vmem:[%s4614_s1 + $0x9e8] sm:$0xff]  ;;  %v2091_v25 = vpack.c.bf16 %v413_v20, %v409_v19  ;;  %v408_v26 = vld [vmem:[%s4614_s1 + $0xac0] sm:$0xff] }
  0x8a   :  { %2054 = vmatpush1.bf16.msra.mxu0 %v2053_v37  ;;  %1114 = vmatmul.mubr.f32.gmra.mrb[2].mxu1 %v42_v38  ;;  %v379_v37 = vld [vmem:[%s4614_s1 + $0x9d8] sm:$0xff]  ;;  %v2075_v41 = vpack.c.bf16 %v381_v36, %v377_v35 }
  0x8b   :  { %2310 = vmatpush1.bf16.msra.mxu1 %v2309_v39  ;;  %2056 = vmatprep.subr.bf16.mxu0 %v2055_v40  ;;  %v383_v38 = vld [vmem:[%s4614_s1 + $0x9f8] sm:$0xff]  ;;  %v2073_v39 = vpack.c.bf16 %v372_v31, %v368_v30  ;;  %v2329_v40 = vpack.c.bf16 %v374_v34, %v370_v32  ;;  %v414_v30 = vld [vmem:[%s4614_s1 + $0xaf0] sm:$0xff]  ;;  %v417_v31 = vld [vmem:[%s4614_s1 + $0xb08] sm:$0xff] }
  0x8c   :  { %2312 = vmatprep.subr.bf16.mxu1 %v2311_v44  ;;  %763 = vmatprep.mubr.f32.mxu0 %v51_v50  ;;  %v378_v44 = vld [vmem:[%s4614_s1 + $0x9d0] sm:$0xff]  ;;  %v2331_v45 = vpack.c.bf16 %v383_v38, %v379_v37  ;;  %v421_v32 = vld [vmem:[%s4614_s1 + $0xb28] sm:$0xff]  ;;  %v423_v34 = vld [vmem:[%s4614_s1 + $0xb38] sm:$0xff] }
  0x8d   :  { %1119 = vmatprep.mubr.f32.mxu1 %v51_v50  ;;  %764 = vmatmul.mubr.f32.gmra.mrb[4].mxu0 %v50_v52  ;;  %v391_v50 = vld [vmem:[%s4614_s1 + $0xa38] sm:$0xff]  ;;  %v2095_v37 = vpack.c.bf16 %v421_v32, %v417_v31  ;;  %v416_v38 = vld [vmem:[%s4614_s1 + $0xb00] sm:$0xff] }
  0x8e   :  { %2058 = vmatpush1.bf16.msra.mxu0 %v2057_v51  ;;  %1120 = vmatmul.mubr.f32.gmra.mrb[4].mxu1 %v50_v52  ;;  %v2077_v51 = vpack.c.bf16 %v380_v43, %v376_v42  ;;  %v2333_v52 = vpack.c.bf16 %v382_v46, %v378_v44  ;;  %v2335_v57 = vpack.c.bf16 %v391_v50, %v387_v49  ;;  %v422_v42 = vld [vmem:[%s4614_s1 + $0xb30] sm:$0xff]  ;;  %v425_v43 = vld [vmem:[%s4614_s1 + $0xb48] sm:$0xff]  ;;  %v431_v46 = vld [vmem:[%s4614_s1 + $0xb78] sm:$0xff] }
  0x8f   :  { %2314 = vmatpush1.bf16.msra.mxu1 %v2313_v53  ;;  %2060 = vmatprep.subr.bf16.mxu0 %v2059_v54  ;;  %v2079_v53 = vpack.c.bf16 %v389_v48, %v385_v47  ;;  %v384_v54 = vld [vmem:[%s4614_s1 + $0xa00] sm:$0xff]  ;;  %v429_v44 = vld [vmem:[%s4614_s1 + $0xb68] sm:$0xff] }
  0x90   :  { %2316 = vmatprep.subr.bf16.mxu1 %v2315_v58  ;;  %769 = vmatprep.mubr.f32.mxu0 %v59_v0  ;;  %v390_v58 = vld [vmem:[%s4614_s1 + $0xa30] sm:$0xff]  ;;  %v2081_v63 = vpack.c.bf16 %v388_v55, %v384_v54  ;;  %v2099_v49 = vpack.c.bf16 %v429_v44, %v425_v43  ;;  %v424_v50 = vld [vmem:[%s4614_s1 + $0xb40] sm:$0xff]  ;;  %v433_v55 = vld [vmem:[%s4614_s1 + $0xb88] sm:$0xff] }
  0x91   :  { %1125 = vmatprep.mubr.f32.mxu1 %v59_v0  ;;  %770 = vmatmul.mubr.f32.gmra.mrb[6].mxu0 %v58_v2  ;;  %v2337_v0 = vpack.c.bf16 %v390_v58, %v386_v56  ;;  %v430_v54 = vld [vmem:[%s4614_s1 + $0xb70] sm:$0xff]  ;;  %v437_v56 = vld [vmem:[%s4614_s1 + $0xba8] sm:$0xff]  ;;  %v439_v58 = vld [vmem:[%s4614_s1 + $0xbb8] sm:$0xff] }
  0x92   :  { %2062 = vmatpush1.bf16.msra.mxu0 %v2061_v1  ;;  %1126 = vmatmul.mubr.f32.gmra.mrb[6].mxu1 %v58_v2  ;;  %v2083_v1 = vpack.c.bf16 %v397_v60, %v393_v59  ;;  %v392_v2 = vld [vmem:[%s4614_s1 + $0xa40] sm:$0xff]  ;;  %v2103_v61 = vpack.c.bf16 %v437_v56, %v433_v55  ;;  %v471_v43 = vld [vmem:[%s4614_s1 + $0xcb8] sm:$0xff]  ;;  %v45_v44 = vld [vmem:[%s4615_s0 + $0x68] sm:$0xff] }
  0x93   :  { %2318 = vmatpush1.bf16.msra.mxu1 %v2317_v3  ;;  %2064 = vmatprep.subr.bf16.mxu0 %v2063_v4  ;;  %v396_v3 = vld [vmem:[%s4614_s1 + $0xa60] sm:$0xff]  ;;  %v394_v4 = vld [vmem:[%s4614_s1 + $0xa50] sm:$0xff]  ;;  %v477_v55 = vld [vmem:[%s4614_s1 + $0xce8] sm:$0xff] }
  0x94   :  { %2320 = vmatprep.subr.bf16.mxu1 %v2319_v8  ;;  %840 = vmatprep.mubr.f32.mxu0 %v37_v14  ;;  %v405_v8 = vld [vmem:[%s4614_s1 + $0xaa8] sm:$0xff]  ;;  %v2085_v11 = vpack.c.bf16 %v396_v3, %v392_v2  ;;  %v2341_v12 = vpack.c.bf16 %v398_v6, %v394_v4  ;;  %v438_v2 = vld [vmem:[%s4614_s1 + $0xbb0] sm:$0xff]  ;;  %v447_v6 = vld [vmem:[%s4614_s1 + $0xbf8] sm:$0xff] }
  0x95   :  { %1196 = vmatprep.mubr.f32.mxu1 %v37_v14  ;;  %v2087_v13 = vpack.c.bf16 %v405_v8, %v401_v7  ;;  %v400_v14 = vld [vmem:[%s4614_s1 + $0xa80] sm:$0xff]  ;;  %v441_v3 = vld [vmem:[%s4614_s1 + $0xbc8] sm:$0xff]  ;;  %v475_v56 = vld [vmem:[%s4614_s1 + $0xcd8] sm:$0xff] }
  0x96   :  { %2066 = vmatpush1.bf16.msra.mxu0 %v2065_v15  ;;  %v404_v15 = vld [vmem:[%s4614_s1 + $0xaa0] sm:$0xff]  ;;  %v445_v4 = vld [vmem:[%s4614_s1 + $0xbe8] sm:$0xff] }
  0x97   :  { %2322 = vmatpush1.bf16.msra.mxu1 %v2321_v16  ;;  %2068 = vmatprep.subr.bf16.mxu0 %v2067_v17  ;;  %v402_v16 = vld [vmem:[%s4614_s1 + $0xa90] sm:$0xff]  ;;  %v2343_v17 = vpack.c.bf16 %v407_v10, %v403_v9  ;;  %v2089_v23 = vpack.c.bf16 %v404_v15, %v400_v14  ;;  %v2107_v9 = vpack.c.bf16 %v445_v4, %v441_v3  ;;  %v440_v10 = vld [vmem:[%s4614_s1 + $0xbc0] sm:$0xff]  ;;  %v449_v15 = vld [vmem:[%s4614_s1 + $0xc08] sm:$0xff] }
  0x98   :  { %2324 = vmatprep.subr.bf16.mxu1 %v2323_v21  ;;  %v411_v21 = vld [vmem:[%s4614_s1 + $0xad8] sm:$0xff]  ;;  %v2345_v24 = vpack.c.bf16 %v406_v18, %v402_v16  ;;  %v446_v14 = vld [vmem:[%s4614_s1 + $0xbf0] sm:$0xff]  ;;  %v453_v16 = vld [vmem:[%s4614_s1 + $0xc28] sm:$0xff] }
  0x99   :  { %v455_v18 = vld [vmem:[%s4614_s1 + $0xc38] sm:$0xff]  ;;  %v36_v31 = vld [vmem:[%s4615_s0 + $0x20] sm:$0xff]  ;;  %v478_v3 = vld [vmem:[%s4614_s1 + $0xcf0] sm:$0xff] }
  0x9a   :  { %2070 = vmatpush1.bf16.msra.mxu0 %v2069_v27  ;;  %v412_v27 = vld [vmem:[%s4614_s1 + $0xae0] sm:$0xff]  ;;  %v481_v4 = vld [vmem:[%s4614_s1 + $0xd08] sm:$0xff] }
  0x9b   :  { %2326 = vmatpush1.bf16.msra.mxu1 %v2325_v28  ;;  %2072 = vmatprep.subr.bf16.mxu0 %v2071_v29  ;;  %v410_v28 = vld [vmem:[%s4614_s1 + $0xad0] sm:$0xff]  ;;  %v2347_v29 = vpack.c.bf16 %v415_v22, %v411_v21  ;;  %v2093_v35 = vpack.c.bf16 %v412_v27, %v408_v26  ;;  %v2111_v21 = vpack.c.bf16 %v453_v16, %v449_v15  ;;  %v448_v22 = vld [vmem:[%s4614_s1 + $0xc00] sm:$0xff]  ;;  %v457_v27 = vld [vmem:[%s4614_s1 + $0xc48] sm:$0xff] }
  0x9c   :  { %2328 = vmatprep.subr.bf16.mxu1 %v2327_v33  ;;  %v419_v33 = vld [vmem:[%s4614_s1 + $0xb18] sm:$0xff]  ;;  %v2349_v36 = vpack.c.bf16 %v414_v30, %v410_v28  ;;  %v454_v26 = vld [vmem:[%s4614_s1 + $0xc30] sm:$0xff]  ;;  %v461_v28 = vld [vmem:[%s4614_s1 + $0xc68] sm:$0xff] }
  0x9d   :  { %v463_v30 = vld [vmem:[%s4614_s1 + $0xc78] sm:$0xff]  ;;  %v482_v15 = vld [vmem:[%s4614_s1 + $0xd10] sm:$0xff] }
  0x9e   :  { %2074 = vmatpush1.bf16.msra.mxu0 %v2073_v39  ;;  %v420_v39 = vld [vmem:[%s4614_s1 + $0xb20] sm:$0xff] }
  0x9f   :  { %2330 = vmatpush1.bf16.msra.mxu1 %v2329_v40  ;;  %2076 = vmatprep.subr.bf16.mxu0 %v2075_v41  ;;  %v418_v40 = vld [vmem:[%s4614_s1 + $0xb10] sm:$0xff]  ;;  %v2351_v41 = vpack.c.bf16 %v423_v34, %v419_v33  ;;  %v2097_v47 = vpack.c.bf16 %v420_v39, %v416_v38  ;;  %v2115_v34 = vpack.c.bf16 %v461_v28, %v457_v27  ;;  %v492_v27 = vld [vmem:[%s4614_s1 + $0xd60] sm:$0xff] }
  0xa0   :  { %2332 = vmatprep.subr.bf16.mxu1 %v2331_v45  ;;  %v427_v45 = vld [vmem:[%s4614_s1 + $0xb58] sm:$0xff]  ;;  %v2353_v48 = vpack.c.bf16 %v422_v42, %v418_v40  ;;  %v462_v39 = vld [vmem:[%s4614_s1 + $0xc70] sm:$0xff]  ;;  %v465_v40 = vld [vmem:[%s4614_s1 + $0xc88] sm:$0xff] }
  0xa1   :  { %v467_v42 = vld [vmem:[%s4614_s1 + $0xc98] sm:$0xff]  ;;  %v490_v28 = vld [vmem:[%s4614_s1 + $0xd50] sm:$0xff] }
  0xa2   :  { %2078 = vmatpush1.bf16.msra.mxu0 %v2077_v51  ;;  %v428_v51 = vld [vmem:[%s4614_s1 + $0xb60] sm:$0xff] }
  0xa3   :  { %2334 = vmatpush1.bf16.msra.mxu1 %v2333_v52  ;;  %2080 = vmatprep.subr.bf16.mxu0 %v2079_v53  ;;  %v426_v52 = vld [vmem:[%s4614_s1 + $0xb50] sm:$0xff]  ;;  %v2355_v53 = vpack.c.bf16 %v431_v46, %v427_v45  ;;  %v2101_v59 = vpack.c.bf16 %v428_v51, %v424_v50  ;;  %v44_v46 = vld [vmem:[%s4615_s0 + $0x60] sm:$0xff] }
  0xa4   :  { %2336 = vmatprep.subr.bf16.mxu1 %v2335_v57  ;;  %v435_v57 = vld [vmem:[%s4614_s1 + $0xb98] sm:$0xff]  ;;  %v2357_v60 = vpack.c.bf16 %v430_v54, %v426_v52  ;;  %v468_v50 = vld [vmem:[%s4614_s1 + $0xca0] sm:$0xff]  ;;  %v466_v51 = vld [vmem:[%s4614_s1 + $0xc90] sm:$0xff]  ;;  %v2375_v52 = vpack.c.bf16 %v471_v43, %v467_v42 }
  0xa5   :  { %v473_v54 = vld [vmem:[%s4614_s1 + $0xcc8] sm:$0xff]  ;;  %v502_v42 = vld [vmem:[%s4614_s1 + $0xdb0] sm:$0xff] }
  0xa6   :  { %2082 = vmatpush1.bf16.msra.mxu0 %v2081_v63  ;;  %v436_v63 = vld [vmem:[%s4614_s1 + $0xba0] sm:$0xff]  ;;  %v505_v43 = vld [vmem:[%s4614_s1 + $0xdc8] sm:$0xff] }
  0xa7   :  { %2338 = vmatpush1.bf16.msra.mxu1 %v2337_v0  ;;  %2084 = vmatprep.subr.bf16.mxu0 %v2083_v1  ;;  %v434_v0 = vld [vmem:[%s4614_s1 + $0xb90] sm:$0xff]  ;;  %v2359_v1 = vpack.c.bf16 %v439_v58, %v435_v57  ;;  %v2105_v7 = vpack.c.bf16 %v436_v63, %v432_v62  ;;  %v479_v57 = vld [vmem:[%s4614_s1 + $0xcf8] sm:$0xff]  ;;  %v53_v58 = vld [vmem:[%s4615_s0 + $0xa8] sm:$0xff]  ;;  %v2123_v62 = vpack.c.bf16 %v477_v55, %v473_v54 }
  0xa8   :  { %2340 = vmatprep.subr.bf16.mxu1 %v2339_v5  ;;  %v443_v5 = vld [vmem:[%s4614_s1 + $0xbd8] sm:$0xff]  ;;  %v2361_v8 = vpack.c.bf16 %v438_v2, %v434_v0  ;;  %v472_v63 = vld [vmem:[%s4614_s1 + $0xcc0] sm:$0xff]  ;;  %v2379_v2 = vpack.c.bf16 %v479_v57, %v475_v56  ;;  %v510_v54 = vld [vmem:[%s4614_s1 + $0xdf0] sm:$0xff] }
  0xa9   :  { %v476_v0 = vld [vmem:[%s4614_s1 + $0xce0] sm:$0xff]  ;;  %v513_v55 = vld [vmem:[%s4614_s1 + $0xe08] sm:$0xff]  ;;  %v515_v57 = vld [vmem:[%s4614_s1 + $0xe18] sm:$0xff] }
  0xaa   :  { %2086 = vmatpush1.bf16.msra.mxu0 %v2085_v11  ;;  %v444_v11 = vld [vmem:[%s4614_s1 + $0xbe0] sm:$0xff]  ;;  %v517_v56 = vld [vmem:[%s4614_s1 + $0xe28] sm:$0xff] }
  0xab   :  { %2342 = vmatpush1.bf16.msra.mxu1 %v2341_v12  ;;  %2088 = vmatprep.subr.bf16.mxu0 %v2087_v13  ;;  %v442_v12 = vld [vmem:[%s4614_s1 + $0xbd0] sm:$0xff]  ;;  %v2363_v13 = vpack.c.bf16 %v447_v6, %v443_v5  ;;  %v2109_v19 = vpack.c.bf16 %v444_v11, %v440_v10  ;;  %v485_v5 = vld [vmem:[%s4614_s1 + $0xd28] sm:$0xff]  ;;  %v483_v6 = vld [vmem:[%s4614_s1 + $0xd18] sm:$0xff] }
  0xac   :  { %2344 = vmatprep.subr.bf16.mxu1 %v2343_v17  ;;  %v451_v17 = vld [vmem:[%s4614_s1 + $0xc18] sm:$0xff]  ;;  %v2365_v20 = vpack.c.bf16 %v446_v14, %v442_v12  ;;  %v60_v10 = vld [vmem:[%s4615_s0 + $0xe0] sm:$0xff]  ;;  %v2127_v12 = vpack.c.bf16 %v485_v5, %v481_v4  ;;  %v525_v4 = vld [vmem:[%s4614_s1 + $0xe68] sm:$0xff] }
  0xad   :  { %v484_v14 = vld [vmem:[%s4614_s1 + $0xd20] sm:$0xff]  ;;  %v523_v5 = vld [vmem:[%s4614_s1 + $0xe58] sm:$0xff] }
  0xae   :  { %2090 = vmatpush1.bf16.msra.mxu0 %v2089_v23  ;;  %v452_v23 = vld [vmem:[%s4614_s1 + $0xc20] sm:$0xff] }
  0xaf   :  { %2346 = vmatpush1.bf16.msra.mxu1 %v2345_v24  ;;  %2092 = vmatprep.subr.bf16.mxu0 %v2091_v25  ;;  %v450_v24 = vld [vmem:[%s4614_s1 + $0xc10] sm:$0xff]  ;;  %v2367_v25 = vpack.c.bf16 %v455_v18, %v451_v17  ;;  %v2113_v32 = vpack.c.bf16 %v452_v23, %v448_v22  ;;  %v489_v18 = vld [vmem:[%s4614_s1 + $0xd48] sm:$0xff]  ;;  %v39_v22 = vld [vmem:[%s4615_s0 + $0x38] sm:$0xff] }
  0xb0   :  { %2348 = vmatprep.subr.bf16.mxu1 %v2347_v29  ;;  %v459_v29 = vld [vmem:[%s4614_s1 + $0xc58] sm:$0xff]  ;;  %v2369_v33 = vpack.c.bf16 %v454_v26, %v450_v24  ;;  %v486_v17 = vld [vmem:[%s4614_s1 + $0xd30] sm:$0xff]  ;;  %v488_v26 = vld [vmem:[%s4614_s1 + $0xd40] sm:$0xff] }
  0xb1   :  { %v2371_v38 = vpack.c.bf16 %v463_v30, %v459_v29  ;;  %v2385_v24 = vpack.c.bf16 %v486_v17, %v482_v15  ;;  %v494_v30 = vld [vmem:[%s4614_s1 + $0xd70] sm:$0xff]  ;;  %v529_v15 = vld [vmem:[%s4614_s1 + $0xe88] sm:$0xff]  ;;  %v531_v17 = vld [vmem:[%s4614_s1 + $0xe98] sm:$0xff] }
  0xb2   :  { %2094 = vmatpush1.bf16.msra.mxu0 %v2093_v35  ;;  %v456_v35 = vld [vmem:[%s4614_s1 + $0xc40] sm:$0xff] }
  0xb3   :  { %2350 = vmatpush1.bf16.msra.mxu1 %v2349_v36  ;;  %2096 = vmatprep.subr.bf16.mxu0 %v2095_v37  ;;  %v460_v36 = vld [vmem:[%s4614_s1 + $0xc60] sm:$0xff]  ;;  %v458_v37 = vld [vmem:[%s4614_s1 + $0xc50] sm:$0xff] }
  0xb4   :  { %2352 = vmatprep.subr.bf16.mxu1 %v2351_v41  ;;  %v469_v41 = vld [vmem:[%s4614_s1 + $0xca8] sm:$0xff]  ;;  %v2117_v45 = vpack.c.bf16 %v460_v36, %v456_v35  ;;  %v2133_v35 = vpack.c.bf16 %v492_v27, %v488_v26  ;;  %v2389_v36 = vpack.c.bf16 %v494_v30, %v490_v28  ;;  %v534_v26 = vld [vmem:[%s4614_s1 + $0xeb0] sm:$0xff]  ;;  %v543_v30 = vld [vmem:[%s4614_s1 + $0xef8] sm:$0xff] }
  0xb5   :  { %v537_v27 = vld [vmem:[%s4614_s1 + $0xec8] sm:$0xff] }
  0xb6   :  { %2098 = vmatpush1.bf16.msra.mxu0 %v2097_v47  ;;  %v2373_v47 = vpack.c.bf16 %v462_v39, %v458_v37  ;;  %v500_v39 = vld [vmem:[%s4614_s1 + $0xda0] sm:$0xff]  ;;  %v541_v28 = vld [vmem:[%s4614_s1 + $0xee8] sm:$0xff] }
  0xb7   :  { %2354 = vmatpush1.bf16.msra.mxu1 %v2353_v48  ;;  %2100 = vmatprep.subr.bf16.mxu0 %v2099_v49  ;;  %v2119_v48 = vpack.c.bf16 %v469_v41, %v465_v40  ;;  %v464_v49 = vld [vmem:[%s4614_s1 + $0xc80] sm:$0xff]  ;;  %v498_v40 = vld [vmem:[%s4614_s1 + $0xd90] sm:$0xff] }
  0xb8   :  { %2356 = vmatprep.subr.bf16.mxu1 %v2355_v53  ;;  %v470_v53 = vld [vmem:[%s4614_s1 + $0xcb0] sm:$0xff] }
  0xba   :  { %2102 = vmatpush1.bf16.msra.mxu0 %v2101_v59  ;;  %v2121_v59 = vpack.c.bf16 %v468_v50, %v464_v49  ;;  %v504_v50 = vld [vmem:[%s4614_s1 + $0xdc0] sm:$0xff] }
  0xbb   :  { %2358 = vmatpush1.bf16.msra.mxu1 %v2357_v60  ;;  %2104 = vmatprep.subr.bf16.mxu0 %v2103_v61  ;;  %v52_v60 = vld [vmem:[%s4615_s0 + $0xa0] sm:$0xff]  ;;  %v2377_v61 = vpack.c.bf16 %v470_v53, %v466_v51 }
  0xbc   :  { %2360 = vmatprep.subr.bf16.mxu1 %v2359_v1  ;;  %v474_v1 = vld [vmem:[%s4614_s1 + $0xcd0] sm:$0xff]  ;;  %v508_v51 = vld [vmem:[%s4614_s1 + $0xde0] sm:$0xff] }
  0xbd   :  { %v2381_v11 = vpack.c.bf16 %v478_v3, %v474_v1  ;;  %v521_v3 = vld [vmem:[%s4614_s1 + $0xe48] sm:$0xff] }
  0xbe   :  { %2106 = vmatpush1.bf16.msra.mxu0 %v2105_v7  ;;  %v487_v7 = vld [vmem:[%s4614_s1 + $0xd38] sm:$0xff] }
  0xbf   :  { %2362 = vmatpush1.bf16.msra.mxu1 %v2361_v8  ;;  %2108 = vmatprep.subr.bf16.mxu0 %v2107_v9  ;;  %v61_v8 = vld [vmem:[%s4615_s0 + $0xe8] sm:$0xff]  ;;  %v2125_v9 = vpack.c.bf16 %v476_v0, %v472_v63  ;;  %v2383_v16 = vpack.c.bf16 %v487_v7, %v483_v6  ;;  %v516_v63 = vld [vmem:[%s4614_s1 + $0xe20] sm:$0xff]  ;;  %v514_v0 = vld [vmem:[%s4614_s1 + $0xe10] sm:$0xff] }
  0xc0   :  { %2364 = vmatprep.subr.bf16.mxu1 %v2363_v13  ;;  %v480_v13 = vld [vmem:[%s4614_s1 + $0xd00] sm:$0xff]  ;;  %v527_v6 = vld [vmem:[%s4614_s1 + $0xe78] sm:$0xff] }
  0xc1   :  { %v2129_v23 = vpack.c.bf16 %v484_v14, %v480_v13  ;;  %v2403_v13 = vpack.c.bf16 %v527_v6, %v523_v5  ;;  %v526_v14 = vld [vmem:[%s4614_s1 + $0xe70] sm:$0xff]  ;;  %v560_v6 = vld [vmem:[%s4614_s1 + $0xf80] sm:$0xff] }
  0xc2   :  { %2110 = vmatpush1.bf16.msra.mxu0 %v2109_v19  ;;  %v493_v19 = vld [vmem:[%s4614_s1 + $0xd68] sm:$0xff] }
  0xc3   :  { %2366 = vmatpush1.bf16.msra.mxu1 %v2365_v20  ;;  %2112 = vmatprep.subr.bf16.mxu0 %v2111_v21  ;;  %v491_v20 = vld [vmem:[%s4614_s1 + $0xd58] sm:$0xff] }
  0xc4   :  { %2368 = vmatprep.subr.bf16.mxu1 %v2367_v25  ;;  %v495_v21 = vld [vmem:[%s4614_s1 + $0xd78] sm:$0xff]  ;;  %v2131_v25 = vpack.c.bf16 %v493_v19, %v489_v18 }
  0xc5   :  { %841 = vmatmul.mubr.f32.vlgmr.msra.gmra.mrb[0].mxu0 %v36_v31  ;;  %v2387_v29 = vpack.c.bf16 %v495_v21, %v491_v20  ;;  %v535_v18 = vld [vmem:[%s4614_s1 + $0xeb8] sm:$0xff] }
  0xc6   :  { %2114 = vmatpush1.bf16.msra.mxu0 %v2113_v32  ;;  %1197 = vmatmul.mubr.f32.vlgmr.msra.gmra.mrb[0].mxu1 %v36_v31  ;;  %v497_v31 = vld [vmem:[%s4614_s1 + $0xd88] sm:$0xff] }
  0xc7   :  { %2370 = vmatpush1.bf16.msra.mxu1 %v2369_v33  ;;  %2116 = vmatprep.subr.bf16.mxu0 %v2115_v34  ;;  %v501_v32 = vld [vmem:[%s4614_s1 + $0xda8] sm:$0xff]  ;;  %v499_v33 = vld [vmem:[%s4614_s1 + $0xd98] sm:$0xff] }
  0xc8   :  { %2372 = vmatprep.subr.bf16.mxu1 %v2371_v38  ;;  %846 = vmatprep.mubr.f32.mxu0 %v45_v44  ;;  %v503_v34 = vld [vmem:[%s4614_s1 + $0xdb8] sm:$0xff]  ;;  %v2135_v37 = vpack.c.bf16 %v501_v32, %v497_v31  ;;  %v496_v38 = vld [vmem:[%s4614_s1 + $0xd80] sm:$0xff] }
  0xc9   :  { %1202 = vmatprep.mubr.f32.mxu1 %v45_v44  ;;  %847 = vmatmul.mubr.f32.gmra.mrb[2].mxu0 %v44_v46  ;;  %v2391_v41 = vpack.c.bf16 %v503_v34, %v499_v33  ;;  %v509_v44 = vld [vmem:[%s4614_s1 + $0xde8] sm:$0xff]  ;;  %v2155_v33 = vpack.c.bf16 %v541_v28, %v537_v27  ;;  %v536_v34 = vld [vmem:[%s4614_s1 + $0xec0] sm:$0xff] }
  0xca   :  { %2118 = vmatpush1.bf16.msra.mxu0 %v2117_v45  ;;  %1203 = vmatmul.mubr.f32.gmra.mrb[2].mxu1 %v44_v46  ;;  %v507_v45 = vld [vmem:[%s4614_s1 + $0xdd8] sm:$0xff]  ;;  %v2139_v49 = vpack.c.bf16 %v509_v44, %v505_v43 }
  0xcb   :  { %2374 = vmatpush1.bf16.msra.mxu1 %v2373_v47  ;;  %2120 = vmatprep.subr.bf16.mxu0 %v2119_v48  ;;  %v511_v46 = vld [vmem:[%s4614_s1 + $0xdf8] sm:$0xff]  ;;  %v2137_v47 = vpack.c.bf16 %v500_v39, %v496_v38  ;;  %v2393_v48 = vpack.c.bf16 %v502_v42, %v498_v40  ;;  %v542_v38 = vld [vmem:[%s4614_s1 + $0xef0] sm:$0xff]  ;;  %v545_v39 = vld [vmem:[%s4614_s1 + $0xf08] sm:$0xff] }
  0xcc   :  { %2376 = vmatprep.subr.bf16.mxu1 %v2375_v52  ;;  %852 = vmatprep.mubr.f32.mxu0 %v53_v58  ;;  %v506_v52 = vld [vmem:[%s4614_s1 + $0xdd0] sm:$0xff]  ;;  %v2395_v53 = vpack.c.bf16 %v511_v46, %v507_v45  ;;  %v549_v40 = vld [vmem:[%s4614_s1 + $0xf28] sm:$0xff]  ;;  %v551_v42 = vld [vmem:[%s4614_s1 + $0xf38] sm:$0xff] }
  0xcd   :  { %1208 = vmatprep.mubr.f32.mxu1 %v53_v58  ;;  %853 = vmatmul.mubr.f32.gmra.mrb[4].mxu0 %v52_v60  ;;  %v519_v58 = vld [vmem:[%s4614_s1 + $0xe38] sm:$0xff]  ;;  %v2159_v45 = vpack.c.bf16 %v549_v40, %v545_v39  ;;  %v544_v46 = vld [vmem:[%s4614_s1 + $0xf00] sm:$0xff] }
  0xce   :  { %2122 = vmatpush1.bf16.msra.mxu0 %v2121_v59  ;;  %1209 = vmatmul.mubr.f32.gmra.mrb[4].mxu1 %v52_v60  ;;  %v2141_v59 = vpack.c.bf16 %v508_v51, %v504_v50  ;;  %v2397_v60 = vpack.c.bf16 %v510_v54, %v506_v52  ;;  %v2399_v1 = vpack.c.bf16 %v519_v58, %v515_v57  ;;  %v550_v50 = vld [vmem:[%s4614_s1 + $0xf30] sm:$0xff]  ;;  %v553_v51 = vld [vmem:[%s4614_s1 + $0xf48] sm:$0xff]  ;;  %v559_v54 = vld [vmem:[%s4614_s1 + $0xf78] sm:$0xff] }
  0xcf   :  { %2378 = vmatpush1.bf16.msra.mxu1 %v2377_v61  ;;  %2124 = vmatprep.subr.bf16.mxu0 %v2123_v62  ;;  %v2143_v61 = vpack.c.bf16 %v517_v56, %v513_v55  ;;  %v512_v62 = vld [vmem:[%s4614_s1 + $0xe00] sm:$0xff]  ;;  %v557_v52 = vld [vmem:[%s4614_s1 + $0xf68] sm:$0xff]  ;;  %v1389_v39 = vld [vmem:[%s4616_s3 + $0x198] sm:$0xff] }
  0xd0   :  { %2380 = vmatprep.subr.bf16.mxu1 %v2379_v2  ;;  %858 = vmatprep.mubr.f32.mxu0 %v61_v8  ;;  %v518_v2 = vld [vmem:[%s4614_s1 + $0xe30] sm:$0xff]  ;;  %v2145_v7 = vpack.c.bf16 %v516_v63, %v512_v62  ;;  %v2163_v57 = vpack.c.bf16 %v557_v52, %v553_v51  ;;  %v552_v58 = vld [vmem:[%s4614_s1 + $0xf40] sm:$0xff]  ;;  %v561_v63 = vld [vmem:[%s4614_s1 + $0xf88] sm:$0xff] }
  0xd1   :  { %1214 = vmatprep.mubr.f32.mxu1 %v61_v8  ;;  %859 = vmatmul.mubr.f32.gmra.mrb[6].mxu0 %v60_v10  ;;  %v2401_v8 = vpack.c.bf16 %v518_v2, %v514_v0  ;;  %v558_v62 = vld [vmem:[%s4614_s1 + $0xf70] sm:$0xff]  ;;  %v565_v0 = vld [vmem:[%s4614_s1 + $0xfa8] sm:$0xff]  ;;  %v567_v2 = vld [vmem:[%s4614_s1 + $0xfb8] sm:$0xff] }
  0xd2   :  { %2126 = vmatpush1.bf16.msra.mxu0 %v2125_v9  ;;  %1215 = vmatmul.mubr.f32.gmra.mrb[6].mxu1 %v60_v10  ;;  %v2147_v9 = vpack.c.bf16 %v525_v4, %v521_v3  ;;  %v520_v10 = vld [vmem:[%s4614_s1 + $0xe40] sm:$0xff]  ;;  %v2167_v5 = vpack.c.bf16 %v565_v0, %v561_v63  ;;  %v47_v40 = vld [vmem:[%s4615_s0 + $0x78] sm:$0xff]  ;;  %v46_v51 = vld [vmem:[%s4615_s0 + $0x70] sm:$0xff] }
  0xd3   :  { %2382 = vmatpush1.bf16.msra.mxu1 %v2381_v11  ;;  %2128 = vmatprep.subr.bf16.mxu0 %v2127_v12  ;;  %v524_v11 = vld [vmem:[%s4614_s1 + $0xe60] sm:$0xff]  ;;  %v522_v12 = vld [vmem:[%s4614_s1 + $0xe50] sm:$0xff]  ;;  %v1343_v63 = vld [vmem:[%s4616_s3 + $0x28] sm:$0xff] }
  0xd4   :  { %2384 = vmatprep.subr.bf16.mxu1 %v2383_v16  ;;  %929 = vmatprep.mubr.f32.mxu0 %v39_v22  ;;  %v533_v16 = vld [vmem:[%s4614_s1 + $0xea8] sm:$0xff]  ;;  %v2149_v19 = vpack.c.bf16 %v524_v11, %v520_v10  ;;  %v2405_v20 = vpack.c.bf16 %v526_v14, %v522_v12  ;;  %v566_v10 = vld [vmem:[%s4614_s1 + $0xfb0] sm:$0xff]  ;;  %v575_v14 = vld [vmem:[%s4614_s1 + $0xff8] sm:$0xff] }
  0xd5   :  { %1285 = vmatprep.mubr.f32.mxu1 %v39_v22  ;;  %v2151_v21 = vpack.c.bf16 %v533_v16, %v529_v15  ;;  %v528_v22 = vld [vmem:[%s4614_s1 + $0xe80] sm:$0xff]  ;;  %v569_v11 = vld [vmem:[%s4614_s1 + $0xfc8] sm:$0xff] }
  0xd6   :  { %2130 = vmatpush1.bf16.msra.mxu0 %v2129_v23  ;;  %v532_v23 = vld [vmem:[%s4614_s1 + $0xea0] sm:$0xff]  ;;  %v573_v12 = vld [vmem:[%s4614_s1 + $0xfe8] sm:$0xff] }
  0xd7   :  { %2386 = vmatpush1.bf16.msra.mxu1 %v2385_v24  ;;  %2132 = vmatprep.subr.bf16.mxu0 %v2131_v25  ;;  %v530_v24 = vld [vmem:[%s4614_s1 + $0xe90] sm:$0xff]  ;;  %v2407_v25 = vpack.c.bf16 %v535_v18, %v531_v17  ;;  %v2153_v31 = vpack.c.bf16 %v532_v23, %v528_v22  ;;  %v2171_v17 = vpack.c.bf16 %v573_v12, %v569_v11  ;;  %v568_v18 = vld [vmem:[%s4614_s1 + $0xfc0] sm:$0xff] }
  0xd8   :  { %2388 = vmatprep.subr.bf16.mxu1 %v2387_v29  ;;  %v539_v29 = vld [vmem:[%s4614_s1 + $0xed8] sm:$0xff]  ;;  %v2409_v32 = vpack.c.bf16 %v534_v26, %v530_v24  ;;  %v574_v22 = vld [vmem:[%s4614_s1 + $0xff0] sm:$0xff]  ;;  %v1354_v23 = vld [vmem:[%s4616_s3 + $0x80] sm:$0xff] }
  0xd9   :  { %v1355_v24 = vld [vmem:[%s4616_s3 + $0x88] sm:$0xff]  ;;  %v1390_v52 = vld [vmem:[%s4616_s3 + $0x1a0] sm:$0xff] }
  0xda   :  { %2134 = vmatpush1.bf16.msra.mxu0 %v2133_v35  ;;  %v540_v35 = vld [vmem:[%s4614_s1 + $0xee0] sm:$0xff]  ;;  %v1387_v26 = vld [vmem:[%s4616_s3 + $0x188] sm:$0xff] }
  0xdb   :  { %2390 = vmatpush1.bf16.msra.mxu1 %v2389_v36  ;;  %2136 = vmatprep.subr.bf16.mxu0 %v2135_v37  ;;  %v538_v36 = vld [vmem:[%s4614_s1 + $0xed0] sm:$0xff]  ;;  %v2411_v37 = vpack.c.bf16 %v543_v30, %v539_v29  ;;  %v2157_v43 = vpack.c.bf16 %v540_v35, %v536_v34  ;;  %v2431_v29 = vpack.c.bf16 %v1355_v24, %v1354_v23  ;;  %v1371_v34 = vld [vmem:[%s4616_s3 + $0x108] sm:$0xff]  ;;  %v1374_v0 = vld [vmem:[%s4616_s3 + $0x120] sm:$0xff] }
  0xdc   :  { %2392 = vmatprep.subr.bf16.mxu1 %v2391_v41  ;;  %v547_v41 = vld [vmem:[%s4614_s1 + $0xf18] sm:$0xff]  ;;  %v2413_v44 = vpack.c.bf16 %v542_v38, %v538_v36  ;;  %v1356_v35 = vld [vmem:[%s4616_s3 + $0x90] sm:$0xff] }
  0xdd   :  { %v1357_v36 = vld [vmem:[%s4616_s3 + $0x98] sm:$0xff]  ;;  %v1388_v38 = vld [vmem:[%s4616_s3 + $0x190] sm:$0xff] }
  0xde   :  { %2138 = vmatpush1.bf16.msra.mxu0 %v2137_v47  ;;  %v548_v47 = vld [vmem:[%s4614_s1 + $0xf20] sm:$0xff] }
  0xdf   :  { %2394 = vmatpush1.bf16.msra.mxu1 %v2393_v48  ;;  %2140 = vmatprep.subr.bf16.mxu0 %v2139_v49  ;;  %v546_v48 = vld [vmem:[%s4614_s1 + $0xf10] sm:$0xff]  ;;  %v2415_v49 = vpack.c.bf16 %v551_v42, %v547_v41  ;;  %v2161_v55 = vpack.c.bf16 %v548_v47, %v544_v46  ;;  %v2467_v47 = vpack.c.bf16 %v1389_v39, %v1388_v38  ;;  %v1381_v38 = vld [vmem:[%s4616_s3 + $0x158] sm:$0xff] }
  0xe0   :  { %2396 = vmatprep.subr.bf16.mxu1 %v2395_v53  ;;  %v555_v53 = vld [vmem:[%s4614_s1 + $0xf58] sm:$0xff]  ;;  %v2417_v56 = vpack.c.bf16 %v550_v50, %v546_v48  ;;  %v1372_v46 = vld [vmem:[%s4616_s3 + $0x110] sm:$0xff]  ;;  %v1359_v50 = vld [vmem:[%s4616_s3 + $0xa8] sm:$0xff] }
  0xe1   :  { %v1373_v48 = vld [vmem:[%s4616_s3 + $0x118] sm:$0xff] }
  0xe2   :  { %2142 = vmatpush1.bf16.msra.mxu0 %v2141_v59  ;;  %v556_v59 = vld [vmem:[%s4614_s1 + $0xf60] sm:$0xff] }
  0xe3   :  { %2398 = vmatpush1.bf16.msra.mxu1 %v2397_v60  ;;  %2144 = vmatprep.subr.bf16.mxu0 %v2143_v61  ;;  %v554_v60 = vld [vmem:[%s4614_s1 + $0xf50] sm:$0xff]  ;;  %v2419_v61 = vpack.c.bf16 %v559_v54, %v555_v53  ;;  %v2165_v3 = vpack.c.bf16 %v556_v59, %v552_v58  ;;  %v1391_v53 = vld [vmem:[%s4616_s3 + $0x1a8] sm:$0xff]  ;;  %v55_v54 = vld [vmem:[%s4615_s0 + $0xb8] sm:$0xff] }
  0xe4   :  { %2400 = vmatprep.subr.bf16.mxu1 %v2399_v1  ;;  %v563_v1 = vld [vmem:[%s4614_s1 + $0xf98] sm:$0xff]  ;;  %v2421_v4 = vpack.c.bf16 %v558_v62, %v554_v60  ;;  %v2471_v58 = vpack.c.bf16 %v1391_v53, %v1390_v52  ;;  %v54_v59 = vld [vmem:[%s4615_s0 + $0xb0] sm:$0xff]  ;;  %v1342_v62 = vld [vmem:[%s4616_s3 + $0x20] sm:$0xff] }
  0xe5   :  { %v63_v60 = vld [vmem:[%s4615_s0 + $0xf8] sm:$0xff]  ;;  %v1368_v52 = vld [vmem:[%s4616_s3 + $0xf0] sm:$0xff] }
  0xe6   :  { %2146 = vmatpush1.bf16.msra.mxu0 %v2145_v7  ;;  %v564_v7 = vld [vmem:[%s4614_s1 + $0xfa0] sm:$0xff]  ;;  %v1369_v53 = vld [vmem:[%s4616_s3 + $0xf8] sm:$0xff] }
  0xe7   :  { %2402 = vmatpush1.bf16.msra.mxu1 %v2401_v8  ;;  %2148 = vmatprep.subr.bf16.mxu0 %v2147_v9  ;;  %v562_v8 = vld [vmem:[%s4614_s1 + $0xf90] sm:$0xff]  ;;  %v2423_v9 = vpack.c.bf16 %v567_v2, %v563_v1  ;;  %v2169_v15 = vpack.c.bf16 %v564_v7, %v560_v6  ;;  %v2441_v1 = vpack.c.bf16 %v1343_v63, %v1342_v62  ;;  %v1375_v2 = vld [vmem:[%s4616_s3 + $0x128] sm:$0xff]  ;;  %v1385_v62 = vld [vmem:[%s4616_s3 + $0x178] sm:$0xff] }
  0xe8   :  { %2404 = vmatprep.subr.bf16.mxu1 %v2403_v13  ;;  %v571_v13 = vld [vmem:[%s4614_s1 + $0xfd8] sm:$0xff]  ;;  %v2425_v16 = vpack.c.bf16 %v566_v10, %v562_v8  ;;  %v1392_v6 = vld [vmem:[%s4616_s3 + $0x1b0] sm:$0xff] }
  0xe9   :  { %v1393_v8 = vld [vmem:[%s4616_s3 + $0x1b8] sm:$0xff] }
  0xea   :  { %2150 = vmatpush1.bf16.msra.mxu0 %v2149_v19  ;;  %v572_v19 = vld [vmem:[%s4614_s1 + $0xfe0] sm:$0xff]  ;;  %v1345_v10 = vld [vmem:[%s4616_s3 + $0x38] sm:$0xff]  ;;  %v2475_v11 = vpack.c.bf16 %v1393_v8, %v1392_v6 }
  0xeb   :  { %2406 = vmatpush1.bf16.msra.mxu1 %v2405_v20  ;;  %2152 = vmatprep.subr.bf16.mxu0 %v2151_v21  ;;  %v570_v20 = vld [vmem:[%s4614_s1 + $0xfd0] sm:$0xff]  ;;  %v2427_v21 = vpack.c.bf16 %v575_v14, %v571_v13  ;;  %v2173_v27 = vpack.c.bf16 %v572_v19, %v568_v18  ;;  %v1377_v14 = vld [vmem:[%s4616_s3 + $0x138] sm:$0xff]  ;;  %v1394_v18 = vld [vmem:[%s4616_s3 + $0x1c0] sm:$0xff] }
  0xec   :  { %2408 = vmatprep.subr.bf16.mxu1 %v2407_v25  ;;  %v1386_v25 = vld [vmem:[%s4616_s3 + $0x180] sm:$0xff]  ;;  %v2429_v28 = vpack.c.bf16 %v574_v22, %v570_v20  ;;  %v1376_v13 = vld [vmem:[%s4616_s3 + $0x130] sm:$0xff]  ;;  %v1395_v20 = vld [vmem:[%s4616_s3 + $0x1c8] sm:$0xff] }
  0xed   :  { %v2463_v30 = vpack.c.bf16 %v1387_v26, %v1386_v25  ;;  %v1347_v22 = vld [vmem:[%s4616_s3 + $0x48] sm:$0xff]  ;;  %v2479_v23 = vpack.c.bf16 %v1395_v20, %v1394_v18  ;;  %v1378_v25 = vld [vmem:[%s4616_s3 + $0x140] sm:$0xff] }
  0xee   :  { %2154 = vmatpush1.bf16.msra.mxu0 %v2153_v31  ;;  %v1338_v31 = vld [vmem:[%s4616_s3] sm:$0xff]  ;;  %v1379_v26 = vld [vmem:[%s4616_s3 + $0x148] sm:$0xff] }
  0xef   :  { %2410 = vmatpush1.bf16.msra.mxu1 %v2409_v32  ;;  %2156 = vmatprep.subr.bf16.mxu0 %v2155_v33  ;;  %v1339_v32 = vld [vmem:[%s4616_s3 + $0x8] sm:$0xff]  ;;  %v1370_v33 = vld [vmem:[%s4616_s3 + $0x100] sm:$0xff] }
  0xf0   :  { %2412 = vmatprep.subr.bf16.mxu1 %v2411_v37  ;;  %v38_v37 = vld [vmem:[%s4615_s0 + $0x30] sm:$0xff]  ;;  %v2433_v41 = vpack.c.bf16 %v1339_v32, %v1338_v31  ;;  %v2465_v42 = vpack.c.bf16 %v1371_v34, %v1370_v33  ;;  %v1397_v32 = vld [vmem:[%s4616_s3 + $0x1d8] sm:$0xff] }
  0xf1   :  { %v1348_v33 = vld [vmem:[%s4616_s3 + $0x50] sm:$0xff]  ;;  %v1349_v34 = vld [vmem:[%s4616_s3 + $0x58] sm:$0xff] }
  0xf2   :  { %2158 = vmatpush1.bf16.msra.mxu0 %v2157_v43  ;;  %v2435_v43 = vpack.c.bf16 %v1357_v36, %v1356_v35  ;;  %v2453_v36 = vpack.c.bf16 %v1349_v34, %v1348_v33 }
  0xf3   :  { %2414 = vmatpush1.bf16.msra.mxu1 %v2413_v44  ;;  %2160 = vmatprep.subr.bf16.mxu0 %v2159_v45  ;;  %v1340_v44 = vld [vmem:[%s4616_s3 + $0x10] sm:$0xff]  ;;  %v1341_v45 = vld [vmem:[%s4616_s3 + $0x18] sm:$0xff] }
  0xf4   :  { %2416 = vmatprep.subr.bf16.mxu1 %v2415_v49  ;;  %v1358_v49 = vld [vmem:[%s4616_s3 + $0xa0] sm:$0xff] }
  0xf6   :  { %2162 = vmatpush1.bf16.msra.mxu0 %v2161_v55  ;;  %v2437_v55 = vpack.c.bf16 %v1341_v45, %v1340_v44  ;;  %v1399_v44 = vld [vmem:[%s4616_s3 + $0x1e8] sm:$0xff]  ;;  %v1350_v45 = vld [vmem:[%s4616_s3 + $0x60] sm:$0xff] }
  0xf7   :  { %2418 = vmatpush1.bf16.msra.mxu1 %v2417_v56  ;;  %2164 = vmatprep.subr.bf16.mxu0 %v2163_v57  ;;  %v2469_v56 = vpack.c.bf16 %v1373_v48, %v1372_v46  ;;  %v2439_v57 = vpack.c.bf16 %v1359_v50, %v1358_v49  ;;  %v1351_v46 = vld [vmem:[%s4616_s3 + $0x68] sm:$0xff]  ;;  %v1382_v49 = vld [vmem:[%s4616_s3 + $0x160] sm:$0xff] }
  0xf8   :  { %2420 = vmatprep.subr.bf16.mxu1 %v2419_v61  ;;  %v62_v61 = vld [vmem:[%s4615_s0 + $0xf0] sm:$0xff]  ;;  %v2457_v48 = vpack.c.bf16 %v1351_v46, %v1350_v45  ;;  %v1383_v50 = vld [vmem:[%s4616_s3 + $0x168] sm:$0xff] }
  0xfa   :  { %2166 = vmatpush1.bf16.msra.mxu0 %v2165_v3  ;;  %v2473_v3 = vpack.c.bf16 %v1375_v2, %v1374_v0  ;;  %v2610_v0 = vmov 0.0|0.0  }
  0xfb   :  { %2422 = vmatpush1.bf16.msra.mxu1 %v2421_v4  ;;  %2168 = vmatprep.subr.bf16.mxu0 %v2167_v5  ;;  %v1360_v4 = vld [vmem:[%s4616_s3 + $0xb0] sm:$0xff]  ;;  %v1361_v5 = vld [vmem:[%s4616_s3 + $0xb8] sm:$0xff] }
  0xfc   :  { %2424 = vmatprep.subr.bf16.mxu1 %v2423_v9  ;;  %v2443_v7 = vpack.c.bf16 %v1361_v5, %v1360_v4  ;;  %v1344_v9 = vld [vmem:[%s4616_s3 + $0x30] sm:$0xff]  ;;  %v576_v4 = vld [vmem:[%s4617_s2] sm:$0xf] }
  0xfd   :  { %v2445_v12 = vpack.c.bf16 %v1345_v10, %v1344_v9 }
  0xfe   :  { %2170 = vmatpush1.bf16.msra.mxu0 %v2169_v15  ;;  %v2477_v15 = vpack.c.bf16 %v1377_v14, %v1376_v13 }
  0xff   :  { %2426 = vmatpush1.bf16.msra.mxu1 %v2425_v16  ;;  %2172 = vmatprep.subr.bf16.mxu0 %v2171_v17  ;;  %v1362_v16 = vld [vmem:[%s4616_s3 + $0xc0] sm:$0xff]  ;;  %v1363_v17 = vld [vmem:[%s4616_s3 + $0xc8] sm:$0xff] }
 0x100   :  { %2428 = vmatprep.subr.bf16.mxu1 %v2427_v21  ;;  %v2447_v19 = vpack.c.bf16 %v1363_v17, %v1362_v16  ;;  %v1346_v21 = vld [vmem:[%s4616_s3 + $0x40] sm:$0xff] }
 0x101   :  { %v2449_v24 = vpack.c.bf16 %v1347_v22, %v1346_v21 }
 0x102   :  { %2174 = vmatpush1.bf16.msra.mxu0 %v2173_v27  ;;  %v2481_v27 = vpack.c.bf16 %v1379_v26, %v1378_v25 }
 0x103   :  { %2430 = vmatpush1.bf16.msra.mxu1 %v2429_v28  ;;  %2432 = vmatprep.subr.bf16.mxu0 %v2431_v29  ;;  %v1364_v28 = vld [vmem:[%s4616_s3 + $0xd0] sm:$0xff]  ;;  %v1365_v29 = vld [vmem:[%s4616_s3 + $0xd8] sm:$0xff] }
 0x104   :  { %2464 = vmatprep.subr.bf16.mxu1 %v2463_v30  ;;  %v1396_v30 = vld [vmem:[%s4616_s3 + $0x1d0] sm:$0xff]  ;;  %v2451_v31 = vpack.c.bf16 %v1365_v29, %v1364_v28 }
 0x105   :  { %930 = vmatmul.mubr.f32.vlgmr.msra.gmra.mrb[0].mxu0 %v38_v37  ;;  %v2483_v35 = vpack.c.bf16 %v1397_v32, %v1396_v30 }
 0x106   :  { %1286 = vmatmul.mubr.f32.vlgmr.msra.gmra.mrb[0].mxu1 %v38_v37  ;;  %935 = vmatprep.mubr.f32.mxu0 %v47_v40  ;;  %v1380_v37 = vld [vmem:[%s4616_s3 + $0x150] sm:$0xff] }
 0x107   :  { %1291 = vmatprep.mubr.f32.mxu1 %v47_v40  ;;  %2434 = vmatpush3.bf16.msra.mxu0 %v2433_v41  ;;  %v2485_v39 = vpack.c.bf16 %v1381_v38, %v1380_v37  ;;  %v1366_v40 = vld [vmem:[%s4616_s3 + $0xe0] sm:$0xff]  ;;  %v1367_v41 = vld [vmem:[%s4616_s3 + $0xe8] sm:$0xff] }
 0x108   :  { %2466 = vmatpush3.bf16.msra.mxu1 %v2465_v42  ;;  %2436 = vmatprep.subr.bf16.mxu0 %v2435_v43  ;;  %v1398_v42 = vld [vmem:[%s4616_s3 + $0x1e0] sm:$0xff]  ;;  %v2455_v43 = vpack.c.bf16 %v1367_v41, %v1366_v40 }
 0x109   :  { %936 = vmatmul.mubr.f32.gmra.mrb[2].mxu0 %v46_v51  ;;  %2468 = vmatprep.subr.bf16.mxu1 %v2467_v47  ;;  %v2487_v47 = vpack.c.bf16 %v1399_v44, %v1398_v42 }
 0x10a   :  { %1292 = vmatmul.mubr.f32.gmra.mrb[2].mxu1 %v46_v51  ;;  %941 = vmatprep.mubr.f32.mxu0 %v55_v54  ;;  %v2489_v51 = vpack.c.bf16 %v1383_v50, %v1382_v49 }
 0x10b   :  { %1297 = vmatprep.mubr.f32.mxu1 %v55_v54  ;;  %2438 = vmatpush3.bf16.msra.mxu0 %v2437_v55  ;;  %v1400_v54 = vld [vmem:[%s4616_s3 + $0x1f0] sm:$0xff]  ;;  %v2459_v55 = vpack.c.bf16 %v1369_v53, %v1368_v52 }
 0x10c   :  { %2470 = vmatpush3.bf16.msra.mxu1 %v2469_v56  ;;  %2440 = vmatprep.subr.bf16.mxu0 %v2439_v57  ;;  %v1401_v56 = vld [vmem:[%s4616_s3 + $0x1f8] sm:$0xff]  ;;  %v1352_v57 = vld [vmem:[%s4616_s3 + $0x70] sm:$0xff] }
 0x10d   :  { %942 = vmatmul.mubr.f32.gmra.mrb[4].mxu0 %v54_v59  ;;  %2472 = vmatprep.subr.bf16.mxu1 %v2471_v58  ;;  %v1353_v58 = vld [vmem:[%s4616_s3 + $0x78] sm:$0xff] }
 0x10e   :  { %1298 = vmatmul.mubr.f32.gmra.mrb[4].mxu1 %v54_v59  ;;  %947 = vmatprep.mubr.f32.mxu0 %v63_v60  ;;  %v2491_v59 = vpack.c.bf16 %v1401_v56, %v1400_v54 }
 0x10f   :  { %1303 = vmatprep.mubr.f32.mxu1 %v63_v60  ;;  %2442 = vmatpush3.bf16.msra.mxu0 %v2441_v1  ;;  %v2461_v60 = vpack.c.bf16 %v1353_v58, %v1352_v57  ;;  %v578_v1 = vlaneseq }
 0x110   :  { %2474 = vmatpush3.bf16.msra.mxu1 %v2473_v3  ;;  %2444 = vmatprep.subr.bf16.mxu0 %v2443_v7 }
 0x111   :  { %948 = vmatmul.mubr.f32.gmra.mrb[6].mxu0 %v62_v61  ;;  %2476 = vmatprep.subr.bf16.mxu1 %v2475_v11  ;;  %v579_v2 = vshrl.u32 %v578_v1, 7 }
 0x112   :  { %1304 = vmatmul.mubr.f32.gmra.mrb[6].mxu1 %v62_v61  ;;  %v1384_v61 = vld [vmem:[%s4616_s3 + $0x170] sm:$0xff] }
 0x113   :  { %2446 = vmatpush3.bf16.msra.mxu0 %v2445_v12  ;;  %v2493_v63 = vpack.c.bf16 %v1385_v62, %v1384_v61  ;;  %v580_v3 = vsub.s32 0, %v579_v2  ;;  %v588_v5 = vsub.s32 2, %v579_v2  ;;  %v584_v6 = vsub.s32 1, %v579_v2 }
 0x114   :  { %2478 = vmatpush3.bf16.msra.mxu1 %v2477_v15  ;;  %2448 = vmatprep.subr.bf16.mxu0 %v2447_v19  ;;  %v592_v7 = vsub.s32 3, %v579_v2  ;;  %v1550_v2 = vld [vmem:[%s4618_s5] sm:$0xff] }
 0x115   :  { %2480 = vmatprep.subr.bf16.mxu1 %v2479_v23  ;;  %v581_v8 = vrot.slane %v576_v4, %v580_v3  ;;  %v589_v10 = vrot.slane %v576_v4, %v588_v5  ;;  %v585_v11 = vrot.slane %v576_v4, %v584_v6  ;;  %v1551_v3 = vld [vmem:[%s4618_s5 + $0x8] sm:$0xff] }
 0x116   :  { %v593_v14 = vrot.slane %v576_v4, %v592_v7 }
 0x117   :  { %2450 = vmatpush3.bf16.msra.mxu0 %v2449_v24 }
 0x118   :  { %2482 = vmatpush3.bf16.msra.mxu1 %v2481_v27  ;;  %2452 = vmatprep.subr.bf16.mxu0 %v2451_v31 }
 0x119   :  { %2484 = vmatprep.subr.bf16.mxu1 %v2483_v35 }
 0x11b   :  { %2454 = vmatpush3.bf16.msra.mxu0 %v2453_v36 }
 0x11c   :  { %2486 = vmatpush3.bf16.msra.mxu1 %v2485_v39  ;;  %2456 = vmatprep.subr.bf16.mxu0 %v2455_v43 }
 0x11d   :  { %2488 = vmatprep.subr.bf16.mxu1 %v2487_v47 }
 0x11f   :  { %2458 = vmatpush3.bf16.msra.mxu0 %v2457_v48 }
 0x120   :  { %2490 = vmatpush3.bf16.msra.mxu1 %v2489_v51  ;;  %2460 = vmatprep.subr.bf16.mxu0 %v2459_v55 }
 0x121   :  { %2492 = vmatprep.subr.bf16.mxu1 %v2491_v59 }
 0x123   :  { %2462 = vmatpush3.bf16.msra.mxu0 %v2461_v60 }
 0x124   :  { %2494 = vmatpush3.bf16.msra.mxu1 %v2493_v63  ;;  %2495 = vmatprep.subr.bf16.mxu0 %v2610_v0 }
 0x125   :  { %2519 = vmatprep.subr.bf16.mxu1 %v2610_v0 }
 0x1d8   :  { %v931_v9 = vpop.f32.mrb[0].mxu0 }
 0x1d9   :  { %v1287_v12 = vpop.f32.mrb[0].mxu1  ;;  %v933_v13 = vpop.f32.mrb[1].mxu0  ;;  %v2543_v16 = vadd.f32 %v931_v9, %v581_v8 }
 0x1da   :  { %v1289_v15 = vpop.f32.mrb[1].mxu1  ;;  %v2551_v17 = vadd.f32 %v1287_v12, %v589_v10  ;;  %v2544_v18 = vadd.f32 %v933_v13, %v585_v11  ;;  %v1552_v12 = vld [vmem:[%s4618_s5 + $0x10] sm:$0xff]  ;;  %v1553_v13 = vld [vmem:[%s4618_s5 + $0x18] sm:$0xff] }
 0x1db   :  { %v2552_v20 = vadd.f32 %v1289_v15, %v593_v14  ;;  %v1310_v27 = vmax.f32 %v2543_v16, 0.0  ;;  %v1554_v15 = vld [vmem:[%s4618_s5 + $0x20] sm:$0xff]  ;;  %v1555_v16 = vld [vmem:[%s4618_s5 + $0x28] sm:$0xff] }
 0x1dc   :  { %v937_v19 = vpop.f32.mrb[2].mxu0  ;;  %v1312_v30 = vmax.f32 %v2551_v17, 0.0  ;;  %v1311_v31 = vmax.f32 %v2544_v18, 0.0  ;;  %v2502_v17 = vpack.c.bf16 %v1555_v16, %v1554_v15  ;;  %v1556_v18 = vld [vmem:[%s4618_s5 + $0x30] sm:$0xff] }
 0x1dd   :  { %v2545_v21 = vadd.f32 %v937_v19, %v581_v8  ;;  %v1293_v22 = vpop.f32.mrb[2].mxu1  ;;  %v939_v23 = vpop.f32.mrb[3].mxu0  ;;  %v1313_v35 = vmax.f32 %v2552_v20, 0.0  ;;  %v1557_v19 = vld [vmem:[%s4618_s5 + $0x38] sm:$0xff] }
 0x1de   :  { %v2553_v24 = vadd.f32 %v1293_v22, %v589_v10  ;;  %v2546_v25 = vadd.f32 %v939_v23, %v585_v11  ;;  %v1295_v26 = vpop.f32.mrb[3].mxu1  ;;  %v2505_v20 = vpack.c.bf16 %v1557_v19, %v1556_v18  ;;  %v1559_v22 = vld [vmem:[%s4618_s5 + $0x48] sm:$0xff] }
 0x1df   :  { %v1314_v28 = vmax.f32 %v2545_v21, 0.0  ;;  %v2554_v29 = vadd.f32 %v1295_v26, %v593_v14  ;;  %v1558_v21 = vld [vmem:[%s4618_s5 + $0x40] sm:$0xff] }
 0x1e0   :  { %v1316_v32 = vmax.f32 %v2553_v24, 0.0  ;;  %v1315_v33 = vmax.f32 %v2546_v25, 0.0  ;;  %v943_v34 = vpop.f32.mrb[4].mxu0  ;;  %v2508_v23 = vpack.c.bf16 %v1559_v22, %v1558_v21  ;;  %v1560_v24 = vld [vmem:[%s4618_s5 + $0x50] sm:$0xff]  ;;  %v1561_v25 = vld [vmem:[%s4618_s5 + $0x58] sm:$0xff] }
 0x1e1   :  { %v1326_v36 = vmax.f32 %v1310_v27, %v1314_v28  ;;  %v1317_v37 = vmax.f32 %v2554_v29, 0.0  ;;  %v1299_v38 = vpop.f32.mrb[4].mxu1  ;;  %v945_v39 = vpop.f32.mrb[5].mxu0  ;;  %v2547_v44 = vadd.f32 %v943_v34, %v581_v8  ;;  %v2511_v26 = vpack.c.bf16 %v1561_v25, %v1560_v24  ;;  %v1562_v27 = vld [vmem:[%s4618_s5 + $0x60] sm:$0xff]  ;;  %v1563_v28 = vld [vmem:[%s4618_s5 + $0x68] sm:$0xff] }
 0x1e2   :  { %v1328_v40 = vmax.f32 %v1312_v30, %v1316_v32  ;;  %v1327_v41 = vmax.f32 %v1311_v31, %v1315_v33  ;;  %v1301_v42 = vpop.f32.mrb[5].mxu1  ;;  %v2555_v45 = vadd.f32 %v1299_v38, %v589_v10  ;;  %v2548_v46 = vadd.f32 %v945_v39, %v585_v11  ;;  %v1564_v30 = vld [vmem:[%s4618_s5 + $0x70] sm:$0xff]  ;;  %v1565_v31 = vld [vmem:[%s4618_s5 + $0x78] sm:$0xff]  ;;  %v1644_v34 = vld [vmem:[%s4619_s7] sm:$0xff] }
 0x1e3   :  { %v1329_v43 = vmax.f32 %v1313_v35, %v1317_v37  ;;  %v2556_v48 = vadd.f32 %v1301_v42, %v593_v14  ;;  %v1318_v55 = vmax.f32 %v2547_v44, 0.0  ;;  %v2514_v29 = vpack.c.bf16 %v1563_v28, %v1562_v27  ;;  %v1645_v35 = vld [vmem:[%s4619_s7 + $0x8] sm:$0xff]  ;;  %v1647_v38 = vld [vmem:[%s4619_s7 + $0x18] sm:$0xff] }
 0x1e4   :  { %v949_v47 = vpop.f32.mrb[6].mxu0  ;;  %v1320_v58 = vmax.f32 %v2555_v45, 0.0  ;;  %v1319_v59 = vmax.f32 %v2548_v46, 0.0  ;;  %v2517_v32 = vpack.c.bf16 %v1565_v31, %v1564_v30  ;;  %v2612_v33 = vmov 0.0   ;;  %v1651_v44 = vld [vmem:[%s4619_s7 + $0x38] sm:$0xff]  ;;  %v1652_v46 = vld [vmem:[%s4619_s7 + $0x40] sm:$0xff] }
 0x1e5   :  { %v2549_v49 = vadd.f32 %v949_v47, %v581_v8  ;;  %v1305_v50 = vpop.f32.mrb[6].mxu1  ;;  %v951_v51 = vpop.f32.mrb[7].mxu0  ;;  %v1321_v62 = vmax.f32 %v2556_v48, 0.0  ;;  %v2520_v37 = vpack.c.bf16 %v1645_v35, %v1644_v34  ;;  %v1653_v47 = vld [vmem:[%s4619_s7 + $0x48] sm:$0xff] }
 0x1e6   :  { %v2557_v52 = vadd.f32 %v1305_v50, %v589_v10  ;;  %v2550_v53 = vadd.f32 %v951_v51, %v585_v11  ;;  %v1307_v54 = vpop.f32.mrb[7].mxu1  ;;  %v2496_v10 = vpack.c.bf16 %v1551_v3, %v1550_v2  ;;  %v2532_v48 = vpack.c.bf16 %v1653_v47, %v1652_v46  ;;  %v1655_v50 = vld [vmem:[%s4619_s7 + $0x58] sm:$0xff]  ;;  %v1658_v2 = vld [vmem:[%s4619_s7 + $0x70] sm:$0xff] }
 0x1e7   :  { %v1322_v56 = vmax.f32 %v2549_v49, 0.0  ;;  %v2558_v57 = vadd.f32 %v1307_v54, %v593_v14  ;;  %v2499_v14 = vpack.c.bf16 %v1553_v13, %v1552_v12  ;;  %v1654_v49 = vld [vmem:[%s4619_s7 + $0x50] sm:$0xff] }
 0x1e8   :  { %v1324_v60 = vmax.f32 %v2557_v52, 0.0  ;;  %v1323_v61 = vmax.f32 %v2550_v53, 0.0  ;;  %v2535_v51 = vpack.c.bf16 %v1655_v50, %v1654_v49  ;;  %v1656_v52 = vld [vmem:[%s4619_s7 + $0x60] sm:$0xff]  ;;  %v1657_v53 = vld [vmem:[%s4619_s7 + $0x68] sm:$0xff] }
 0x1e9   :  { %v1330_v63 = vmax.f32 %v1318_v55, %v1322_v56  ;;  %v1325_v1 = vmax.f32 %v2558_v57, 0.0  ;;  %v2538_v54 = vpack.c.bf16 %v1657_v53, %v1656_v52  ;;  %v1742_v57 = vld [vmem:[%s4620_s4] ss:$0 sm:$0xff] }
 0x1ea   :  { %v1332_v4 = vmax.f32 %v1320_v58, %v1324_v60  ;;  %v1331_v5 = vmax.f32 %v1319_v59, %v1323_v61 }
 0x1eb   :  { %v1334_v6 = vmax.f32 %v1326_v36, %v1330_v63  ;;  %v1333_v7 = vmax.f32 %v1321_v62, %v1325_v1  ;;  %v1646_v36 = vld [vmem:[%s4619_s7 + $0x10] sm:$0xff] }
 0x1ec   :  { %v1336_v8 = vmax.f32 %v1328_v40, %v1332_v4  ;;  %v1335_v9 = vmax.f32 %v1327_v41, %v1331_v5  ;;  %v2523_v39 = vpack.c.bf16 %v1647_v38, %v1646_v36  ;;  %v1648_v40 = vld [vmem:[%s4619_s7 + $0x20] sm:$0xff]  ;;  %v1649_v41 = vld [vmem:[%s4619_s7 + $0x28] sm:$0xff] }
 0x1ed   :  { %v1337_v11 = vmax.f32 %v1329_v43, %v1333_v7  ;;  %v2526_v42 = vpack.c.bf16 %v1649_v41, %v1648_v40  ;;  %v1650_v43 = vld [vmem:[%s4619_s7 + $0x30] sm:$0xff]  ;;  %v1743_v4 = vld [vmem:[%s4621_s6] ss:$0 sm:$0xff] }
 0x1ee   :  { %1473 = vmatprep.mubr.f32.mxu0 %v1335_v9  ;;  %v2529_v45 = vpack.c.bf16 %v1651_v44, %v1650_v43  ;;  %v1744_v9 = vld [vmem:[%s4622_s8] ss:$0 sm:$0xff] }
 0x1ef   :  { %1543 = vmatprep.mubr.f32.mxu1 %v1337_v11  ;;  %1474 = vmatmul.mubr.f32.vlgmr.msra.gmra.mrb[8].mxu0 %v1334_v6 }
 0x1f0   :  { %1544 = vmatmul.mubr.f32.vlgmr.msra.gmra.mrb[8].mxu1 %v1336_v8  ;;  %2497 = vmatpush3.bf16.msra.mxu0 %v2496_v10 }
 0x1f1   :  { %2498 = vmatprep.subr.bf16.mxu0 %v2610_v0  ;;  %1881 = vmatprep.mubr.msk.f32.mxu0 %vm2611_vm0, %v2612_v33 }
 0x1f2   :  { %1916 = vmatprep.mubr.msk.f32.mxu1 %vm2611_vm0, %v2612_v33  ;;  %2521 = vmatpush3.bf16.msra.mxu1 %v2520_v37 }
 0x1f3   :  { %2522 = vmatprep.subr.bf16.mxu1 %v2610_v0 }
 0x1f4   :  { %2500 = vmatpush3.bf16.msra.mxu0 %v2499_v14 }
 0x1f5   :  { %2501 = vmatprep.subr.bf16.mxu0 %v2610_v0 }
 0x1f6   :  { %2524 = vmatpush3.bf16.msra.mxu1 %v2523_v39 }
 0x1f7   :  { %2525 = vmatprep.subr.bf16.mxu1 %v2610_v0 }
 0x1f8   :  { %2503 = vmatpush3.bf16.msra.mxu0 %v2502_v17 }
 0x1f9   :  { %2504 = vmatprep.subr.bf16.mxu0 %v2610_v0 }
 0x1fa   :  { %2527 = vmatpush3.bf16.msra.mxu1 %v2526_v42 }
 0x1fb   :  { %2528 = vmatprep.subr.bf16.mxu1 %v2610_v0 }
 0x1fc   :  { %2506 = vmatpush3.bf16.msra.mxu0 %v2505_v20 }
 0x1fd   :  { %2507 = vmatprep.subr.bf16.mxu0 %v2610_v0 }
 0x1fe   :  { %2530 = vmatpush3.bf16.msra.mxu1 %v2529_v45 }
 0x1ff   :  { %2531 = vmatprep.subr.bf16.mxu1 %v2610_v0 }
 0x200   :  { %2509 = vmatpush3.bf16.msra.mxu0 %v2508_v23 }
 0x201   :  { %2510 = vmatprep.subr.bf16.mxu0 %v2610_v0 }
 0x202   :  { %2533 = vmatpush3.bf16.msra.mxu1 %v2532_v48 }
 0x203   :  { %2534 = vmatprep.subr.bf16.mxu1 %v2610_v0 }
 0x204   :  { %2512 = vmatpush3.bf16.msra.mxu0 %v2511_v26 }
 0x205   :  { %2513 = vmatprep.subr.bf16.mxu0 %v2610_v0 }
 0x206   :  { %2536 = vmatpush3.bf16.msra.mxu1 %v2535_v51 }
 0x207   :  { %2537 = vmatprep.subr.bf16.mxu1 %v2610_v0 }
 0x208   :  { %2515 = vmatpush3.bf16.msra.mxu0 %v2514_v29 }
 0x209   :  { %2516 = vmatprep.subr.bf16.mxu0 %v2610_v0 }
 0x20a   :  { %2539 = vmatpush3.bf16.msra.mxu1 %v2538_v54 }
 0x20b   :  { %2540 = vmatprep.subr.bf16.mxu1 %v2610_v0  ;;  %v1659_v0 = vld [vmem:[%s4619_s7 + $0x78] sm:$0xff] }
 0x20c   :  { %2518 = vmatpush3.bf16.msra.mxu0 %v2517_v32  ;;  %v2541_v3 = vpack.c.bf16 %v1659_v0, %v1658_v2 }
 0x20e   :  { %2542 = vmatpush3.bf16.msra.mxu1 %v2541_v3 }
 0x2c2   :  { %v1777_v55 = vpop.f32.mrb[8].mxu0 }
 0x2c3   :  { %v1812_v56 = vpop.f32.mrb[8].mxu1  ;;  %v1778_v58 = vpop.f32.mrb[9].mxu0 }
 0x2c4   :  { %v1779_v59 = vadd.f32 %v1778_v58, %v1777_v55  ;;  %v1813_v60 = vpop.f32.mrb[9].mxu1 }
 0x2c5   :  { %v1814_v61 = vadd.f32 %v1813_v60, %v1812_v56 }
 0x2c6   :  { %v1476_v62 = vadd.f32 %v1779_v59, %v1742_v57 }
 0x2c8   :  { %v1546_v63 = vadd.f32 %v1814_v61, %v1476_v62 }
 0x2ca   :  { %v1549_v1 = vmax.f32 %v1546_v63, 0.0 }
 0x2cc   :  { %1882 = vmatmul.mubr.f32.vlgmr.msra.gmra.mrb[10].mxu0 %v1549_v1 }
 0x39f   :  { %v1639_v5 = vpop.f32.mrb[10].mxu0 }
 0x3a0   :  { %v1640_v6 = vadd.f32 %v1743_v4, %v1639_v5  ;;  %v1883_v7 = vpop.f32.mrb[11].mxu0 }
 0x3a2   :  { %v1643_v8 = vmax.f32 %v1640_v6, 0.0 }
 0x3a4   :  { %1917 = vmatmul.mubr.f32.vlgmr.msra.gmra.mrb[10].mxu1 %v1643_v8 }
 0x477   :  { %v1733_v10 = vpop.f32.mrb[10].mxu1 }
 0x478   :  { %v1734_v11 = vadd.f32 %v1744_v9, %v1733_v10  ;;  %v1918_v12 = vpop.f32.mrb[11].mxu1 }
 0x47a   :  { %1737 = vst [vmem:[%s4623_s9] sm:$0xff] %v1734_v11 }

</bundles_post_ra>
